<compile_context>
chip_gen: v6e
topology: v6e:2x2x1
jax: 0.10.0
libtpu: 0.0.40
codegen_flags: <defaults>
</compile_context>

<pallas_src>
import functools

import jax
import jax.numpy as jnp
from jax.experimental import pallas as pl
from jax.experimental.pallas import tpu as pltpu


def _round_up(x, m):
    return ((x + m - 1) // m) * m


def conv3x3_relu_kernel(x_ref, w_ref, b_ref, o_ref, xp_ref, acc_ref, *,
                        weights_resident):
    # x_ref:   (1, H, W, C)              bf16  combined [dec, enc] activations (NHWC)
    # w_ref:   (n_co|1, 3, 3, C, TCO)    bf16  HWIO weights grouped by Cout tile
    # b_ref:   (1, 1, TCO)               f32
    # o_ref:   (1, H, W, TCO)            f32
    # xp_ref:  (H+2, Wp, C)              bf16  zero-padded image (persists across co)
    # acc_ref: (H*Wp, TCO)               f32   accumulator
    H, W = o_ref.shape[1], o_ref.shape[2]
    TCO = o_ref.shape[3]
    Hp, Wp, C = xp_ref.shape
    HW = H * Wp

    co = pl.program_id(1)

    # Refill the padded image only when the batch element changes (co == 0).
    # Only the pad regions are zeroed; the interior is fully overwritten.  This is
    # correct even when the batch axis is sharded across TensorCores, because the
    # pads are re-zeroed on every co == 0 (cheap) rather than only on n == 0.
    @pl.when(co == 0)
    def _fill():
        zrow = jnp.zeros((1, Wp, C), dtype=xp_ref.dtype)
        xp_ref[0:1, :, :] = zrow                                   # top pad row
        xp_ref[H + 1:H + 2, :, :] = zrow                           # bottom pad row
        xp_ref[1:H + 1, W:Wp, :] = jnp.zeros((H, Wp - W, C), dtype=xp_ref.dtype)
        # Interior: row offset 1 is an outer-dim offset (free); columns start at 0
        # (aligned) -> no sublane relayout; bf16 -> bf16, no cast.
        xp_ref[1:H + 1, 0:W, :] = x_ref[0]

    w_i = co if weights_resident else 0

    # Bias-initialized accumulator (no separate epilogue bias pass).
    acc_ref[...] = jnp.broadcast_to(b_ref[0], (HW, TCO))

    for kw in range(3):
        # Column shift applied to the f32 product on the XLU; the wrap lands only on
        # zero-pad columns (left edge) or on discarded >=W columns (right edge).
        shift = (1 - kw) % HW
        for kh in range(3):
            # Row shift = pure outer-dim window on the scratch ref (free, aligned);
            # Wp % 16 == 0 keeps the (H, Wp, C) -> (H*Wp, C) reshape layout-preserving.
            lhs = xp_ref[kh:kh + H, :, :].reshape(HW, C)
            p = jnp.dot(lhs, w_ref[w_i, kh, kw],
                        preferred_element_type=jnp.float32)
            if shift:
                p = pltpu.roll(p, shift=shift, axis=0)
            acc_ref[...] += p

    y = jnp.maximum(acc_ref[...], 0.0).reshape(H, Wp, TCO)
    o_ref[0] = y[:, 0:W, :].astype(o_ref.dtype)   # lane-dense (TCO % 128 == 0) store


@jax.jit
def conv_bottleneck(dec, enc, weight, bias):
    """dec: (N, C1, H, W), enc: (N, C2, H, W) f32; weight: (Cout, C1+C2, 3, 3); bias: (Cout,)."""
    N, C1, H, W = dec.shape
    C2 = enc.shape[1]
    C = C1 + C2
    Cout, Cin = weight.shape[0], weight.shape[1]
    assert Cin == C

    TCO = 256 if Cout > 128 else 128      # 256 matches the v6e/v7x MXU; 128 minimum tile
    COP = _round_up(Cout, TCO)
    n_co = COP // TCO
    Hp = H + 2
    Wp = _round_up(W + 2, 16)             # bf16 sublane pack = 16

    # NCHW -> NHWC + channel concat + bf16 cast in one wrapper copy (concat just
    # targets adjoining lane ranges of the same buffer -> same HBM bytes as two
    # separate transposes, and it doubles the matmul K inside the kernel).
    # TODO(synk): if the surrounding model keeps NHWC bf16 activations, this copy and
    # the output transpose below (full HBM passes each) disappear entirely.
    x = jnp.concatenate(
        [jnp.transpose(dec, (0, 2, 3, 1)), jnp.transpose(enc, (0, 2, 3, 1))],
        axis=-1).astype(jnp.bfloat16)

    # OIHW -> HWIO, pad Cout to a lane-dense multiple of TCO, regroup per Cout tile.
    w = jnp.transpose(weight, (2, 3, 1, 0))                 # (3, 3, C, Cout)
    b = bias
    if COP != Cout:
        w = jnp.pad(w, ((0, 0), (0, 0), (0, 0), (0, COP - Cout)))
        b = jnp.pad(b, (0, COP - Cout))
    w = w.reshape(3, 3, C, n_co, TCO).transpose(3, 0, 1, 2, 4).astype(jnp.bfloat16)
    b = b.reshape(n_co, 1, TCO).astype(jnp.float32)

    # Keep the whole weight resident in VMEM (DMA'd once for the whole grid) when it
    # fits; otherwise stream one Cout tile per grid step.
    w_bytes = 9 * C * COP * 2
    weights_resident = w_bytes <= 6 * 1024 * 1024
    if weights_resident:
        w_spec = pl.BlockSpec((n_co, 3, 3, C, TCO), lambda n, co: (0, 0, 0, 0, 0))
    else:
        w_spec = pl.BlockSpec((1, 3, 3, C, TCO), lambda n, co: (co, 0, 0, 0, 0))

    # Size the VMEM limit to the actual working set; cap at 48 MiB (v7x headroom).
    work_bytes = (Hp * Wp * C * 2 + H * Wp * TCO * 4          # scratches
                  + 2 * H * W * C * 2                         # x, double-buffered
                  + 2 * (w_bytes if weights_resident else 9 * C * TCO * 2)
                  + 2 * H * W * TCO * 4                       # out, double-buffered
                  + 2 * TCO * 4)                              # bias
    vmem_limit = int(min(48 * 1024 * 1024, max(16 * 1024 * 1024, 2 * work_bytes)))

    cost = pl.CostEstimate(
        flops=2 * N * H * W * 9 * C * COP,
        transcendentals=0,
        bytes_accessed=N * H * W * C * 2 + w_bytes + COP * 4 + N * H * W * COP * 4)

    out_nhwc = pl.pallas_call(
        functools.partial(conv3x3_relu_kernel, weights_resident=weights_resident),
        out_shape=jax.ShapeDtypeStruct((N, H, W, COP), jnp.float32),
        grid_spec=pltpu.PrefetchScalarGridSpec(
            num_scalar_prefetch=0,
            grid=(N, n_co),
            in_specs=[
                pl.BlockSpec((1, H, W, C), lambda n, co: (n, 0, 0, 0)),
                w_spec,
                pl.BlockSpec((1, 1, TCO), lambda n, co: (co, 0, 0)),
            ],
            out_specs=pl.BlockSpec((1, H, W, TCO), lambda n, co: (n, 0, 0, co)),
            scratch_shapes=[
                pltpu.VMEM((Hp, Wp, C), jnp.bfloat16),
                pltpu.VMEM((H * Wp, TCO), jnp.float32),
            ],
        ),
        compiler_params=pltpu.CompilerParams(
            dimension_semantics=("parallel", "arbitrary"),
            vmem_limit_bytes=vmem_limit,
        ),
        cost_estimate=cost,
    )(x, w, b)

    if COP != Cout:
        out_nhwc = out_nhwc[..., :Cout]
    # TODO(synk): drop this transpose (full HBM pass) if the consumer accepts NHWC.
    return jnp.transpose(out_nhwc, (0, 3, 1, 2))


def conv_bottleneck_ref(dec, enc, weight, bias):
    """Pure-JAX reference (NCHW conv), for correctness check."""
    x = jnp.concatenate([dec, enc], axis=1)
    y = jax.lax.conv_general_dilated(
        x, weight, window_strides=(1, 1), padding=((1, 1), (1, 1)),
        dimension_numbers=("NCHW", "OIHW", "NCHW"))
    return jnp.maximum(y + bias[None, :, None, None], 0.0)


if __name__ == "__main__":
    # Small shapes: dec/enc each (N=2, C=4, H=16, W=16) -> concat Cin=8, Cout=4.
    N, C_half, H, W = 2, 4, 16, 16
    Cin, Cout = 2 * C_half, 4

    key = jax.random.PRNGKey(0)
    k_dec, k_enc, k_w, k_b = jax.random.split(key, 4)
    dec = jax.random.normal(k_dec, (N, C_half, H, W), dtype=jnp.float32)
    enc = jax.random.normal(k_enc, (N, C_half, H, W), dtype=jnp.float32)
    weight = 0.1 * jax.random.normal(k_w, (Cout, Cin, 3, 3), dtype=jnp.float32)
    bias = 0.1 * jax.random.normal(k_b, (Cout,), dtype=jnp.float32)

    out = jax.block_until_ready(conv_bottleneck(dec, enc, weight, bias))

    # Reference on the same bf16-rounded operands (kernel computes bf16 x bf16 -> f32).
    dec_b = dec.astype(jnp.bfloat16).astype(jnp.float32)
    enc_b = enc.astype(jnp.bfloat16).astype(jnp.float32)
    w_b = weight.astype(jnp.bfloat16).astype(jnp.float32)
    ref = jax.block_until_ready(conv_bottleneck_ref(dec_b, enc_b, w_b, bias))

    assert out.shape == (N, Cout, H, W), out.shape
    max_err = float(jnp.max(jnp.abs(out - ref)))
    assert jnp.allclose(out, ref, atol=1e-2, rtol=1e-2), max_err

    print("KERNEL_OK")
</pallas_src>

<mosaic_0001>
module attributes {stable_mosaic.version = 11 : i64} {
  func.func @conv3x3_relu_kernel(%arg0: i32, %arg1: i32, %arg2: memref<1x16x16x8xbf16, #tpu.memory_space<vmem>>, %arg3: memref<1x3x3x8x128xbf16, #tpu.memory_space<vmem>>, %arg4: memref<1x1x128xf32, #tpu.memory_space<vmem>>, %arg5: memref<1x16x16x128xf32, #tpu.memory_space<vmem>>, %arg6: memref<18x32x8xbf16, #tpu.memory_space<vmem>>, %arg7: memref<512x128xf32, #tpu.memory_space<vmem>>) attributes {dimension_semantics = [#tpu.dimension_semantics<parallel>, #tpu.dimension_semantics<arbitrary>], iteration_bounds = array<i64: 2, 1>, scalar_prefetch = 0 : i64, scratch_operands = 2 : i64, tpu.core_type = #tpu.core_type<tc>, window_params = [{transform_indices = @transform_0, window_bounds = array<i64: 1, 16, 16, 8>}, {pipeline_mode = #tpu.pipeline_mode<synchronous>, transform_indices = @transform_1, window_bounds = array<i64: 1, 3, 3, 8, 128>}, {transform_indices = @transform_2, window_bounds = array<i64: 1, 1, 128>}, {transform_indices = @transform_3, window_bounds = array<i64: 1, 16, 16, 128>}]} {
    %c0_i32 = arith.constant 0 : i32
    %0 = arith.cmpi eq, %arg1, %c0_i32 : i32
    %1 = arith.extui %0 : i1 to i32
    %c0_i32_0 = arith.constant 0 : i32
    %2 = arith.cmpi ne, %1, %c0_i32_0 : i32
    scf.if %2 {
      %cst_121 = arith.constant 0.000000e+00 : bf16
      %103 = vector.broadcast %cst_121 : bf16 to vector<1x32x8xbf16>
      %c0_122 = arith.constant 0 : index
      %c0_123 = arith.constant 0 : index
      %c0_124 = arith.constant 0 : index
      %104 = vector.load %arg6[%c0_122, %c0_123, %c0_124] : memref<18x32x8xbf16, #tpu.memory_space<vmem>>, vector<1x32x8xbf16>
      tpu.vector_store %arg6[%c0_122, %c0_123, %c0_124], %103 {strides = array<i32>} : memref<18x32x8xbf16, #tpu.memory_space<vmem>>, vector<1x32x8xbf16>,
      %c17 = arith.constant 17 : index
      %c0_125 = arith.constant 0 : index
      %c0_126 = arith.constant 0 : index
      %105 = vector.load %arg6[%c17, %c0_125, %c0_126] : memref<18x32x8xbf16, #tpu.memory_space<vmem>>, vector<1x32x8xbf16>
      tpu.vector_store %arg6[%c17, %c0_125, %c0_126], %103 {strides = array<i32>} : memref<18x32x8xbf16, #tpu.memory_space<vmem>>, vector<1x32x8xbf16>,
      %cst_127 = arith.constant 0.000000e+00 : bf16
      %106 = vector.broadcast %cst_127 : bf16 to vector<16x16x8xbf16>
      %c1_128 = arith.constant 1 : index
      %c16 = arith.constant 16 : index
      %c0_129 = arith.constant 0 : index
      %107 = vector.load %arg6[%c1_128, %c16, %c0_129] : memref<18x32x8xbf16, #tpu.memory_space<vmem>>, vector<16x16x8xbf16>
      tpu.vector_store %arg6[%c1_128, %c16, %c0_129], %106 {strides = array<i32>} : memref<18x32x8xbf16, #tpu.memory_space<vmem>>, vector<16x16x8xbf16>,
      %c0_130 = arith.constant 0 : index
      %c0_131 = arith.constant 0 : index
      %c0_132 = arith.constant 0 : index
      %c0_133 = arith.constant 0 : index
      %108 = vector.load %arg2[%c0_130, %c0_131, %c0_132, %c0_133] : memref<1x16x16x8xbf16, #tpu.memory_space<vmem>>, vector<1x16x16x8xbf16>
      %109 = vector.shape_cast %108 : vector<1x16x16x8xbf16> to vector<16x16x8xbf16>
      %c1_134 = arith.constant 1 : index
      %c0_135 = arith.constant 0 : index
      %c0_136 = arith.constant 0 : index
      %110 = vector.load %arg6[%c1_134, %c0_135, %c0_136] : memref<18x32x8xbf16, #tpu.memory_space<vmem>>, vector<16x16x8xbf16>
      tpu.vector_store %arg6[%c1_134, %c0_135, %c0_136], %109 {strides = array<i32>} : memref<18x32x8xbf16, #tpu.memory_space<vmem>>, vector<16x16x8xbf16>,
    } else {
    }
    %c0 = arith.constant 0 : index
    %c0_1 = arith.constant 0 : index
    %c0_2 = arith.constant 0 : index
    %3 = vector.load %arg4[%c0, %c0_1, %c0_2] : memref<1x1x128xf32, #tpu.memory_space<vmem>>, vector<1x1x128xf32>
    %4 = vector.shape_cast %3 : vector<1x1x128xf32> to vector<1x128xf32>
    %5 = vector.shape_cast %4 : vector<1x128xf32> to vector<1x128xf32>
    %6 = vector.broadcast %5 : vector<1x128xf32> to vector<512x128xf32>
    %c0_3 = arith.constant 0 : index
    %c0_4 = arith.constant 0 : index
    %7 = vector.load %arg7[%c0_3, %c0_4] : memref<512x128xf32, #tpu.memory_space<vmem>>, vector<512x128xf32>
    tpu.vector_store %arg7[%c0_3, %c0_4], %6 {strides = array<i32>} : memref<512x128xf32, #tpu.memory_space<vmem>>, vector<512x128xf32>,
    %c0_5 = arith.constant 0 : index
    %c0_6 = arith.constant 0 : index
    %c0_7 = arith.constant 0 : index
    %8 = vector.load %arg6[%c0_5, %c0_6, %c0_7] : memref<18x32x8xbf16, #tpu.memory_space<vmem>>, vector<16x32x8xbf16>
    %9 = vector.shape_cast %8 : vector<16x32x8xbf16> to vector<512x8xbf16>
    %10 = arith.index_cast %arg1 : i32 to index
    %c0_8 = arith.constant 0 : index
    %c0_9 = arith.constant 0 : index
    %c0_10 = arith.constant 0 : index
    %c0_11 = arith.constant 0 : index
    %11 = vector.load %arg3[%10, %c0_8, %c0_9, %c0_10, %c0_11] : memref<1x3x3x8x128xbf16, #tpu.memory_space<vmem>>, vector<1x1x1x8x128xbf16>
    %12 = vector.shape_cast %11 : vector<1x1x1x8x128xbf16> to vector<8x128xbf16>
    %cst = arith.constant dense<0.000000e+00> : vector<512x128xf32>
    %13 = tpu.matmul %9, %12, %cst {dimension_numbers = #tpu.dot_dimension_numbers<[1], [0], [0], [1], [0, 0, 1, 1], [], []>} : vector<512x8xbf16>, vector<8x128xbf16>, vector<512x128xf32> -> vector<512x128xf32>
    %c1_i32 = arith.constant 1 : i32
    %14 = tpu.dynamic_rotate %13 by %c1_i32 dim 0 : vector<512x128xf32>, i32 -> vector<512x128xf32>
    %c0_12 = arith.constant 0 : index
    %c0_13 = arith.constant 0 : index
    %15 = vector.load %arg7[%c0_12, %c0_13] : memref<512x128xf32, #tpu.memory_space<vmem>>, vector<512x128xf32>
    %16 = arith.addf %15, %14 : vector<512x128xf32>
    %c0_14 = arith.constant 0 : index
    %c0_15 = arith.constant 0 : index
    %17 = vector.load %arg7[%c0_14, %c0_15] : memref<512x128xf32, #tpu.memory_space<vmem>>, vector<512x128xf32>
    tpu.vector_store %arg7[%c0_14, %c0_15], %16 {strides = array<i32>} : memref<512x128xf32, #tpu.memory_space<vmem>>, vector<512x128xf32>,
    %c1 = arith.constant 1 : index
    %c0_16 = arith.constant 0 : index
    %c0_17 = arith.constant 0 : index
    %18 = vector.load %arg6[%c1, %c0_16, %c0_17] : memref<18x32x8xbf16, #tpu.memory_space<vmem>>, vector<16x32x8xbf16>
    %19 = vector.shape_cast %18 : vector<16x32x8xbf16> to vector<512x8xbf16>
    %20 = arith.index_cast %arg1 : i32 to index
    %c1_18 = arith.constant 1 : index
    %c0_19 = arith.constant 0 : index
    %c0_20 = arith.constant 0 : index
    %c0_21 = arith.constant 0 : index
    %21 = vector.load %arg3[%20, %c1_18, %c0_19, %c0_20, %c0_21] : memref<1x3x3x8x128xbf16, #tpu.memory_space<vmem>>, vector<1x1x1x8x128xbf16>
    %22 = vector.shape_cast %21 : vector<1x1x1x8x128xbf16> to vector<8x128xbf16>
    %cst_22 = arith.constant dense<0.000000e+00> : vector<512x128xf32>
    %23 = tpu.matmul %19, %22, %cst_22 {dimension_numbers = #tpu.dot_dimension_numbers<[1], [0], [0], [1], [0, 0, 1, 1], [], []>} : vector<512x8xbf16>, vector<8x128xbf16>, vector<512x128xf32> -> vector<512x128xf32>
    %c1_i32_23 = arith.constant 1 : i32
    %24 = tpu.dynamic_rotate %23 by %c1_i32_23 dim 0 : vector<512x128xf32>, i32 -> vector<512x128xf32>
    %c0_24 = arith.constant 0 : index
    %c0_25 = arith.constant 0 : index
    %25 = vector.load %arg7[%c0_24, %c0_25] : memref<512x128xf32, #tpu.memory_space<vmem>>, vector<512x128xf32>
    %26 = arith.addf %25, %24 : vector<512x128xf32>
    %c0_26 = arith.constant 0 : index
    %c0_27 = arith.constant 0 : index
    %27 = vector.load %arg7[%c0_26, %c0_27] : memref<512x128xf32, #tpu.memory_space<vmem>>, vector<512x128xf32>
    tpu.vector_store %arg7[%c0_26, %c0_27], %26 {strides = array<i32>} : memref<512x128xf32, #tpu.memory_space<vmem>>, vector<512x128xf32>,
    %c2 = arith.constant 2 : index
    %c0_28 = arith.constant 0 : index
    %c0_29 = arith.constant 0 : index
    %28 = vector.load %arg6[%c2, %c0_28, %c0_29] : memref<18x32x8xbf16, #tpu.memory_space<vmem>>, vector<16x32x8xbf16>
    %29 = vector.shape_cast %28 : vector<16x32x8xbf16> to vector<512x8xbf16>
    %30 = arith.index_cast %arg1 : i32 to index
    %c2_30 = arith.constant 2 : index
    %c0_31 = arith.constant 0 : index
    %c0_32 = arith.constant 0 : index
    %c0_33 = arith.constant 0 : index
    %31 = vector.load %arg3[%30, %c2_30, %c0_31, %c0_32, %c0_33] : memref<1x3x3x8x128xbf16, #tpu.memory_space<vmem>>, vector<1x1x1x8x128xbf16>
    %32 = vector.shape_cast %31 : vector<1x1x1x8x128xbf16> to vector<8x128xbf16>
    %cst_34 = arith.constant dense<0.000000e+00> : vector<512x128xf32>
    %33 = tpu.matmul %29, %32, %cst_34 {dimension_numbers = #tpu.dot_dimension_numbers<[1], [0], [0], [1], [0, 0, 1, 1], [], []>} : vector<512x8xbf16>, vector<8x128xbf16>, vector<512x128xf32> -> vector<512x128xf32>
    %c1_i32_35 = arith.constant 1 : i32
    %34 = tpu.dynamic_rotate %33 by %c1_i32_35 dim 0 : vector<512x128xf32>, i32 -> vector<512x128xf32>
    %c0_36 = arith.constant 0 : index
    %c0_37 = arith.constant 0 : index
    %35 = vector.load %arg7[%c0_36, %c0_37] : memref<512x128xf32, #tpu.memory_space<vmem>>, vector<512x128xf32>
    %36 = arith.addf %35, %34 : vector<512x128xf32>
    %c0_38 = arith.constant 0 : index
    %c0_39 = arith.constant 0 : index
    %37 = vector.load %arg7[%c0_38, %c0_39] : memref<512x128xf32, #tpu.memory_space<vmem>>, vector<512x128xf32>
    tpu.vector_store %arg7[%c0_38, %c0_39], %36 {strides = array<i32>} : memref<512x128xf32, #tpu.memory_space<vmem>>, vector<512x128xf32>,
    %c0_40 = arith.constant 0 : index
    %c0_41 = arith.constant 0 : index
    %c0_42 = arith.constant 0 : index
    %38 = vector.load %arg6[%c0_40, %c0_41, %c0_42] : memref<18x32x8xbf16, #tpu.memory_space<vmem>>, vector<16x32x8xbf16>
    %39 = vector.shape_cast %38 : vector<16x32x8xbf16> to vector<512x8xbf16>
    %40 = arith.index_cast %arg1 : i32 to index
    %c0_43 = arith.constant 0 : index
    %c1_44 = arith.constant 1 : index
    %c0_45 = arith.constant 0 : index
    %c0_46 = arith.constant 0 : index
    %41 = vector.load %arg3[%40, %c0_43, %c1_44, %c0_45, %c0_46] : memref<1x3x3x8x128xbf16, #tpu.memory_space<vmem>>, vector<1x1x1x8x128xbf16>
    %42 = vector.shape_cast %41 : vector<1x1x1x8x128xbf16> to vector<8x128xbf16>
    %cst_47 = arith.constant dense<0.000000e+00> : vector<512x128xf32>
    %43 = tpu.matmul %39, %42, %cst_47 {dimension_numbers = #tpu.dot_dimension_numbers<[1], [0], [0], [1], [0, 0, 1, 1], [], []>} : vector<512x8xbf16>, vector<8x128xbf16>, vector<512x128xf32> -> vector<512x128xf32>
    %c0_48 = arith.constant 0 : index
    %c0_49 = arith.constant 0 : index
    %44 = vector.load %arg7[%c0_48, %c0_49] : memref<512x128xf32, #tpu.memory_space<vmem>>, vector<512x128xf32>
    %45 = arith.addf %44, %43 : vector<512x128xf32>
    %c0_50 = arith.constant 0 : index
    %c0_51 = arith.constant 0 : index
    %46 = vector.load %arg7[%c0_50, %c0_51] : memref<512x128xf32, #tpu.memory_space<vmem>>, vector<512x128xf32>
    tpu.vector_store %arg7[%c0_50, %c0_51], %45 {strides = array<i32>} : memref<512x128xf32, #tpu.memory_space<vmem>>, vector<512x128xf32>,
    %c1_52 = arith.constant 1 : index
    %c0_53 = arith.constant 0 : index
    %c0_54 = arith.constant 0 : index
    %47 = vector.load %arg6[%c1_52, %c0_53, %c0_54] : memref<18x32x8xbf16, #tpu.memory_space<vmem>>, vector<16x32x8xbf16>
    %48 = vector.shape_cast %47 : vector<16x32x8xbf16> to vector<512x8xbf16>
    %49 = arith.index_cast %arg1 : i32 to index
    %c1_55 = arith.constant 1 : index
    %c1_56 = arith.constant 1 : index
    %c0_57 = arith.constant 0 : index
    %c0_58 = arith.constant 0 : index
    %50 = vector.load %arg3[%49, %c1_55, %c1_56, %c0_57, %c0_58] : memref<1x3x3x8x128xbf16, #tpu.memory_space<vmem>>, vector<1x1x1x8x128xbf16>
    %51 = vector.shape_cast %50 : vector<1x1x1x8x128xbf16> to vector<8x128xbf16>
    %cst_59 = arith.constant dense<0.000000e+00> : vector<512x128xf32>
    %52 = tpu.matmul %48, %51, %cst_59 {dimension_numbers = #tpu.dot_dimension_numbers<[1], [0], [0], [1], [0, 0, 1, 1], [], []>} : vector<512x8xbf16>, vector<8x128xbf16>, vector<512x128xf32> -> vector<512x128xf32>
    %c0_60 = arith.constant 0 : index
    %c0_61 = arith.constant 0 : index
    %53 = vector.load %arg7[%c0_60, %c0_61] : memref<512x128xf32, #tpu.memory_space<vmem>>, vector<512x128xf32>
    %54 = arith.addf %53, %52 : vector<512x128xf32>
    %c0_62 = arith.constant 0 : index
    %c0_63 = arith.constant 0 : index
    %55 = vector.load %arg7[%c0_62, %c0_63] : memref<512x128xf32, #tpu.memory_space<vmem>>, vector<512x128xf32>
    tpu.vector_store %arg7[%c0_62, %c0_63], %54 {strides = array<i32>} : memref<512x128xf32, #tpu.memory_space<vmem>>, vector<512x128xf32>,
    %c2_64 = arith.constant 2 : index
    %c0_65 = arith.constant 0 : index
    %c0_66 = arith.constant 0 : index
    %56 = vector.load %arg6[%c2_64, %c0_65, %c0_66] : memref<18x32x8xbf16, #tpu.memory_space<vmem>>, vector<16x32x8xbf16>
    %57 = vector.shape_cast %56 : vector<16x32x8xbf16> to vector<512x8xbf16>
    %58 = arith.index_cast %arg1 : i32 to index
    %c2_67 = arith.constant 2 : index
    %c1_68 = arith.constant 1 : index
    %c0_69 = arith.constant 0 : index
    %c0_70 = arith.constant 0 : index
    %59 = vector.load %arg3[%58, %c2_67, %c1_68, %c0_69, %c0_70] : memref<1x3x3x8x128xbf16, #tpu.memory_space<vmem>>, vector<1x1x1x8x128xbf16>
    %60 = vector.shape_cast %59 : vector<1x1x1x8x128xbf16> to vector<8x128xbf16>
    %cst_71 = arith.constant dense<0.000000e+00> : vector<512x128xf32>
    %61 = tpu.matmul %57, %60, %cst_71 {dimension_numbers = #tpu.dot_dimension_numbers<[1], [0], [0], [1], [0, 0, 1, 1], [], []>} : vector<512x8xbf16>, vector<8x128xbf16>, vector<512x128xf32> -> vector<512x128xf32>
    %c0_72 = arith.constant 0 : index
    %c0_73 = arith.constant 0 : index
    %62 = vector.load %arg7[%c0_72, %c0_73] : memref<512x128xf32, #tpu.memory_space<vmem>>, vector<512x128xf32>
    %63 = arith.addf %62, %61 : vector<512x128xf32>
    %c0_74 = arith.constant 0 : index
    %c0_75 = arith.constant 0 : index
    %64 = vector.load %arg7[%c0_74, %c0_75] : memref<512x128xf32, #tpu.memory_space<vmem>>, vector<512x128xf32>
    tpu.vector_store %arg7[%c0_74, %c0_75], %63 {strides = array<i32>} : memref<512x128xf32, #tpu.memory_space<vmem>>, vector<512x128xf32>,
    %c0_76 = arith.constant 0 : index
    %c0_77 = arith.constant 0 : index
    %c0_78 = arith.constant 0 : index
    %65 = vector.load %arg6[%c0_76, %c0_77, %c0_78] : memref<18x32x8xbf16, #tpu.memory_space<vmem>>, vector<16x32x8xbf16>
    %66 = vector.shape_cast %65 : vector<16x32x8xbf16> to vector<512x8xbf16>
    %67 = arith.index_cast %arg1 : i32 to index
    %c0_79 = arith.constant 0 : index
    %c2_80 = arith.constant 2 : index
    %c0_81 = arith.constant 0 : index
    %c0_82 = arith.constant 0 : index
    %68 = vector.load %arg3[%67, %c0_79, %c2_80, %c0_81, %c0_82] : memref<1x3x3x8x128xbf16, #tpu.memory_space<vmem>>, vector<1x1x1x8x128xbf16>
    %69 = vector.shape_cast %68 : vector<1x1x1x8x128xbf16> to vector<8x128xbf16>
    %cst_83 = arith.constant dense<0.000000e+00> : vector<512x128xf32>
    %70 = tpu.matmul %66, %69, %cst_83 {dimension_numbers = #tpu.dot_dimension_numbers<[1], [0], [0], [1], [0, 0, 1, 1], [], []>} : vector<512x8xbf16>, vector<8x128xbf16>, vector<512x128xf32> -> vector<512x128xf32>
    %c511_i32 = arith.constant 511 : i32
    %71 = tpu.dynamic_rotate %70 by %c511_i32 dim 0 : vector<512x128xf32>, i32 -> vector<512x128xf32>
    %c0_84 = arith.constant 0 : index
    %c0_85 = arith.constant 0 : index
    %72 = vector.load %arg7[%c0_84, %c0_85] : memref<512x128xf32, #tpu.memory_space<vmem>>, vector<512x128xf32>
    %73 = arith.addf %72, %71 : vector<512x128xf32>
    %c0_86 = arith.constant 0 : index
    %c0_87 = arith.constant 0 : index
    %74 = vector.load %arg7[%c0_86, %c0_87] : memref<512x128xf32, #tpu.memory_space<vmem>>, vector<512x128xf32>
    tpu.vector_store %arg7[%c0_86, %c0_87], %73 {strides = array<i32>} : memref<512x128xf32, #tpu.memory_space<vmem>>, vector<512x128xf32>,
    %c1_88 = arith.constant 1 : index
    %c0_89 = arith.constant 0 : index
    %c0_90 = arith.constant 0 : index
    %75 = vector.load %arg6[%c1_88, %c0_89, %c0_90] : memref<18x32x8xbf16, #tpu.memory_space<vmem>>, vector<16x32x8xbf16>
    %76 = vector.shape_cast %75 : vector<16x32x8xbf16> to vector<512x8xbf16>
    %77 = arith.index_cast %arg1 : i32 to index
    %c1_91 = arith.constant 1 : index
    %c2_92 = arith.constant 2 : index
    %c0_93 = arith.constant 0 : index
    %c0_94 = arith.constant 0 : index
    %78 = vector.load %arg3[%77, %c1_91, %c2_92, %c0_93, %c0_94] : memref<1x3x3x8x128xbf16, #tpu.memory_space<vmem>>, vector<1x1x1x8x128xbf16>
    %79 = vector.shape_cast %78 : vector<1x1x1x8x128xbf16> to vector<8x128xbf16>
    %cst_95 = arith.constant dense<0.000000e+00> : vector<512x128xf32>
    %80 = tpu.matmul %76, %79, %cst_95 {dimension_numbers = #tpu.dot_dimension_numbers<[1], [0], [0], [1], [0, 0, 1, 1], [], []>} : vector<512x8xbf16>, vector<8x128xbf16>, vector<512x128xf32> -> vector<512x128xf32>
    %c511_i32_96 = arith.constant 511 : i32
    %81 = tpu.dynamic_rotate %80 by %c511_i32_96 dim 0 : vector<512x128xf32>, i32 -> vector<512x128xf32>
    %c0_97 = arith.constant 0 : index
    %c0_98 = arith.constant 0 : index
    %82 = vector.load %arg7[%c0_97, %c0_98] : memref<512x128xf32, #tpu.memory_space<vmem>>, vector<512x128xf32>
    %83 = arith.addf %82, %81 : vector<512x128xf32>
    %c0_99 = arith.constant 0 : index
    %c0_100 = arith.constant 0 : index
    %84 = vector.load %arg7[%c0_99, %c0_100] : memref<512x128xf32, #tpu.memory_space<vmem>>, vector<512x128xf32>
    tpu.vector_store %arg7[%c0_99, %c0_100], %83 {strides = array<i32>} : memref<512x128xf32, #tpu.memory_space<vmem>>, vector<512x128xf32>,
    %c2_101 = arith.constant 2 : index
    %c0_102 = arith.constant 0 : index
    %c0_103 = arith.constant 0 : index
    %85 = vector.load %arg6[%c2_101, %c0_102, %c0_103] : memref<18x32x8xbf16, #tpu.memory_space<vmem>>, vector<16x32x8xbf16>
    %86 = vector.shape_cast %85 : vector<16x32x8xbf16> to vector<512x8xbf16>
    %87 = arith.index_cast %arg1 : i32 to index
    %c2_104 = arith.constant 2 : index
    %c2_105 = arith.constant 2 : index
    %c0_106 = arith.constant 0 : index
    %c0_107 = arith.constant 0 : index
    %88 = vector.load %arg3[%87, %c2_104, %c2_105, %c0_106, %c0_107] : memref<1x3x3x8x128xbf16, #tpu.memory_space<vmem>>, vector<1x1x1x8x128xbf16>
    %89 = vector.shape_cast %88 : vector<1x1x1x8x128xbf16> to vector<8x128xbf16>
    %cst_108 = arith.constant dense<0.000000e+00> : vector<512x128xf32>
    %90 = tpu.matmul %86, %89, %cst_108 {dimension_numbers = #tpu.dot_dimension_numbers<[1], [0], [0], [1], [0, 0, 1, 1], [], []>} : vector<512x8xbf16>, vector<8x128xbf16>, vector<512x128xf32> -> vector<512x128xf32>
    %c511_i32_109 = arith.constant 511 : i32
    %91 = tpu.dynamic_rotate %90 by %c511_i32_109 dim 0 : vector<512x128xf32>, i32 -> vector<512x128xf32>
    %c0_110 = arith.constant 0 : index
    %c0_111 = arith.constant 0 : index
    %92 = vector.load %arg7[%c0_110, %c0_111] : memref<512x128xf32, #tpu.memory_space<vmem>>, vector<512x128xf32>
    %93 = arith.addf %92, %91 : vector<512x128xf32>
    %c0_112 = arith.constant 0 : index
    %c0_113 = arith.constant 0 : index
    %94 = vector.load %arg7[%c0_112, %c0_113] : memref<512x128xf32, #tpu.memory_space<vmem>>, vector<512x128xf32>
    tpu.vector_store %arg7[%c0_112, %c0_113], %93 {strides = array<i32>} : memref<512x128xf32, #tpu.memory_space<vmem>>, vector<512x128xf32>,
    %c0_114 = arith.constant 0 : index
    %c0_115 = arith.constant 0 : index
    %95 = vector.load %arg7[%c0_114, %c0_115] : memref<512x128xf32, #tpu.memory_space<vmem>>, vector<512x128xf32>
    %cst_116 = arith.constant 0.000000e+00 : f32
    %96 = vector.broadcast %cst_116 : f32 to vector<512x128xf32>
    %97 = arith.maximumf %95, %96 : vector<512x128xf32>
    %98 = vector.shape_cast %97 : vector<512x128xf32> to vector<16x32x128xf32>
    %99 = vector.extract_strided_slice %98 {offsets = [0, 0, 0], sizes = [16, 16, 128], strides = [1, 1, 1]} : vector<16x32x128xf32> to vector<16x16x128xf32>
    %c0_117 = arith.constant 0 : index
    %c0_118 = arith.constant 0 : index
    %c0_119 = arith.constant 0 : index
    %c0_120 = arith.constant 0 : index
    %100 = vector.load %arg5[%c0_117, %c0_118, %c0_119, %c0_120] : memref<1x16x16x128xf32, #tpu.memory_space<vmem>>, vector<1x16x16x128xf32>
    %101 = vector.shape_cast %100 : vector<1x16x16x128xf32> to vector<16x16x128xf32>
    %102 = vector.shape_cast %99 : vector<16x16x128xf32> to vector<1x16x16x128xf32>
    tpu.vector_store %arg5[%c0_117, %c0_118, %c0_119, %c0_120], %102 {strides = array<i32>} : memref<1x16x16x128xf32, #tpu.memory_space<vmem>>, vector<1x16x16x128xf32>,
    return
  }
  func.func @transform_0(%arg0: i32, %arg1: i32) -> (i32, i32, i32, i32) {
    %c0_i32 = arith.constant 0 : i32
    %c0_i32_0 = arith.constant 0 : i32
    %c0_i32_1 = arith.constant 0 : i32
    %c0_i32_2 = arith.constant 0 : i32
    return %arg0, %c0_i32, %c0_i32_0, %c0_i32_1 : i32, i32, i32, i32
  }
  func.func @transform_1(%arg0: i32, %arg1: i32) -> (i32, i32, i32, i32, i32) {
    %c0_i32 = arith.constant 0 : i32
    %c0_i32_0 = arith.constant 0 : i32
    %c0_i32_1 = arith.constant 0 : i32
    %c0_i32_2 = arith.constant 0 : i32
    %c0_i32_3 = arith.constant 0 : i32
    %c0_i32_4 = arith.constant 0 : i32
    return %c0_i32, %c0_i32_0, %c0_i32_1, %c0_i32_2, %c0_i32_3 : i32, i32, i32, i32, i32
  }
  func.func @transform_2(%arg0: i32, %arg1: i32) -> (i32, i32, i32) {
    %c0_i32 = arith.constant 0 : i32
    %c0_i32_0 = arith.constant 0 : i32
    %c0_i32_1 = arith.constant 0 : i32
    return %arg1, %c0_i32, %c0_i32_0 : i32, i32, i32
  }
  func.func @transform_3(%arg0: i32, %arg1: i32) -> (i32, i32, i32, i32) {
    %c0_i32 = arith.constant 0 : i32
    %c0_i32_0 = arith.constant 0 : i32
    %c0_i32_1 = arith.constant 0 : i32
    return %arg0, %c0_i32, %c0_i32_0, %arg1 : i32, i32, i32, i32
  }
}

</mosaic_0001>

<bundles_post_ra>
// kernel: conv_bottleneck.1
= control target key start
LH: loop header
LB: loop body
LE: loop exit
PB: predicated region body
PF: predicated region fallthrough
CT: control target
= control target key end

     0   :  { %s10519_s12 = smov 0   ;;  %s10521_s13 = smov 0   ;;  %s11895_s0 = inlined_call_operand.vmem [shape: bf16[2,16,16,8], index: 0, kind: input, shape index: {}]   ;;  %s11896_s1 = inlined_call_operand.vmem [shape: bf16[1,3,3,8,128], index: 1, kind: input, shape index: {}]   ;;  %s11897_s2 = inlined_call_operand.vmem [shape: f32[1,1,128], index: 2, kind: input, shape index: {}]   ;;  %s11898_s3 = inlined_call_operand.vmem [shape: f32[2,16,16,128], index: 3, kind: output, shape index: {}]  }
   0x1   :  { %s10523_s14 = smov 0  }
   0x2 LB: > { %s25_s15 = sadd.s32 1, %s10492_s13  ;;  %p8661_p0 = scmp.ge.s32.totalorder %s10496_s14, 1  ;;  %s10496_s14 = sphi %s10523_s14, %s13_s14   ;;  %s10492_s13 = sphi %s10521_s13, %s11900_s13   ;;  %s10488_s12 = sphi %s10519_s12, %s11899_s12  }
   0x3   : > { %p27_p1 = scmp.ge.s32.totalorder %s25_s15, 2  ;;  %p159_p2 = scmp.lt.s32.totalorder %s10496_s14, 3 }
   0x5   : > { %s11902_s15 = smov (%p27_p1, %s25_s15), 0  ;;  %p160_p3 = pnand %p8661_p0, %p159_p2 }
   0x6   : > { %p189_p4 = scmp.lt.s32.totalorder (!%p160_p3), %s10488_s12, 1 }
   0x7   : > { %163 = sbr.rel (%p160_p3) target bundleno = 819 (0x333), region = 32 }
   0xc   : > { %v455_v0 = vld [vmem:[%s11896_s1] sm:$0xf]  ;;  %vm713_vm0 = vcmask 1043456   ;;  %vm210_vm1 = vcmask 60416   ;;  %v10498_v2 = vmov 0   ;;  %s11904_s12 = smov (!%p189_p4, %s10488_s12), 1 }
   0xd   : > { %10148 = vmatprep.subr.msk.bf16.mxu0 %vm713_vm0, %v455_v0  ;;  %v715_v1 = vsel %vm713_vm0, %v455_v0, 0  ;;  %211 = vst.msk [vmem:[#allocation2] sm:$0xf] %vm210_vm1, %v10498_v2  ;;  %212 = vst.msk [vmem:[#allocation2 + $0x4] sm:$0xf] %vm210_vm1, %v10498_v2  ;;  %10149 = vmatprep.subr.msk.bf16.mxu1 %vm713_vm0, %v455_v0  ;;  %s9253_s22 = sshll.u32 %s11904_s12, 7 }
   0xe   : > { %213 = vst.msk [vmem:[#allocation2 + $0x8] sm:$0xf] %vm210_vm1, %v10498_v2  ;;  %214 = vst.msk [vmem:[#allocation2 + $0xc] sm:$0xf] %vm210_vm1, %v10498_v2  ;;  %v8731_v3 = vld [vmem:[%s11896_s1 + $0xc] sm:$0xf]  ;;  %9553 = vmatpush3.bf16.msra.mxu0 %v715_v1  ;;  %10147 = vmatpush3.bf16.msra.mxu1 %v715_v1  ;;  %s10601_s25 = scalar_lea.vmem %s11895_s0, %s9253_s22 }
   0xf   : > { %216 = vst.msk [vmem:[#allocation2 + $0x110] sm:$0xf] %vm210_vm1, %v10498_v2  ;;  %217 = vst.msk [vmem:[#allocation2 + $0x114] sm:$0xf] %vm210_vm1, %v10498_v2  ;;  %v8796_v4 = vld [vmem:[%s11896_s1 + $0x18] sm:$0xf]  ;;  %10150 = vmatprep.subr.msk.bf16.mxu1 %vm713_vm0, %v8731_v3 }
  0x10   : > { %218 = vst.msk [vmem:[#allocation2 + $0x118] sm:$0xf] %vm210_vm1, %v10498_v2  ;;  %219 = vst.msk [vmem:[#allocation2 + $0x11c] sm:$0xf] %vm210_vm1, %v10498_v2  ;;  %10151 = vmatprep.subr.msk.bf16.mxu0 %vm713_vm0, %v8796_v4  ;;  %vm616_vm2 = vcmask 64512   ;;  %v2592_v10 = vsel %vm713_vm0, %v8796_v4, 0 }
  0x11   : > { %221 = vst.msk [vmem:[#allocation2 + $0x18] sm:$0xf] %vm210_vm1, %v10498_v2  ;;  %222 = vst.msk [vmem:[#allocation2 + $0x1c] sm:$0xf] %vm210_vm1, %v10498_v2  ;;  %v267_v5 = vld [vmem:[%s10601_s25 + $0x38] sm:$0xf] }
  0x12   : > { %223 = vst.msk [vmem:[#allocation2 + $0x28] sm:$0xf] %vm210_vm1, %v10498_v2  ;;  %224 = vst.msk [vmem:[#allocation2 + $0x2c] sm:$0xf] %vm210_vm1, %v10498_v2  ;;  %v268_v6 = vld [vmem:[%s10601_s25 + $0x3c] sm:$0xf] }
  0x13   : > { %225 = vst.msk [vmem:[#allocation2 + $0x38] sm:$0xf] %vm210_vm1, %v10498_v2  ;;  %226 = vst.msk [vmem:[#allocation2 + $0x3c] sm:$0xf] %vm210_vm1, %v10498_v2  ;;  %v253_v7 = vld [vmem:[%s10601_s25] sm:$0xf] }
  0x14   : > { %227 = vst.msk [vmem:[#allocation2 + $0x48] sm:$0xf] %vm210_vm1, %v10498_v2  ;;  %228 = vst.msk [vmem:[#allocation2 + $0x4c] sm:$0xf] %vm210_vm1, %v10498_v2  ;;  %v10183_v8 = vld [vmem:[#allocation2] sm:$0xff]   ;;  %v1655_v19 = vsel %vm713_vm0, %v8731_v3, 0 }
  0x15   : > { %229 = vst.msk [vmem:[#allocation2 + $0x58] sm:$0xf] %vm210_vm1, %v10498_v2  ;;  %230 = vst.msk [vmem:[#allocation2 + $0x5c] sm:$0xf] %vm210_vm1, %v10498_v2  ;;  %v10184_v9 = vld [vmem:[#allocation2 + $0x8] sm:$0xff]   ;;  %9554 = vmatprep.mubr.msk.bf16.mxu0 %vm616_vm2, %v10183_v8  ;;  %s9254_s23 = sshll.u32 %s11904_s12, 8 }
  0x16   : > { %231 = vst.msk [vmem:[#allocation2 + $0x68] sm:$0xf] %vm210_vm1, %v10498_v2  ;;  %232 = vst.msk [vmem:[#allocation2 + $0x6c] sm:$0xf] %vm210_vm1, %v10498_v2  ;;  %v10614_v11 = vld [vmem:[%s11896_s1 + $0x10] sm:$0xf]  ;;  %9555 = vmatmul.mubr.msk.bf16.vlgmr.msra.gmra.mxu0 %vm616_vm2, %v10184_v9  ;;  %s11702_s12 = scalar_lea.vmem %s11898_s3, %s9254_s23 }
  0x17   : > { %233 = vst.msk [vmem:[#allocation2 + $0x78] sm:$0xf] %vm210_vm1, %v10498_v2  ;;  %234 = vst.msk [vmem:[#allocation2 + $0x7c] sm:$0xf] %vm210_vm1, %v10498_v2  ;;  %v254_v12 = vld [vmem:[%s10601_s25 + $0x4] sm:$0xf]  ;;  %9685 = vmatpush3.bf16.msra.mxu0 %v2592_v10 }
  0x18   : > { %235 = vst.msk [vmem:[#allocation2 + $0x88] sm:$0xf] %vm210_vm1, %v10498_v2  ;;  %236 = vst.msk [vmem:[#allocation2 + $0x8c] sm:$0xf] %vm210_vm1, %v10498_v2  ;;  %v269_v13 = vld [vmem:[%s10601_s25 + $0x40] sm:$0xf]  ;;  %10153 = vmatprep.subr.msk.bf16.mxu0 %vm713_vm0, %v10614_v11 }
  0x19   : > { %237 = vst.msk [vmem:[#allocation2 + $0x98] sm:$0xf] %vm210_vm1, %v10498_v2  ;;  %238 = vst.msk [vmem:[#allocation2 + $0x9c] sm:$0xf] %vm210_vm1, %v10498_v2  ;;  %v270_v14 = vld [vmem:[%s10601_s25 + $0x44] sm:$0xf] }
  0x1a   : > { %239 = vst.msk [vmem:[#allocation2 + $0xa8] sm:$0xf] %vm210_vm1, %v10498_v2  ;;  %240 = vst.msk [vmem:[#allocation2 + $0xac] sm:$0xf] %vm210_vm1, %v10498_v2  ;;  %v255_v16 = vld [vmem:[%s10601_s25 + $0x8] sm:$0xf] }
  0x1b   : > { %241 = vst.msk [vmem:[#allocation2 + $0xb8] sm:$0xf] %vm210_vm1, %v10498_v2  ;;  %242 = vst.msk [vmem:[#allocation2 + $0xbc] sm:$0xf] %vm210_vm1, %v10498_v2  ;;  %v256_v17 = vld [vmem:[%s10601_s25 + $0xc] sm:$0xf] }
  0x1c   : > { %243 = vst.msk [vmem:[#allocation2 + $0xc8] sm:$0xf] %vm210_vm1, %v10498_v2  ;;  %244 = vst.msk [vmem:[#allocation2 + $0xcc] sm:$0xf] %vm210_vm1, %v10498_v2  ;;  %v10633_v20 = vld [vmem:[%s11896_s1 + $0x4] sm:$0xf] }
  0x1d   : > { %245 = vst.msk [vmem:[#allocation2 + $0xd8] sm:$0xf] %vm210_vm1, %v10498_v2  ;;  %246 = vst.msk [vmem:[#allocation2 + $0xdc] sm:$0xf] %vm210_vm1, %v10498_v2  ;;  %v271_v21 = vld [vmem:[%s10601_s25 + $0x48] sm:$0xf] }
  0x1e   : > { %247 = vst.msk [vmem:[#allocation2 + $0xe8] sm:$0xf] %vm210_vm1, %v10498_v2  ;;  %248 = vst.msk [vmem:[#allocation2 + $0xec] sm:$0xf] %vm210_vm1, %v10498_v2  ;;  %v272_v22 = vld [vmem:[%s10601_s25 + $0x4c] sm:$0xf] }
  0x1f   : > { %249 = vst.msk [vmem:[#allocation2 + $0xf8] sm:$0xf] %vm210_vm1, %v10498_v2  ;;  %250 = vst.msk [vmem:[#allocation2 + $0xfc] sm:$0xf] %vm210_vm1, %v10498_v2  ;;  %v10186_v15 = vld [vmem:[#allocation2 + $0x88] sm:$0xff]   ;;  %v10188_v23 = vld [vmem:[#allocation2 + $0x18] sm:$0xff]  }
  0x20   : > { %251 = vst.msk [vmem:[#allocation2 + $0x108] sm:$0xf] %vm210_vm1, %v10498_v2  ;;  %252 = vst.msk [vmem:[#allocation2 + $0x10c] sm:$0xf] %vm210_vm1, %v10498_v2  ;;  %v257_v24 = vld [vmem:[%s10601_s25 + $0x10] sm:$0xf] }
  0x21   : > { %299 = vst.msk [vmem:[#allocation2 + $0x80] sm:$0xf] %vm210_vm1, %v267_v5  ;;  %300 = vst.msk [vmem:[#allocation2 + $0x84] sm:$0xf] %vm210_vm1, %v268_v6  ;;  %v258_v26 = vld [vmem:[%s10601_s25 + $0x14] sm:$0xf] }
  0x22   : > { %285 = vst.msk [vmem:[#allocation2 + $0x10] sm:$0xf] %vm210_vm1, %v253_v7  ;;  %286 = vst.msk [vmem:[#allocation2 + $0x14] sm:$0xf] %vm210_vm1, %v254_v12  ;;  %v10190_v28 = vld [vmem:[#allocation2 + $0x98] sm:$0xff]   ;;  %v10192_v32 = vld [vmem:[#allocation2 + $0x28] sm:$0xff]  }
  0x23   : > { %301 = vst.msk [vmem:[#allocation2 + $0x90] sm:$0xf] %vm210_vm1, %v269_v13  ;;  %302 = vst.msk [vmem:[#allocation2 + $0x94] sm:$0xf] %vm210_vm1, %v270_v14  ;;  %v273_v30 = vld [vmem:[%s10601_s25 + $0x50] sm:$0xf] }
  0x24   : > { %287 = vst.msk [vmem:[#allocation2 + $0x20] sm:$0xf] %vm210_vm1, %v255_v16  ;;  %288 = vst.msk [vmem:[#allocation2 + $0x24] sm:$0xf] %vm210_vm1, %v256_v17  ;;  %v274_v31 = vld [vmem:[%s10601_s25 + $0x54] sm:$0xf] }
  0x25   : > { %303 = vst.msk [vmem:[#allocation2 + $0xa0] sm:$0xf] %vm210_vm1, %v271_v21  ;;  %304 = vst.msk [vmem:[#allocation2 + $0xa4] sm:$0xf] %vm210_vm1, %v272_v22  ;;  %v259_v33 = vld [vmem:[%s10601_s25 + $0x18] sm:$0xf] }
  0x26   : > { %289 = vst.msk [vmem:[#allocation2 + $0x30] sm:$0xf] %vm210_vm1, %v257_v24  ;;  %290 = vst.msk [vmem:[#allocation2 + $0x34] sm:$0xf] %vm210_vm1, %v258_v26  ;;  %v260_v35 = vld [vmem:[%s10601_s25 + $0x1c] sm:$0xf] }
  0x27   : > { %305 = vst.msk [vmem:[#allocation2 + $0xb0] sm:$0xf] %vm210_vm1, %v273_v30  ;;  %306 = vst.msk [vmem:[#allocation2 + $0xb4] sm:$0xf] %vm210_vm1, %v274_v31  ;;  %v275_v37 = vld [vmem:[%s10601_s25 + $0x58] sm:$0xf] }
  0x28   : > { %v10185_v18 = vld [vmem:[#allocation2 + $0x80] sm:$0xff]   ;;  %291 = vst.msk [vmem:[#allocation2 + $0x40] sm:$0xf] %vm210_vm1, %v259_v33  ;;  %292 = vst.msk [vmem:[#allocation2 + $0x44] sm:$0xf] %vm210_vm1, %v260_v35  ;;  %v10194_v39 = vld [vmem:[#allocation2 + $0xa8] sm:$0xff]  }
  0x29   : > { %9586 = vmatprep.mubr.msk.bf16.mxu1 %vm616_vm2, %v10185_v18  ;;  %v10187_v25 = vld [vmem:[#allocation2 + $0x10] sm:$0xff]   ;;  %v276_v38 = vld [vmem:[%s10601_s25 + $0x5c] sm:$0xf]  ;;  %307 = vst.msk [vmem:[#allocation2 + $0xc0] sm:$0xf] %vm210_vm1, %v275_v37  ;;  %v10200_v54 = vld [vmem:[#allocation2 + $0x48] sm:$0xff]  }
  0x2a   : > { %9587 = vmatmul.mubr.msk.bf16.vlgmr.msra.gmra.mxu1 %vm616_vm2, %v10186_v15  ;;  %v10189_v27 = vld [vmem:[#allocation2 + $0x90] sm:$0xff]   ;;  %9558 = vmatprep.mubr.msk.bf16.mxu0 %vm616_vm2, %v10187_v25  ;;  %308 = vst.msk [vmem:[#allocation2 + $0xc4] sm:$0xf] %vm210_vm1, %v276_v38  ;;  %v261_v40 = vld [vmem:[%s10601_s25 + $0x20] sm:$0xf]  ;;  %v10196_v45 = vld [vmem:[#allocation2 + $0x38] sm:$0xff]  }
  0x2b   : > { %9619 = vmatpush3.bf16.msra.mxu1 %v1655_v19  ;;  %9559 = vmatmul.mubr.msk.bf16.gmra.mxu0 %vm616_vm2, %v10188_v23  ;;  %v10191_v29 = vld [vmem:[#allocation2 + $0x20] sm:$0xff]   ;;  %293 = vst.msk [vmem:[#allocation2 + $0x50] sm:$0xf] %vm210_vm1, %v261_v40  ;;  %v263_v47 = vld [vmem:[%s10601_s25 + $0x28] sm:$0xf]  ;;  %v10198_v49 = vld [vmem:[#allocation2 + $0xb8] sm:$0xff]  }
  0x2c   : > { %10152 = vmatprep.subr.msk.bf16.mxu1 %vm713_vm0, %v10633_v20  ;;  %9590 = vmatprep.mubr.msk.bf16.mxu1 %vm616_vm2, %v10189_v27  ;;  %v10193_v34 = vld [vmem:[#allocation2 + $0xa0] sm:$0xff]   ;;  %v264_v48 = vld [vmem:[%s10601_s25 + $0x2c] sm:$0xf]  ;;  %295 = vst.msk [vmem:[#allocation2 + $0x60] sm:$0xf] %vm210_vm1, %v263_v47  ;;  %v10204_v61 = vld [vmem:[#allocation2 + $0x58] sm:$0xff]  }
  0x2d   : > { %9562 = vmatprep.mubr.msk.bf16.mxu0 %vm616_vm2, %v10191_v29  ;;  %v10195_v36 = vld [vmem:[#allocation2 + $0x30] sm:$0xff]   ;;  %v262_v41 = vld [vmem:[%s10601_s25 + $0x24] sm:$0xf]  ;;  %v277_v43 = vld [vmem:[%s10601_s25 + $0x60] sm:$0xf]  ;;  %v4336_v12 = vsel %vm713_vm0, %v10614_v11, 0 }
  0x2e   : > { %v10197_v42 = vld [vmem:[#allocation2 + $0xb0] sm:$0xff]   ;;  %294 = vst.msk [vmem:[#allocation2 + $0x54] sm:$0xf] %vm210_vm1, %v262_v41  ;;  %v278_v44 = vld [vmem:[%s10601_s25 + $0x64] sm:$0xf]  ;;  %v10202_v59 = vld [vmem:[#allocation2 + $0xc8] sm:$0xff]  }
  0x2f   : > { %309 = vst.msk [vmem:[#allocation2 + $0xd0] sm:$0xf] %vm210_vm1, %v277_v43  ;;  %310 = vst.msk [vmem:[#allocation2 + $0xd4] sm:$0xf] %vm210_vm1, %v278_v44  ;;  %v10199_v46 = vld [vmem:[#allocation2 + $0x40] sm:$0xff]   ;;  %v10206_v63 = vld [vmem:[#allocation2 + $0xd8] sm:$0xff]  }
  0x30   : > { %296 = vst.msk [vmem:[#allocation2 + $0x64] sm:$0xf] %vm210_vm1, %v264_v48  ;;  %v279_v51 = vld [vmem:[%s10601_s25 + $0x68] sm:$0xf]  ;;  %v280_v52 = vld [vmem:[%s10601_s25 + $0x6c] sm:$0xf] }
  0x31   : > { %v10201_v50 = vld [vmem:[#allocation2 + $0xc0] sm:$0xff]   ;;  %311 = vst.msk [vmem:[#allocation2 + $0xe0] sm:$0xf] %vm210_vm1, %v279_v51  ;;  %312 = vst.msk [vmem:[#allocation2 + $0xe4] sm:$0xf] %vm210_vm1, %v280_v52  ;;  %v10208_v1 = vld [vmem:[#allocation2 + $0x68] sm:$0xff]  }
  0x32   : > { %9591 = vmatmul.mubr.msk.bf16.gmra.mxu1 %vm616_vm2, %v10190_v28  ;;  %v265_v53 = vld [vmem:[%s10601_s25 + $0x30] sm:$0xf]  ;;  %v266_v55 = vld [vmem:[%s10601_s25 + $0x34] sm:$0xf]  ;;  %v10210_v3 = vld [vmem:[#allocation2 + $0xe8] sm:$0xff]   ;;  %v3528_v15 = vsel %vm713_vm0, %v10633_v20, 0 }
  0x33   : > { %9594 = vmatprep.mubr.msk.bf16.mxu1 %vm616_vm2, %v10193_v34  ;;  %9563 = vmatmul.mubr.msk.bf16.gmra.mxu0 %vm616_vm2, %v10192_v32  ;;  %297 = vst.msk [vmem:[#allocation2 + $0x70] sm:$0xf] %vm210_vm1, %v265_v53  ;;  %298 = vst.msk [vmem:[#allocation2 + $0x74] sm:$0xf] %vm210_vm1, %v266_v55  ;;  %v281_v57 = vld [vmem:[%s10601_s25 + $0x70] sm:$0xf] }
  0x34   : > { %9566 = vmatprep.mubr.msk.bf16.mxu0 %vm616_vm2, %v10195_v36  ;;  %v282_v58 = vld [vmem:[%s10601_s25 + $0x74] sm:$0xf]  ;;  %313 = vst.msk [vmem:[#allocation2 + $0xf0] sm:$0xf] %vm210_vm1, %v281_v57  ;;  %v10212_v5 = vld [vmem:[#allocation2 + $0x78] sm:$0xff]   ;;  %v10215_v6 = vld [vmem:[#allocation2 + $0x20] sm:$0xff]  }
  0x35   : > { %v10203_v56 = vld [vmem:[#allocation2 + $0x50] sm:$0xff]   ;;  %314 = vst.msk [vmem:[#allocation2 + $0xf4] sm:$0xf] %vm210_vm1, %v282_v58  ;;  %v10214_v7 = vld [vmem:[#allocation2 + $0xf8] sm:$0xff]   ;;  %v10216_v9 = vld [vmem:[#allocation2 + $0x28] sm:$0xff]  }
  0x36   : > { %v10205_v60 = vld [vmem:[#allocation2 + $0xd0] sm:$0xff]   ;;  %v10218_v13 = vld [vmem:[#allocation2 + $0x18] sm:$0xff]   ;;  %v10221_v14 = vld [vmem:[#allocation2 + $0x20] sm:$0xff]  }
  0x37   : > { %v10207_v62 = vld [vmem:[#allocation2 + $0x60] sm:$0xff]   ;;  %v10217_v8 = vld [vmem:[#allocation2 + $0x10] sm:$0xff]   ;;  %v10220_v16 = vld [vmem:[#allocation2 + $0x38] sm:$0xff]  }
  0x38   : > { %v10209_v0 = vld [vmem:[#allocation2 + $0xe0] sm:$0xff]   ;;  %v10219_v10 = vld [vmem:[#allocation2 + $0x30] sm:$0xff]   ;;  %v10222_v11 = vld [vmem:[#allocation2 + $0x28] sm:$0xff]  }
  0x39   : > { %v10223_v17 = vld [vmem:[#allocation2 + $0x40] sm:$0xff]   ;;  %v10225_v18 = vld [vmem:[#allocation2 + $0x30] sm:$0xff]   ;;  %v10224_v19 = vld [vmem:[#allocation2 + $0x48] sm:$0xff]  }
  0x3a   : > { %9595 = vmatmul.mubr.msk.bf16.gmra.mxu1 %vm616_vm2, %v10194_v39  ;;  %v10211_v2 = vld [vmem:[#allocation2 + $0x70] sm:$0xff]   ;;  %v10226_v21 = vld [vmem:[#allocation2 + $0x38] sm:$0xff]   ;;  %v10229_v22 = vld [vmem:[#allocation2 + $0x40] sm:$0xff]  }
  0x3b   : > { %9598 = vmatprep.mubr.msk.bf16.mxu1 %vm616_vm2, %v10197_v42  ;;  %9567 = vmatmul.mubr.msk.bf16.gmra.mxu0 %vm616_vm2, %v10196_v45  ;;  %v10227_v20 = vld [vmem:[#allocation2 + $0x50] sm:$0xff]   ;;  %v10228_v23 = vld [vmem:[#allocation2 + $0x58] sm:$0xff]   ;;  %v10231_v24 = vld [vmem:[#allocation2 + $0x60] sm:$0xff]  }
  0x3c   : > { %9570 = vmatprep.mubr.msk.bf16.mxu0 %vm616_vm2, %v10199_v46  ;;  %v10213_v4 = vld [vmem:[#allocation2 + $0xf0] sm:$0xff]   ;;  %v10230_v25 = vld [vmem:[#allocation2 + $0x48] sm:$0xff]   ;;  %v283_v27 = vld [vmem:[%s10601_s25 + $0x78] sm:$0xf] }
  0x3d   : > { %v10233_v26 = vld [vmem:[#allocation2 + $0x50] sm:$0xff]   ;;  %v284_v28 = vld [vmem:[%s10601_s25 + $0x7c] sm:$0xf]  ;;  %v10232_v29 = vld [vmem:[#allocation2 + $0x68] sm:$0xff]   ;;  %315 = vst.msk [vmem:[#allocation2 + $0x100] sm:$0xf] %vm210_vm1, %v283_v27 }
  0x3e   : > { %316 = vst.msk [vmem:[#allocation2 + $0x104] sm:$0xf] %vm210_vm1, %v284_v28  ;;  %v10235_v30 = vld [vmem:[#allocation2 + $0x70] sm:$0xff]   ;;  %v10234_v31 = vld [vmem:[#allocation2 + $0x58] sm:$0xff]   ;;  %v10237_v32 = vld [vmem:[#allocation2 + $0x60] sm:$0xff]  }
  0x3f   : > { %v10236_v33 = vld [vmem:[#allocation2 + $0x78] sm:$0xff]   ;;  %v10239_v34 = vld [vmem:[#allocation2 + $0x80] sm:$0xff]   ;;  %v10238_v36 = vld [vmem:[#allocation2 + $0x68] sm:$0xff]  }
  0x40   : > { %v10744_v35 = vld [vmem:[%s11896_s1 + $0x1c] sm:$0xf]  ;;  %v10752_v37 = vld [vmem:[%s11896_s1 + $0x8] sm:$0xf]  ;;  %v10241_v38 = vld [vmem:[#allocation2 + $0x70] sm:$0xff]  }
  0x41   : > { %v10240_v39 = vld [vmem:[#allocation2 + $0x88] sm:$0xff]   ;;  %v10243_v40 = vld [vmem:[#allocation2 + $0x90] sm:$0xff]   ;;  %v10242_v41 = vld [vmem:[#allocation2 + $0x78] sm:$0xff]  }
  0x42   : > { %9599 = vmatmul.mubr.msk.bf16.gmra.mxu1 %vm616_vm2, %v10198_v49  ;;  %v10245_v42 = vld [vmem:[#allocation2 + $0x80] sm:$0xff]   ;;  %v10244_v43 = vld [vmem:[#allocation2 + $0x98] sm:$0xff]   ;;  %v10246_v45 = vld [vmem:[#allocation2 + $0x88] sm:$0xff]  }
  0x43   : > { %9602 = vmatprep.mubr.msk.bf16.mxu1 %vm616_vm2, %v10201_v50  ;;  %9571 = vmatmul.mubr.msk.bf16.gmra.mxu0 %vm616_vm2, %v10200_v54  ;;  %v10247_v44 = vld [vmem:[#allocation2 + $0xa0] sm:$0xff]   ;;  %v10249_v46 = vld [vmem:[#allocation2 + $0x90] sm:$0xff]   ;;  %v10248_v47 = vld [vmem:[#allocation2 + $0xa8] sm:$0xff]  }
  0x44   : > { %9574 = vmatprep.mubr.msk.bf16.mxu0 %vm616_vm2, %v10203_v56  ;;  %v10251_v48 = vld [vmem:[#allocation2 + $0xb0] sm:$0xff]   ;;  %v10250_v49 = vld [vmem:[#allocation2 + $0x98] sm:$0xff]   ;;  %v10253_v50 = vld [vmem:[#allocation2 + $0xa0] sm:$0xff]  }
  0x45   : > { %v10252_v51 = vld [vmem:[#allocation2 + $0xb8] sm:$0xff]   ;;  %v10255_v52 = vld [vmem:[#allocation2 + $0xc0] sm:$0xff]   ;;  %v10254_v53 = vld [vmem:[#allocation2 + $0xa8] sm:$0xff]  }
  0x46   : > { %v10257_v54 = vld [vmem:[#allocation2 + $0xb0] sm:$0xff]   ;;  %v10256_v55 = vld [vmem:[#allocation2 + $0xc8] sm:$0xff]   ;;  %v10258_v57 = vld [vmem:[#allocation2 + $0xb8] sm:$0xff]  }
  0x47   : > { %v10259_v56 = vld [vmem:[#allocation2 + $0xd0] sm:$0xff]   ;;  %v10261_v58 = vld [vmem:[#allocation2 + $0xc0] sm:$0xff]   ;;  %v10284_v28 = vld [vmem:[#allocation2 + $0x28] sm:$0xff]  }
  0x4a   : > { %9603 = vmatmul.mubr.msk.bf16.gmra.mxu1 %vm616_vm2, %v10202_v59  ;;  %v10260_v59 = vld [vmem:[#allocation2 + $0xd8] sm:$0xff]  }
  0x4b   : > { %9606 = vmatprep.mubr.msk.bf16.mxu1 %vm616_vm2, %v10205_v60  ;;  %9575 = vmatmul.mubr.msk.bf16.gmra.mxu0 %vm616_vm2, %v10204_v61  ;;  %v10263_v60 = vld [vmem:[#allocation2 + $0xe0] sm:$0xff]   ;;  %v10262_v61 = vld [vmem:[#allocation2 + $0xc8] sm:$0xff]  }
  0x4c   : > { %9578 = vmatprep.mubr.msk.bf16.mxu0 %vm616_vm2, %v10207_v62  ;;  %v10265_v62 = vld [vmem:[#allocation2 + $0xd0] sm:$0xff]  }
  0x52   : > { %9607 = vmatmul.mubr.msk.bf16.gmra.mxu1 %vm616_vm2, %v10206_v63  ;;  %v10264_v63 = vld [vmem:[#allocation2 + $0xe8] sm:$0xff]  }
  0x53   : > { %9610 = vmatprep.mubr.msk.bf16.mxu1 %vm616_vm2, %v10209_v0  ;;  %9579 = vmatmul.mubr.msk.bf16.gmra.mxu0 %vm616_vm2, %v10208_v1  ;;  %v10267_v0 = vld [vmem:[#allocation2 + $0xf0] sm:$0xff]   ;;  %v10266_v1 = vld [vmem:[#allocation2 + $0xd8] sm:$0xff]  }
  0x54   : > { %9582 = vmatprep.mubr.msk.bf16.mxu0 %vm616_vm2, %v10211_v2  ;;  %v10269_v2 = vld [vmem:[#allocation2 + $0xe0] sm:$0xff]  }
  0x5a   : > { %9611 = vmatmul.mubr.msk.bf16.gmra.mxu1 %vm616_vm2, %v10210_v3  ;;  %v10268_v3 = vld [vmem:[#allocation2 + $0xf8] sm:$0xff]  }
  0x5b   : > { %9614 = vmatprep.mubr.msk.bf16.mxu1 %vm616_vm2, %v10213_v4  ;;  %9583 = vmatmul.mubr.msk.bf16.gmra.mxu0 %vm616_vm2, %v10212_v5  ;;  %v10271_v4 = vld [vmem:[#allocation2 + $0x100] sm:$0xff]   ;;  %v10270_v5 = vld [vmem:[#allocation2 + $0xe8] sm:$0xff]  }
  0x5c   : > { %9686 = vmatprep.mubr.msk.bf16.mxu0 %vm616_vm2, %v10215_v6  ;;  %v10273_v6 = vld [vmem:[#allocation2 + $0xf0] sm:$0xff]  }
  0x62   : > { %9615 = vmatmul.mubr.msk.bf16.gmra.mxu1 %vm616_vm2, %v10214_v7  ;;  %v10272_v7 = vld [vmem:[#allocation2 + $0x108] sm:$0xff]  }
  0x63   : > { %9620 = vmatprep.mubr.msk.bf16.mxu1 %vm616_vm2, %v10217_v8  ;;  %9687 = vmatmul.mubr.msk.bf16.vlgmr.msra.gmra.mxu0 %vm616_vm2, %v10216_v9  ;;  %v10275_v8 = vld [vmem:[#allocation2 + $0x110] sm:$0xff]   ;;  %v10274_v9 = vld [vmem:[#allocation2 + $0xf8] sm:$0xff]  }
  0x64   : > { %9690 = vmatprep.mubr.msk.bf16.mxu0 %vm616_vm2, %v10219_v10  ;;  %9817 = vmatpush3.bf16.msra.mxu0 %v4336_v12  ;;  %v10277_v10 = vld [vmem:[#allocation2 + $0x100] sm:$0xff]   ;;  %v10276_v12 = vld [vmem:[#allocation2 + $0x118] sm:$0xff]  }
  0x65   : > { %10155 = vmatprep.subr.msk.bf16.mxu0 %vm713_vm0, %v10752_v37 }
  0x6a   : > { %9621 = vmatmul.mubr.msk.bf16.vlgmr.msra.gmra.mxu1 %vm616_vm2, %v10218_v13  ;;  %v10279_v13 = vld [vmem:[#allocation2 + $0x10] sm:$0xff]  }
  0x6b   : > { %9751 = vmatpush3.bf16.msra.mxu1 %v3528_v15  ;;  %9624 = vmatprep.mubr.msk.bf16.mxu1 %vm616_vm2, %v10221_v14  ;;  %v10278_v14 = vld [vmem:[#allocation2 + $0x108] sm:$0xff]   ;;  %v10281_v15 = vld [vmem:[#allocation2] sm:$0xff]  }
  0x6c   : > { %9691 = vmatmul.mubr.msk.bf16.gmra.mxu0 %vm616_vm2, %v10220_v16  ;;  %10154 = vmatprep.subr.msk.bf16.mxu1 %vm713_vm0, %v10744_v35  ;;  %v10280_v16 = vld [vmem:[#allocation2 + $0x18] sm:$0xff]  }
  0x6d   : > { %9694 = vmatprep.mubr.msk.bf16.mxu0 %vm616_vm2, %v10223_v17  ;;  %v1070_v17 = vlaneseq }
  0x72   : > { %9625 = vmatmul.mubr.msk.bf16.gmra.mxu1 %vm616_vm2, %v10222_v11  ;;  %v10283_v11 = vld [vmem:[#allocation2 + $0x20] sm:$0xff]  }
  0x73   : > { %9628 = vmatprep.mubr.msk.bf16.mxu1 %vm616_vm2, %v10225_v18 }
  0x74   : > { %9695 = vmatmul.mubr.msk.bf16.gmra.mxu0 %vm616_vm2, %v10224_v19  ;;  %v5952_v19 = vsel %vm713_vm0, %v10752_v37, 0 }
  0x75   : > { %9698 = vmatprep.mubr.msk.bf16.mxu0 %vm616_vm2, %v10227_v20 }
  0x7a   : > { %9629 = vmatmul.mubr.msk.bf16.gmra.mxu1 %vm616_vm2, %v10226_v21  ;;  %v10803_v21 = vshrl.u32 %v1070_v17, 7 }
  0x7b   : > { %9632 = vmatprep.mubr.msk.bf16.mxu1 %vm616_vm2, %v10229_v22  ;;  %v10282_v22 = vld [vmem:[#allocation2 + $0x8] sm:$0xff]  }
  0x7c   : > { %9699 = vmatmul.mubr.msk.bf16.gmra.mxu0 %vm616_vm2, %v10228_v23  ;;  %v10285_v23 = vld [vmem:[#allocation2 + $0x10] sm:$0xff]   ;;  %vm1072_vm3 = vcmp.lt.s32.totalorder %v10803_v21, 1  ;;  %vm6307_vm4 = vcmp.lt.s32.totalorder %v10803_v21, 7 }
  0x7d   : > { %9702 = vmatprep.mubr.msk.bf16.mxu0 %vm616_vm2, %v10231_v24 }
  0x82   : > { %9633 = vmatmul.mubr.msk.bf16.gmra.mxu1 %vm616_vm2, %v10230_v25 }
  0x83   : > { %9636 = vmatprep.mubr.msk.bf16.mxu1 %vm616_vm2, %v10233_v26  ;;  %v5144_v26 = vsel %vm713_vm0, %v10744_v35, 0  ;;  %v10286_v35 = vld [vmem:[#allocation2 + $0x18] sm:$0xff]  }
  0x84   : > { %9703 = vmatmul.mubr.msk.bf16.gmra.mxu0 %vm616_vm2, %v10232_v29 }
  0x85   : > { %9706 = vmatprep.mubr.msk.bf16.mxu0 %vm616_vm2, %v10235_v30 }
  0x8a   : > { %9637 = vmatmul.mubr.msk.bf16.gmra.mxu1 %vm616_vm2, %v10234_v31  ;;  %v10287_v31 = vld [vmem:[#allocation2 + $0x30] sm:$0xff]  }
  0x8b   : > { %9640 = vmatprep.mubr.msk.bf16.mxu1 %vm616_vm2, %v10237_v32  ;;  %v9121_v32 = vld [vmem:[%s11896_s1 + $0x14] sm:$0xf] }
  0x8c   : > { %9707 = vmatmul.mubr.msk.bf16.gmra.mxu0 %vm616_vm2, %v10236_v33 }
  0x8d   : > { %9710 = vmatprep.mubr.msk.bf16.mxu0 %vm616_vm2, %v10239_v34 }
  0x92   : > { %9641 = vmatmul.mubr.msk.bf16.gmra.mxu1 %vm616_vm2, %v10238_v36  ;;  %v9186_v36 = vld [vmem:[%s11896_s1 + $0x20] sm:$0xf] }
  0x93   : > { %9644 = vmatprep.mubr.msk.bf16.mxu1 %vm616_vm2, %v10241_v38 }
  0x94   : > { %9711 = vmatmul.mubr.msk.bf16.gmra.mxu0 %vm616_vm2, %v10240_v39  ;;  %v10289_v39 = vld [vmem:[#allocation2 + $0x20] sm:$0xff]  }
  0x95   : > { %9714 = vmatprep.mubr.msk.bf16.mxu0 %vm616_vm2, %v10243_v40 }
  0x9a   : > { %9645 = vmatmul.mubr.msk.bf16.gmra.mxu1 %vm616_vm2, %v10242_v41 }
  0x9b   : > { %9648 = vmatprep.mubr.msk.bf16.mxu1 %vm616_vm2, %v10245_v42 }
  0x9c   : > { %9715 = vmatmul.mubr.msk.bf16.gmra.mxu0 %vm616_vm2, %v10244_v43  ;;  %v10834_v43 = vld [vmem:[%s11897_s2] ss:$0 sm:$0xff] }
  0x9d   : > { %9718 = vmatprep.mubr.msk.bf16.mxu0 %vm616_vm2, %v10247_v44 }
  0xa2   : > { %9649 = vmatmul.mubr.msk.bf16.gmra.mxu1 %vm616_vm2, %v10246_v45 }
  0xa3   : > { %9652 = vmatprep.mubr.msk.bf16.mxu1 %vm616_vm2, %v10249_v46 }
  0xa4   : > { %9719 = vmatmul.mubr.msk.bf16.gmra.mxu0 %vm616_vm2, %v10248_v47 }
  0xa5   : > { %9722 = vmatprep.mubr.msk.bf16.mxu0 %vm616_vm2, %v10251_v48 }
  0xaa   : > { %9653 = vmatmul.mubr.msk.bf16.gmra.mxu1 %vm616_vm2, %v10250_v49  ;;  %v10288_v49 = vld [vmem:[#allocation2 + $0x38] sm:$0xff]  }
  0xab   : > { %9656 = vmatprep.mubr.msk.bf16.mxu1 %vm616_vm2, %v10253_v50 }
  0xac   : > { %9723 = vmatmul.mubr.msk.bf16.gmra.mxu0 %vm616_vm2, %v10252_v51 }
  0xad   : > { %9726 = vmatprep.mubr.msk.bf16.mxu0 %vm616_vm2, %v10255_v52  ;;  %v10291_v52 = vld [vmem:[#allocation2 + $0x40] sm:$0xff]  }
  0xb2   : > { %9657 = vmatmul.mubr.msk.bf16.gmra.mxu1 %vm616_vm2, %v10254_v53 }
  0xb3   : > { %9660 = vmatprep.mubr.msk.bf16.mxu1 %vm616_vm2, %v10257_v54 }
  0xb4   : > { %9727 = vmatmul.mubr.msk.bf16.gmra.mxu0 %vm616_vm2, %v10256_v55 }
  0xb5   : > { %9730 = vmatprep.mubr.msk.bf16.mxu0 %vm616_vm2, %v10259_v56 }
  0xba   : > { %9661 = vmatmul.mubr.msk.bf16.gmra.mxu1 %vm616_vm2, %v10258_v57 }
  0xbb   : > { %9664 = vmatprep.mubr.msk.bf16.mxu1 %vm616_vm2, %v10261_v58 }
  0xbc   : > { %9731 = vmatmul.mubr.msk.bf16.gmra.mxu0 %vm616_vm2, %v10260_v59  ;;  %v10290_v59 = vld [vmem:[#allocation2 + $0x28] sm:$0xff]  }
  0xbd   : > { %9734 = vmatprep.mubr.msk.bf16.mxu0 %vm616_vm2, %v10263_v60 }
  0xc2   : > { %9665 = vmatmul.mubr.msk.bf16.gmra.mxu1 %vm616_vm2, %v10262_v61 }
  0xc3   : > { %9668 = vmatprep.mubr.msk.bf16.mxu1 %vm616_vm2, %v10265_v62 }
  0xc4   : > { %9735 = vmatmul.mubr.msk.bf16.gmra.mxu0 %vm616_vm2, %v10264_v63 }
  0xc5   : > { %9738 = vmatprep.mubr.msk.bf16.mxu0 %vm616_vm2, %v10267_v0  ;;  %v10293_v0 = vld [vmem:[#allocation2 + $0x30] sm:$0xff]  }
  0xca   : > { %9669 = vmatmul.mubr.msk.bf16.gmra.mxu1 %vm616_vm2, %v10266_v1 }
  0xcb   : > { %9672 = vmatprep.mubr.msk.bf16.mxu1 %vm616_vm2, %v10269_v2 }
  0xcc   : > { %9739 = vmatmul.mubr.msk.bf16.gmra.mxu0 %vm616_vm2, %v10268_v3 }
  0xcd   : > { %9742 = vmatprep.mubr.msk.bf16.mxu0 %vm616_vm2, %v10271_v4 }
  0xd2   : > { %9673 = vmatmul.mubr.msk.bf16.gmra.mxu1 %vm616_vm2, %v10270_v5 }
  0xd3   : > { %9676 = vmatprep.mubr.msk.bf16.mxu1 %vm616_vm2, %v10273_v6 }
  0xd4   : > { %9743 = vmatmul.mubr.msk.bf16.gmra.mxu0 %vm616_vm2, %v10272_v7 }
  0xd5   : > { %9746 = vmatprep.mubr.msk.bf16.mxu0 %vm616_vm2, %v10275_v8 }
  0xd6   : > { %v9556_v18 = vpop.f32.mrf.mxu0 }
  0xd8   : > { %v10801_v20 = vpop.f32.mrf.mxu0 }
  0xd9   : > { %v1006_v25 = vrot.slane %v10801_v20, 7 }
  0xda   : > { %9677 = vmatmul.mubr.msk.bf16.gmra.mxu1 %vm616_vm2, %v10274_v9  ;;  %v9557_v24 = vpop.f32.mrf.mxu0  ;;  %v10292_v9 = vld [vmem:[#allocation2 + $0x48] sm:$0xff]  }
  0xdb   : > { %9680 = vmatprep.mubr.msk.bf16.mxu1 %vm616_vm2, %v10277_v10  ;;  %v1009_v42 = vrot.slane %v9557_v24, 7 }
  0xdc   : > { %9747 = vmatmul.mubr.msk.bf16.gmra.mxu0 %vm616_vm2, %v10276_v12  ;;  %v754_v27 = vpop.f32.mrf.mxu0 }
  0xdd   : > { %9818 = vmatprep.mubr.msk.bf16.mxu0 %vm616_vm2, %v10279_v13  ;;  %v1007_v29 = vrot.slane %v754_v27, 7  ;;  %v10295_v13 = vld [vmem:[#allocation2 + $0x50] sm:$0xff]   ;;  %v10297_v27 = vld [vmem:[#allocation2 + $0x40] sm:$0xff]  }
  0xdf   : > { %v10820_v33 = vsel %vm1072_vm3, %v1006_v25, %v1007_v29 }
  0xe2   : > { %9681 = vmatmul.mubr.msk.bf16.gmra.mxu1 %vm616_vm2, %v10278_v14 }
  0xe3   : > { %9752 = vmatprep.mubr.msk.bf16.mxu1 %vm616_vm2, %v10281_v15 }
  0xe4   : > { %9819 = vmatmul.mubr.msk.bf16.vlgmr.msra.gmra.mxu0 %vm616_vm2, %v10280_v16 }
  0xe5   : > { %9822 = vmatprep.mubr.msk.bf16.mxu0 %vm616_vm2, %v10283_v11  ;;  %9949 = vmatpush3.bf16.msra.mxu0 %v5952_v19  ;;  %v10294_v19 = vld [vmem:[#allocation2 + $0x38] sm:$0xff]  }
  0xe6   : > { %10157 = vmatprep.subr.msk.bf16.mxu0 %vm713_vm0, %v9186_v36 }
  0xea   : > { %v9588_v30 = vpop.f32.mrf.mxu1  ;;  %9753 = vmatmul.mubr.msk.bf16.vlgmr.msra.gmra.mxu1 %vm616_vm2, %v10282_v22 }
  0xeb   : > { %9883 = vmatpush3.bf16.msra.mxu1 %v5144_v26  ;;  %9756 = vmatprep.mubr.msk.bf16.mxu1 %vm616_vm2, %v10285_v23  ;;  %v9560_v37 = vpop.f32.mrf.mxu0 }
  0xec   : > { %v10822_v34 = vpop.f32.mrf.mxu1  ;;  %10156 = vmatprep.subr.msk.bf16.mxu1 %vm713_vm0, %v9121_v32  ;;  %9823 = vmatmul.mubr.msk.bf16.gmra.mxu0 %vm616_vm2, %v10284_v28 }
  0xed   : > { %9826 = vmatprep.mubr.msk.bf16.mxu0 %vm616_vm2, %v10287_v31  ;;  %v767_v40 = vpop.f32.mrf.mxu0  ;;  %v1038_v44 = vrot.slane %v10822_v34, 7 }
  0xee   : > { %v9589_v38 = vpop.f32.mrf.mxu1  ;;  %v1010_v45 = vrot.slane %v767_v40, 7 }
  0xef   : > { %v9561_v47 = vpop.f32.mrf.mxu0  ;;  %v1041_v56 = vrot.slane %v9589_v38, 7  ;;  %v10296_v38 = vld [vmem:[#allocation2 + $0x58] sm:$0xff]  }
  0xf0   : > { %v882_v41 = vpop.f32.mrf.mxu1  ;;  %v10840_v50 = vsel %vm1072_vm3, %v1009_v42, %v1010_v45  ;;  %v1013_v4 = vrot.slane %v9561_v47, 7 }
  0xf1   : > { %v1039_v46 = vrot.slane %v882_v41, 7  ;;  %v770_v54 = vpop.f32.mrf.mxu0  ;;  %v10299_v41 = vld [vmem:[#allocation2 + $0x60] sm:$0xff]  }
  0xf2   : > { %v9592_v48 = vpop.f32.mrf.mxu1  ;;  %9757 = vmatmul.mubr.msk.bf16.gmra.mxu1 %vm616_vm2, %v10286_v35  ;;  %v1011_v57 = vrot.slane %v770_v54, 7 }
  0xf3   : > { %v1103_v51 = vsel %vm1072_vm3, %v1038_v44, %v1039_v46  ;;  %9760 = vmatprep.mubr.msk.bf16.mxu1 %vm616_vm2, %v10289_v39  ;;  %v9564_v60 = vpop.f32.mrf.mxu0 }
  0xf4   : > { %v10848_v53 = vadd.f32 %v10834_v43, %v1103_v51  ;;  %v895_v55 = vpop.f32.mrf.mxu1  ;;  %9827 = vmatmul.mubr.msk.bf16.gmra.mxu0 %vm616_vm2, %v10288_v49  ;;  %v10853_v62 = vsel %vm1072_vm3, %v1010_v45, %v1011_v57  ;;  %v10298_v51 = vld [vmem:[#allocation2 + $0x48] sm:$0xff]   ;;  %v10301_v57 = vld [vmem:[#allocation2 + $0x50] sm:$0xff]  }
  0xf5   : > { %v1042_v58 = vrot.slane %v895_v55, 7  ;;  %9830 = vmatprep.mubr.msk.bf16.mxu0 %vm616_vm2, %v10291_v52  ;;  %v783_v2 = vpop.f32.mrf.mxu0 }
  0xf6   : > { %v9593_v61 = vpop.f32.mrf.mxu1  ;;  %v1014_v5 = vrot.slane %v783_v2, 7 }
  0xf7   : > { %v1100_v63 = vsel %vm1072_vm3, %v1041_v56, %v1042_v58  ;;  %v9565_v7 = vpop.f32.mrf.mxu0  ;;  %v1045_v17 = vrot.slane %v9593_v61, 7 }
  0xf8   : > { %v10859_v1 = vadd.f32 %v10834_v43, %v1100_v63  ;;  %v898_v3 = vpop.f32.mrf.mxu1  ;;  %v10864_v10 = vsel %vm1072_vm3, %v1013_v4, %v1014_v5  ;;  %v1017_v31 = vrot.slane %v9565_v7, 7  ;;  %v10300_v4 = vld [vmem:[#allocation2 + $0x68] sm:$0xff]   ;;  %v10303_v7 = vld [vmem:[#allocation2 + $0x70] sm:$0xff]  }
  0xf9   : > { %v1043_v6 = vrot.slane %v898_v3, 7  ;;  %v786_v15 = vpop.f32.mrf.mxu0 }
  0xfa   : > { %v9596_v8 = vpop.f32.mrf.mxu1  ;;  %9761 = vmatmul.mubr.msk.bf16.gmra.mxu1 %vm616_vm2, %v10290_v59  ;;  %v1015_v11 = vrot.slane %v786_v15, 7 }
  0xfb   : > { %v1099_v12 = vsel %vm1072_vm3, %v1042_v58, %v1043_v6  ;;  %9764 = vmatprep.mubr.msk.bf16.mxu1 %vm616_vm2, %v10293_v0  ;;  %v9568_v22 = vpop.f32.mrf.mxu0 }
  0xfc   : > { %v10870_v14 = vadd.f32 %v10834_v43, %v1099_v12  ;;  %v911_v16 = vpop.f32.mrf.mxu1  ;;  %9831 = vmatmul.mubr.msk.bf16.gmra.mxu0 %vm616_vm2, %v10292_v9  ;;  %v10875_v24 = vsel %vm1072_vm3, %v1014_v5, %v1015_v11 }
  0xfd   : > { %v1046_v18 = vrot.slane %v911_v16, 7  ;;  %9834 = vmatprep.mubr.msk.bf16.mxu0 %vm616_vm2, %v10295_v13  ;;  %v799_v29 = vpop.f32.mrf.mxu0 }
  0xfe   : > { %v9597_v23 = vpop.f32.mrf.mxu1  ;;  %v1018_v32 = vrot.slane %v799_v29, 7 }
  0xff   : > { %v1096_v26 = vsel %vm1072_vm3, %v1045_v17, %v1046_v18  ;;  %v9569_v36 = vpop.f32.mrf.mxu0  ;;  %v1049_v47 = vrot.slane %v9597_v23, 7  ;;  %v10302_v17 = vld [vmem:[#allocation2 + $0x58] sm:$0xff]   ;;  %v10305_v23 = vld [vmem:[#allocation2 + $0x60] sm:$0xff]  }
 0x100   : > { %v10881_v28 = vadd.f32 %v10834_v43, %v1096_v26  ;;  %v914_v30 = vpop.f32.mrf.mxu1  ;;  %v10886_v39 = vsel %vm1072_vm3, %v1017_v31, %v1018_v32  ;;  %v1021_v61 = vrot.slane %v9569_v36, 7 }
 0x101   : > { %v1047_v35 = vrot.slane %v914_v30, 7  ;;  %v802_v45 = vpop.f32.mrf.mxu0 }
 0x102   : > { %v9600_v37 = vpop.f32.mrf.mxu1  ;;  %9765 = vmatmul.mubr.msk.bf16.gmra.mxu1 %vm616_vm2, %v10294_v19  ;;  %v1019_v48 = vrot.slane %v802_v45, 7 }
 0x103   : > { %v1095_v40 = vsel %vm1072_vm3, %v1046_v18, %v1047_v35  ;;  %9768 = vmatprep.mubr.msk.bf16.mxu1 %vm616_vm2, %v10297_v27  ;;  %v9572_v52 = vpop.f32.mrf.mxu0  ;;  %v10304_v37 = vld [vmem:[#allocation2 + $0x78] sm:$0xff]  }
 0x104   : > { %v10892_v42 = vadd.f32 %v10834_v43, %v1095_v40  ;;  %v927_v46 = vpop.f32.mrf.mxu1  ;;  %9835 = vmatmul.mubr.msk.bf16.gmra.mxu0 %vm616_vm2, %v10296_v38  ;;  %v10897_v55 = vsel %vm1072_vm3, %v1018_v32, %v1019_v48  ;;  %v10306_v52 = vld [vmem:[#allocation2 + $0x68] sm:$0xff]  }
 0x105   : > { %v1050_v49 = vrot.slane %v927_v46, 7  ;;  %9838 = vmatprep.mubr.msk.bf16.mxu0 %vm616_vm2, %v10299_v41  ;;  %v815_v59 = vpop.f32.mrf.mxu0  ;;  %v10307_v41 = vld [vmem:[#allocation2 + $0x80] sm:$0xff]  }
 0x106   : > { %v9601_v54 = vpop.f32.mrf.mxu1  ;;  %v1022_v63 = vrot.slane %v815_v59, 7 }
 0x107   : > { %v1092_v56 = vsel %vm1072_vm3, %v1049_v47, %v1050_v49  ;;  %v9573_v2 = vpop.f32.mrf.mxu0  ;;  %v1053_v13 = vrot.slane %v9601_v54, 7 }
 0x108   : > { %v10903_v58 = vadd.f32 %v10834_v43, %v1092_v56  ;;  %v930_v60 = vpop.f32.mrf.mxu1  ;;  %v10908_v5 = vsel %vm1072_vm3, %v1021_v61, %v1022_v63  ;;  %v1025_v30 = vrot.slane %v9573_v2, 7 }
 0x109   : > { %v1051_v0 = vrot.slane %v930_v60, 7  ;;  %v818_v9 = vpop.f32.mrf.mxu0  ;;  %v10309_v60 = vld [vmem:[#allocation2 + $0x70] sm:$0xff]  }
 0x10a   : > { %v9604_v3 = vpop.f32.mrf.mxu1  ;;  %9769 = vmatmul.mubr.msk.bf16.gmra.mxu1 %vm616_vm2, %v10298_v51  ;;  %v1023_v15 = vrot.slane %v818_v9, 7  ;;  %v10308_v9 = vld [vmem:[#allocation2 + $0x88] sm:$0xff]  }
 0x10b   : > { %v1091_v6 = vsel %vm1072_vm3, %v1050_v49, %v1051_v0  ;;  %9772 = vmatprep.mubr.msk.bf16.mxu1 %vm616_vm2, %v10301_v57  ;;  %v9576_v11 = vpop.f32.mrf.mxu0 }
 0x10c   : > { %v10914_v8 = vadd.f32 %v10834_v43, %v1091_v6  ;;  %v943_v12 = vpop.f32.mrf.mxu1  ;;  %9839 = vmatmul.mubr.msk.bf16.gmra.mxu0 %vm616_vm2, %v10300_v4  ;;  %v10919_v19 = vsel %vm1072_vm3, %v1022_v63, %v1023_v15  ;;  %v10311_v15 = vld [vmem:[#allocation2 + $0x90] sm:$0xff]  }
 0x10d   : > { %v1054_v16 = vrot.slane %v943_v12, 7  ;;  %9842 = vmatprep.mubr.msk.bf16.mxu0 %vm616_vm2, %v10303_v7  ;;  %v831_v27 = vpop.f32.mrf.mxu0 }
 0x10e   : > { %v9605_v18 = vpop.f32.mrf.mxu1  ;;  %v1026_v31 = vrot.slane %v831_v27, 7  ;;  %v10310_v27 = vld [vmem:[#allocation2 + $0x78] sm:$0xff]  }
 0x10f   : > { %v1088_v22 = vsel %vm1072_vm3, %v1053_v13, %v1054_v16  ;;  %v9577_v35 = vpop.f32.mrf.mxu0  ;;  %v1057_v48 = vrot.slane %v9605_v18, 7 }
 0x110   : > { %v10925_v26 = vadd.f32 %v10834_v43, %v1088_v22  ;;  %v946_v29 = vpop.f32.mrf.mxu1  ;;  %v10930_v38 = vsel %vm1072_vm3, %v1025_v30, %v1026_v31  ;;  %v1029_v2 = vrot.slane %v9577_v35, 7  ;;  %v10313_v35 = vld [vmem:[#allocation2 + $0x80] sm:$0xff]  }
 0x111   : > { %v1055_v32 = vrot.slane %v946_v29, 7  ;;  %v834_v46 = vpop.f32.mrf.mxu0 }
 0x112   : > { %v9608_v36 = vpop.f32.mrf.mxu1  ;;  %9773 = vmatmul.mubr.msk.bf16.gmra.mxu1 %vm616_vm2, %v10302_v17  ;;  %v1027_v49 = vrot.slane %v834_v46, 7 }
 0x113   : > { %v1087_v40 = vsel %vm1072_vm3, %v1054_v16, %v1055_v32  ;;  %9776 = vmatprep.mubr.msk.bf16.mxu1 %vm616_vm2, %v10305_v23  ;;  %v9580_v54 = vpop.f32.mrf.mxu0 }
 0x114   : > { %v10936_v45 = vadd.f32 %v10834_v43, %v1087_v40  ;;  %v959_v47 = vpop.f32.mrf.mxu1  ;;  %9843 = vmatmul.mubr.msk.bf16.gmra.mxu0 %vm616_vm2, %v10304_v37  ;;  %v10941_v57 = vsel %vm1072_vm3, %v1026_v31, %v1027_v49 }
 0x115   : > { %v1058_v51 = vrot.slane %v959_v47, 7  ;;  %9846 = vmatprep.mubr.msk.bf16.mxu0 %vm616_vm2, %v10307_v41  ;;  %v847_v63 = vpop.f32.mrf.mxu0 }
 0x116   : > { %v9609_v56 = vpop.f32.mrf.mxu1  ;;  %v1030_v3 = vrot.slane %v847_v63, 7 }
 0x117   : > { %v1084_v59 = vsel %vm1072_vm3, %v1057_v48, %v1058_v51  ;;  %v9581_v6 = vpop.f32.mrf.mxu0  ;;  %v1061_v18 = vrot.slane %v9609_v56, 7 }
 0x118   : > { %v10947_v61 = vadd.f32 %v10834_v43, %v1084_v59  ;;  %v962_v0 = vpop.f32.mrf.mxu1  ;;  %v10952_v12 = vsel %vm1072_vm3, %v1029_v2, %v1030_v3  ;;  %v1033_v41 = vrot.slane %v9581_v6, 7  ;;  %v10315_v59 = vld [vmem:[#allocation2 + $0xa0] sm:$0xff]  }
 0x119   : > { %v1059_v4 = vrot.slane %v962_v0, 7  ;;  %v850_v17 = vpop.f32.mrf.mxu0 }
 0x11a   : > { %v9612_v7 = vpop.f32.mrf.mxu1  ;;  %9777 = vmatmul.mubr.msk.bf16.gmra.mxu1 %vm616_vm2, %v10306_v52  ;;  %v1031_v22 = vrot.slane %v850_v17, 7 }
 0x11b   : > { %v1083_v13 = vsel %vm1072_vm3, %v1058_v51, %v1059_v4  ;;  %9780 = vmatprep.mubr.msk.bf16.mxu1 %vm616_vm2, %v10309_v60  ;;  %v9584_v29 = vpop.f32.mrf.mxu0  ;;  %v10312_v51 = vld [vmem:[#allocation2 + $0x98] sm:$0xff]   ;;  %v10314_v7 = vld [vmem:[#allocation2 + $0x88] sm:$0xff]  }
 0x11c   : > { %v10958_v16 = vadd.f32 %v10834_v43, %v1083_v13  ;;  %v975_v11 = vpop.f32.mrf.mxu1  ;;  %9847 = vmatmul.mubr.msk.bf16.gmra.mxu0 %vm616_vm2, %v10308_v9  ;;  %v10963_v31 = vsel %vm1072_vm3, %v1030_v3, %v1031_v22 }
 0x11d   : > { %v1062_v23 = vrot.slane %v975_v11, 7  ;;  %9850 = vmatprep.mubr.msk.bf16.mxu0 %vm616_vm2, %v10311_v15  ;;  %v863_v37 = vpop.f32.mrf.mxu0 }
 0x11e   : > { %v9613_v30 = vpop.f32.mrf.mxu1  ;;  %v1034_v46 = vrot.slane %v863_v37, 7 }
 0x11f   : > { %v1080_v32 = vsel %vm1072_vm3, %v1061_v18, %v1062_v23  ;;  %v9585_v48 = vpop.f32.mrf.mxu0  ;;  %v1065_v2 = vrot.slane %v9613_v30, 7 }
 0x120   : > { %v10969_v36 = vadd.f32 %v10834_v43, %v1080_v32  ;;  %v978_v40 = vpop.f32.mrf.mxu1  ;;  %v10974_v52 = vsel %vm1072_vm3, %v1033_v41, %v1034_v46  ;;  %v1037_v54 = vrot.slane %v9585_v48, 7  ;;  %v10319_v41 = vld [vmem:[#allocation2 + $0xb0] sm:$0xff]   ;;  %v10318_v48 = vld [vmem:[#allocation2 + $0x98] sm:$0xff]  }
 0x121   : > { %v1063_v47 = vrot.slane %v978_v40, 7  ;;  %v866_v63 = vpop.f32.mrf.mxu0 }
 0x122   : > { %v9616_v49 = vpop.f32.mrf.mxu1  ;;  %9781 = vmatmul.mubr.msk.bf16.gmra.mxu1 %vm616_vm2, %v10310_v27  ;;  %v1104_v3 = vsel %vm1072_vm3, %v1037_v54, %v1038_v44  ;;  %v1035_v4 = vrot.slane %v866_v63, 7  ;;  %v10317_v44 = vld [vmem:[#allocation2 + $0x90] sm:$0xff]   ;;  %v10321_v54 = vld [vmem:[#allocation2 + $0xa0] sm:$0xff]  }
 0x123   : > { %v1079_v56 = vsel %vm1072_vm3, %v1062_v23, %v1063_v47  ;;  %9784 = vmatprep.mubr.msk.bf16.mxu1 %vm616_vm2, %v10313_v35  ;;  %v10987_v9 = vadd.f32 %v10834_v43, %v1104_v3  ;;  %v9688_v13 = vpop.f32.mrf.mxu0  ;;  %v10316_v35 = vld [vmem:[#allocation2 + $0xa8] sm:$0xff]  }
 0x124   : > { %v10980_v60 = vadd.f32 %v10834_v43, %v1079_v56  ;;  %v991_v0 = vpop.f32.mrf.mxu1  ;;  %9851 = vmatmul.mubr.msk.bf16.gmra.mxu0 %vm616_vm2, %v10312_v51  ;;  %v10992_v17 = vsel %vm1072_vm3, %v1034_v46, %v1035_v4 }
 0x125   : > { %v1066_v6 = vrot.slane %v991_v0, 7  ;;  %9854 = vmatprep.mubr.msk.bf16.mxu0 %vm616_vm2, %v10315_v59  ;;  %v11000_v22 = vpop.f32.mrf.mxu0 }
 0x126   : > { %v9617_v15 = vpop.f32.mrf.mxu1  ;;  %v2883_v37 = vrot.slane %v11000_v22, 7 }
 0x127   : > { %v1076_v34 = vsel %vm1072_vm3, %v1065_v2, %v1066_v6  ;;  %v1069_v11 = vrot.slane %v9617_v15, 7  ;;  %v9689_v30 = vpop.f32.mrf.mxu0  ;;  %v10320_v15 = vld [vmem:[#allocation2 + $0xb8] sm:$0xff]  }
 0x128   : > { %v10998_v18 = vadd.f32 %v10834_v43, %v1076_v34  ;;  %v994_v23 = vpop.f32.mrf.mxu1  ;;  %v2886_v0 = vrot.slane %v9689_v30, 7 }
 0x129   : > { %v11006_v27 = vsel %vm1072_vm3, %v1069_v11, %v1006_v25  ;;  %v1067_v29 = vrot.slane %v994_v23, 7  ;;  %v2631_v46 = vpop.f32.mrf.mxu0  ;;  %v10323_v11 = vld [vmem:[#allocation2 + $0xc0] sm:$0xff]  }
 0x12a   : > { %v9622_v32 = vpop.f32.mrf.mxu1  ;;  %9785 = vmatmul.mubr.msk.bf16.gmra.mxu1 %vm616_vm2, %v10314_v7  ;;  %v2884_v47 = vrot.slane %v2631_v46, 7 }
 0x12b   : > { %v1075_v40 = vsel %vm1072_vm3, %v1066_v6, %v1067_v29  ;;  %9788 = vmatprep.mubr.msk.bf16.mxu1 %vm616_vm2, %v10317_v44  ;;  %v1202_v6 = vadd.f32 %v10834_v43, %v10820_v33 }
 0x12c   : > { %v11014_v20 = vadd.f32 %v10834_v43, %v1075_v40  ;;  %v11016_v25 = vpop.f32.mrf.mxu1  ;;  %v9692_v49 = vpop.f32.mrf.mxu0  ;;  %9855 = vmatmul.mubr.msk.bf16.gmra.mxu0 %vm616_vm2, %v10316_v35  ;;  %v3009_v56 = vsel %vm1072_vm3, %v2883_v37, %v2884_v47  ;;  %v10322_v40 = vld [vmem:[#allocation2 + $0xa8] sm:$0xff]  }
 0x12d   : > { %9858 = vmatprep.mubr.msk.bf16.mxu0 %vm616_vm2, %v10319_v41  ;;  %v1946_v2 = vrot.slane %v11016_v25, 7  ;;  %v1205_v41 = vadd.f32 %v10834_v43, %v10840_v50 }
 0x12e   : > { %v9623_v51 = vpop.f32.mrf.mxu1  ;;  %v2644_v59 = vpop.f32.mrf.mxu0 }
 0x12f   : > { %v2887_v3 = vrot.slane %v2644_v59, 7  ;;  %v1949_v33 = vrot.slane %v9623_v51, 7 }
 0x130   : > { %v1694_v63 = vpop.f32.mrf.mxu1  ;;  %v9693_v7 = vpop.f32.mrf.mxu0 }
 0x131   : > { %v1947_v4 = vrot.slane %v1694_v63, 7  ;;  %v3006_v44 = vsel %vm1072_vm3, %v2886_v0, %v2887_v3 }
 0x132   : > { %v9626_v13 = vpop.f32.mrf.mxu1  ;;  %9789 = vmatmul.mubr.msk.bf16.gmra.mxu1 %vm616_vm2, %v10318_v48  ;;  %v2647_v23 = vpop.f32.mrf.mxu0 }
 0x133   : > { %v2072_v34 = vsel %vm1072_vm3, %v1946_v2, %v1947_v4  ;;  %9792 = vmatprep.mubr.msk.bf16.mxu1 %vm616_vm2, %v10321_v54  ;;  %v2888_v32 = vrot.slane %v2647_v23, 7  ;;  %v10325_v54 = vld [vmem:[#allocation2 + $0xb0] sm:$0xff]   ;;  %v2890_v4 = vrot.slane %v9693_v7, 7  ;;  %v1206_v13 = vadd.f32 %v10834_v43, %v10853_v62 }
 0x134   : > { %v1707_v29 = vpop.f32.mrf.mxu1  ;;  %v2139_v30 = vadd.f32 %v2072_v34, %v1202_v6  ;;  %v9696_v46 = vpop.f32.mrf.mxu0  ;;  %9859 = vmatmul.mubr.msk.bf16.gmra.mxu0 %vm616_vm2, %v10320_v15  ;;  %v10324_v34 = vld [vmem:[#allocation2 + $0xc8] sm:$0xff]  }
 0x135   : > { %v1950_v35 = vrot.slane %v1707_v29, 7  ;;  %9862 = vmatprep.mubr.msk.bf16.mxu0 %vm616_vm2, %v10323_v11  ;;  %v3005_v51 = vsel %vm1072_vm3, %v2887_v3, %v2888_v32  ;;  %v10327_v3 = vld [vmem:[#allocation2 + $0xd0] sm:$0xff]  }
 0x136   : > { %v9627_v47 = vpop.f32.mrf.mxu1  ;;  %v11038_v48 = vadd.f32 %v3009_v56, %v2139_v30  ;;  %v2660_v59 = vpop.f32.mrf.mxu0 }
 0x137   : > { %v2069_v49 = vsel %vm1072_vm3, %v1949_v33, %v1950_v35  ;;  %v2891_v50 = vrot.slane %v2660_v59, 7  ;;  %v1953_v62 = vrot.slane %v9627_v47, 7  ;;  %v10329_v59 = vld [vmem:[#allocation2 + $0xc0] sm:$0xff]  }
 0x138   : > { %v1710_v63 = vpop.f32.mrf.mxu1  ;;  %v2142_v0 = vadd.f32 %v2069_v49, %v1205_v41  ;;  %v9697_v56 = vpop.f32.mrf.mxu0 }
 0x139   : > { %v1951_v6 = vrot.slane %v1710_v63, 7  ;;  %v3002_v7 = vsel %vm1072_vm3, %v2890_v4, %v2891_v50 }
 0x13a   : > { %v9630_v15 = vpop.f32.mrf.mxu1  ;;  %9793 = vmatmul.mubr.msk.bf16.gmra.mxu1 %vm616_vm2, %v10322_v40  ;;  %v11048_v23 = vadd.f32 %v3006_v44, %v2142_v0  ;;  %v2663_v29 = vpop.f32.mrf.mxu0  ;;  %v1209_v40 = vadd.f32 %v10834_v43, %v10864_v10  ;;  %v2894_v10 = vrot.slane %v9697_v56, 7 }
 0x13b   : > { %v2068_v11 = vsel %vm1072_vm3, %v1950_v35, %v1951_v6  ;;  %9796 = vmatprep.mubr.msk.bf16.mxu1 %vm616_vm2, %v10325_v54  ;;  %v2892_v32 = vrot.slane %v2663_v29, 7  ;;  %v10326_v35 = vld [vmem:[#allocation2 + $0xb8] sm:$0xff]   ;;  %v1210_v15 = vadd.f32 %v10834_v43, %v10875_v24 }
 0x13c   : > { %v1723_v30 = vpop.f32.mrf.mxu1  ;;  %v2143_v33 = vadd.f32 %v2068_v11, %v1206_v13  ;;  %v9700_v44 = vpop.f32.mrf.mxu0  ;;  %9863 = vmatmul.mubr.msk.bf16.gmra.mxu0 %vm616_vm2, %v10324_v34  ;;  %v10328_v11 = vld [vmem:[#allocation2 + $0xd8] sm:$0xff]  }
 0x13d   : > { %v1954_v41 = vrot.slane %v1723_v30, 7  ;;  %9866 = vmatprep.mubr.msk.bf16.mxu0 %vm616_vm2, %v10327_v3  ;;  %v3001_v47 = vsel %vm1072_vm3, %v2891_v50, %v2892_v32  ;;  %v10331_v50 = vld [vmem:[#allocation2 + $0xe0] sm:$0xff]   ;;  %v1213_v44 = vadd.f32 %v10834_v43, %v10886_v39 }
 0x13e   : > { %v9631_v46 = vpop.f32.mrf.mxu1  ;;  %v11058_v49 = vadd.f32 %v3005_v51, %v2143_v33  ;;  %v2676_v63 = vpop.f32.mrf.mxu0 }
 0x13f   : > { %v2065_v54 = vsel %vm1072_vm3, %v1953_v62, %v1954_v41  ;;  %v2895_v6 = vrot.slane %v2676_v63, 7  ;;  %v1957_v24 = vrot.slane %v9631_v46, 7  ;;  %v10333_v63 = vld [vmem:[#allocation2 + $0xd0] sm:$0xff]  }
 0x140   : > { %v1726_v0 = vpop.f32.mrf.mxu1  ;;  %v2146_v4 = vadd.f32 %v2065_v54, %v1209_v40  ;;  %v9701_v51 = vpop.f32.mrf.mxu0 }
 0x141   : > { %v1955_v13 = vrot.slane %v1726_v0, 7  ;;  %v2998_v56 = vsel %vm1072_vm3, %v2894_v10, %v2895_v6  ;;  %v2898_v39 = vrot.slane %v9701_v51, 7 }
 0x142   : > { %v9634_v34 = vpop.f32.mrf.mxu1  ;;  %9797 = vmatmul.mubr.msk.bf16.gmra.mxu1 %vm616_vm2, %v10326_v35  ;;  %v11068_v29 = vadd.f32 %v3002_v7, %v2146_v4  ;;  %v2679_v30 = vpop.f32.mrf.mxu0 }
 0x143   : > { %v2064_v3 = vsel %vm1072_vm3, %v1954_v41, %v1955_v13  ;;  %9800 = vmatprep.mubr.msk.bf16.mxu1 %vm616_vm2, %v10329_v59  ;;  %v2896_v32 = vrot.slane %v2679_v30, 7  ;;  %v10330_v41 = vld [vmem:[#allocation2 + $0xc8] sm:$0xff]   ;;  %v1214_v34 = vadd.f32 %v10834_v43, %v10897_v55 }
 0x144   : > { %v1739_v33 = vpop.f32.mrf.mxu1  ;;  %v2147_v62 = vadd.f32 %v2064_v3, %v1210_v15  ;;  %v9704_v7 = vpop.f32.mrf.mxu0  ;;  %9867 = vmatmul.mubr.msk.bf16.gmra.mxu0 %vm616_vm2, %v10328_v11  ;;  %v10332_v3 = vld [vmem:[#allocation2 + $0xe8] sm:$0xff]  }
 0x145   : > { %v1958_v40 = vrot.slane %v1739_v33, 7  ;;  %9870 = vmatprep.mubr.msk.bf16.mxu0 %vm616_vm2, %v10331_v50  ;;  %v2997_v46 = vsel %vm1072_vm3, %v2895_v6, %v2896_v32  ;;  %v10335_v6 = vld [vmem:[#allocation2 + $0xf0] sm:$0xff]   ;;  %v1217_v7 = vadd.f32 %v10834_v43, %v10908_v5 }
 0x146   : > { %v9635_v35 = vpop.f32.mrf.mxu1  ;;  %v11078_v54 = vadd.f32 %v3001_v47, %v2147_v62  ;;  %v2692_v0 = vpop.f32.mrf.mxu0 }
 0x147   : > { %v2061_v59 = vsel %vm1072_vm3, %v1957_v24, %v1958_v40  ;;  %v2899_v13 = vrot.slane %v2692_v0, 7  ;;  %v1961_v55 = vrot.slane %v9635_v35, 7  ;;  %v10337_v0 = vld [vmem:[#allocation2 + $0xe0] sm:$0xff]  }
 0x148   : > { %v1742_v4 = vpop.f32.mrf.mxu1  ;;  %v2150_v10 = vadd.f32 %v2061_v59, %v1213_v44  ;;  %v9705_v47 = vpop.f32.mrf.mxu0 }
 0x149   : > { %v1959_v15 = vrot.slane %v1742_v4, 7  ;;  %v2994_v51 = vsel %vm1072_vm3, %v2898_v39, %v2899_v13  ;;  %v2902_v5 = vrot.slane %v9705_v47, 7 }
 0x14a   : > { %v9638_v11 = vpop.f32.mrf.mxu1  ;;  %9801 = vmatmul.mubr.msk.bf16.gmra.mxu1 %vm616_vm2, %v10330_v41  ;;  %v11088_v30 = vadd.f32 %v2998_v56, %v2150_v10  ;;  %v2695_v33 = vpop.f32.mrf.mxu0 }
 0x14b   : > { %v2060_v50 = vsel %vm1072_vm3, %v1958_v40, %v1959_v15  ;;  %9804 = vmatprep.mubr.msk.bf16.mxu1 %vm616_vm2, %v10333_v63  ;;  %v2900_v32 = vrot.slane %v2695_v33, 7  ;;  %v10334_v40 = vld [vmem:[#allocation2 + $0xd8] sm:$0xff]   ;;  %v1218_v11 = vadd.f32 %v10834_v43, %v10919_v19 }
 0x14c   : > { %v1755_v62 = vpop.f32.mrf.mxu1  ;;  %v2151_v24 = vadd.f32 %v2060_v50, %v1214_v34  ;;  %v9708_v56 = vpop.f32.mrf.mxu0  ;;  %9871 = vmatmul.mubr.msk.bf16.gmra.mxu0 %vm616_vm2, %v10332_v3  ;;  %v10336_v50 = vld [vmem:[#allocation2 + $0xf8] sm:$0xff]  }
 0x14d   : > { %v1962_v44 = vrot.slane %v1755_v62, 7  ;;  %9874 = vmatprep.mubr.msk.bf16.mxu0 %vm616_vm2, %v10335_v6  ;;  %v2993_v35 = vsel %vm1072_vm3, %v2899_v13, %v2900_v32  ;;  %v10339_v13 = vld [vmem:[#allocation2 + $0x100] sm:$0xff]  }
 0x14e   : > { %v9639_v41 = vpop.f32.mrf.mxu1  ;;  %v11098_v59 = vadd.f32 %v2997_v46, %v2151_v24  ;;  %v2708_v4 = vpop.f32.mrf.mxu0 }
 0x14f   : > { %v2057_v63 = vsel %vm1072_vm3, %v1961_v55, %v1962_v44  ;;  %v2903_v15 = vrot.slane %v2708_v4, 7  ;;  %v1965_v43 = vrot.slane %v9639_v41, 7 }
 0x150   : > { %v1758_v10 = vpop.f32.mrf.mxu1  ;;  %v2154_v39 = vadd.f32 %v2057_v63, %v1217_v7  ;;  %v9709_v46 = vpop.f32.mrf.mxu0 }
 0x151   : > { %v1963_v34 = vrot.slane %v1758_v10, 7  ;;  %v2990_v47 = vsel %vm1072_vm3, %v2902_v5, %v2903_v15 }
 0x152   : > { %v9642_v3 = vpop.f32.mrf.mxu1  ;;  %9805 = vmatmul.mubr.msk.bf16.gmra.mxu1 %vm616_vm2, %v10334_v40  ;;  %v11108_v33 = vadd.f32 %v2994_v51, %v2154_v39  ;;  %v2711_v62 = vpop.f32.mrf.mxu0  ;;  %v11118_v51 = vld [vmem:[%s11897_s2] ss:$0 sm:$0xff]  ;;  %v10338_v40 = vld [vmem:[#allocation2 + $0xe8] sm:$0xff]  }
 0x153   : > { %v2056_v6 = vsel %vm1072_vm3, %v1962_v44, %v1963_v34  ;;  %9808 = vmatprep.mubr.msk.bf16.mxu1 %vm616_vm2, %v10337_v0  ;;  %v2904_v19 = vrot.slane %v2711_v62, 7  ;;  %v1221_v44 = vadd.f32 %v11118_v51, %v10930_v38  ;;  %v10341_v0 = vld [vmem:[#allocation2 + $0xf0] sm:$0xff]   ;;  %v2906_v38 = vrot.slane %v9709_v46, 7 }
 0x154   : > { %v1771_v24 = vpop.f32.mrf.mxu1  ;;  %v2155_v55 = vadd.f32 %v2056_v6, %v1218_v11  ;;  %v9712_v7 = vpop.f32.mrf.mxu0  ;;  %9875 = vmatmul.mubr.msk.bf16.gmra.mxu0 %vm616_vm2, %v10336_v50  ;;  %v1222_v3 = vadd.f32 %v11118_v51, %v10941_v57  ;;  %v10340_v6 = vld [vmem:[#allocation2 + $0x108] sm:$0xff]  }
 0x155   : > { %v1966_v32 = vrot.slane %v1771_v24, 7  ;;  %9878 = vmatprep.mubr.msk.bf16.mxu0 %vm616_vm2, %v10339_v13  ;;  %v2989_v4 = vsel %vm1072_vm3, %v2903_v15, %v2904_v19  ;;  %v10343_v15 = vld [vmem:[#allocation2] sm:$0xff]   ;;  %v1225_v7 = vadd.f32 %v11118_v51, %v10952_v12 }
 0x156   : > { %v9643_v56 = vpop.f32.mrf.mxu1  ;;  %v11123_v63 = vadd.f32 %v2993_v35, %v2155_v55  ;;  %v2724_v10 = vpop.f32.mrf.mxu0 }
 0x157   : > { %v2053_v41 = vsel %vm1072_vm3, %v1965_v43, %v1966_v32  ;;  %v2907_v34 = vrot.slane %v2724_v10, 7  ;;  %v1969_v57 = vrot.slane %v9643_v56, 7  ;;  %v10345_v10 = vld [vmem:[#allocation2 + $0x20] sm:$0xff]  }
 0x158   : > { %v1774_v39 = vpop.f32.mrf.mxu1  ;;  %v2158_v5 = vadd.f32 %v2053_v41, %v1221_v44  ;;  %v9713_v35 = vpop.f32.mrf.mxu0 }
 0x159   : > { %v1967_v11 = vrot.slane %v1774_v39, 7  ;;  %v2986_v46 = vsel %vm1072_vm3, %v2906_v38, %v2907_v34  ;;  %v2910_v12 = vrot.slane %v9713_v35, 7 }
 0x15a   : > { %v9646_v50 = vpop.f32.mrf.mxu1  ;;  %9809 = vmatmul.mubr.msk.bf16.gmra.mxu1 %vm616_vm2, %v10338_v40  ;;  %v11133_v62 = vadd.f32 %v2990_v47, %v2158_v5  ;;  %v2727_v24 = vpop.f32.mrf.mxu0 }
 0x15b   : > { %v2052_v13 = vsel %vm1072_vm3, %v1966_v32, %v1967_v11  ;;  %9812 = vmatprep.mubr.msk.bf16.mxu1 %vm616_vm2, %v10341_v0  ;;  %v2908_v19 = vrot.slane %v2727_v24, 7  ;;  %v10342_v32 = vld [vmem:[#allocation2 + $0xf8] sm:$0xff]   ;;  %v1226_v50 = vadd.f32 %v11118_v51, %v10963_v31  ;;  %v10472_v31 = vld [vmem:[%s11896_s1 + $0x20] sm:$0xf] }
 0x15c   : > { %v1787_v55 = vpop.f32.mrf.mxu1  ;;  %v2159_v43 = vadd.f32 %v2052_v13, %v1222_v3  ;;  %v9716_v47 = vpop.f32.mrf.mxu0  ;;  %9879 = vmatmul.mubr.msk.bf16.gmra.mxu0 %vm616_vm2, %v10340_v6  ;;  %v10344_v13 = vld [vmem:[#allocation2 + $0x8] sm:$0xff]  }
 0x15d   : > { %v1970_v44 = vrot.slane %v1787_v55, 7  ;;  %9950 = vmatprep.mubr.msk.bf16.mxu0 %vm616_vm2, %v10343_v15  ;;  %v2985_v56 = vsel %vm1072_vm3, %v2907_v34, %v2908_v19  ;;  %v10347_v34 = vld [vmem:[#allocation2 + $0x10] sm:$0xff]  }
 0x15e   : > { %v9647_v40 = vpop.f32.mrf.mxu1  ;;  %v11143_v41 = vadd.f32 %v2989_v4, %v2159_v43  ;;  %v2740_v39 = vpop.f32.mrf.mxu0 }
 0x15f   : > { %v2049_v0 = vsel %vm1072_vm3, %v1969_v57, %v1970_v44  ;;  %v2911_v11 = vrot.slane %v2740_v39, 7  ;;  %v7825_v57 = vsel %vm713_vm0, %v10472_v31, 0 }
 0x160   : > { %v1790_v5 = vpop.f32.mrf.mxu1  ;;  %v2162_v38 = vadd.f32 %v2049_v0, %v1225_v7  ;;  %v9717_v4 = vpop.f32.mrf.mxu0 }
 0x161   : > { %v1971_v3 = vrot.slane %v1790_v5, 7  ;;  %v2982_v35 = vsel %vm1072_vm3, %v2910_v12, %v2911_v11 }
 0x162   : > { %v9650_v6 = vpop.f32.mrf.mxu1  ;;  %9813 = vmatmul.mubr.msk.bf16.gmra.mxu1 %vm616_vm2, %v10342_v32  ;;  %v11153_v24 = vadd.f32 %v2986_v46, %v2162_v38  ;;  %v2743_v55 = vpop.f32.mrf.mxu0  ;;  %v1973_v46 = vrot.slane %v9647_v40, 7  ;;  %v10349_v38 = vld [vmem:[#allocation2 + $0x30] sm:$0xff]  }
 0x163   : > { %v2048_v15 = vsel %vm1072_vm3, %v1970_v44, %v1971_v3  ;;  %9884 = vmatprep.mubr.msk.bf16.mxu1 %vm616_vm2, %v10345_v10  ;;  %v2912_v7 = vrot.slane %v2743_v55, 7  ;;  %v1229_v44 = vadd.f32 %v11118_v51, %v10974_v52  ;;  %v10346_v10 = vld [vmem:[#allocation2 + $0x28] sm:$0xff]   ;;  %v10473_v52 = vld [vmem:[%s11896_s1 + $0x14] sm:$0xf]  ;;  %v2914_v6 = vrot.slane %v9717_v4, 7 }
 0x164   : > { %v1803_v43 = vpop.f32.mrf.mxu1  ;;  %v2163_v19 = vadd.f32 %v2048_v15, %v1226_v50  ;;  %v9720_v32 = vpop.f32.mrf.mxu0  ;;  %9951 = vmatmul.mubr.msk.bf16.vlgmr.msra.gmra.mxu0 %vm616_vm2, %v10344_v13  ;;  %v6889_v50 = vsel %vm713_vm0, %v10473_v52, 0 }
 0x165   : > { %v1974_v47 = vrot.slane %v1803_v43, 7  ;;  %9954 = vmatprep.mubr.msk.bf16.mxu0 %vm616_vm2, %v10347_v34  ;;  %10081 = vmatpush3.bf16.msra.mxu0 %v7825_v57  ;;  %v2981_v40 = vsel %vm1072_vm3, %v2911_v11, %v2912_v7  ;;  %v1230_v34 = vadd.f32 %v11118_v51, %v10992_v17  ;;  %v10348_v11 = vld [vmem:[#allocation2 + $0x18] sm:$0xff]  }
 0x166   : > { %v9651_v0 = vpop.f32.mrf.mxu1  ;;  %v11167_v39 = vadd.f32 %v2985_v56, %v2163_v19  ;;  %v2756_v12 = vpop.f32.mrf.mxu0  ;;  %v10351_v19 = vld [vmem:[#allocation2 + $0x20] sm:$0xff]  }
 0x167   : > { %v2045_v5 = vsel %vm1072_vm3, %v1973_v46, %v1974_v47  ;;  %v2915_v13 = vrot.slane %v2756_v12, 7  ;;  %v10350_v12 = vld [vmem:[#allocation2 + $0x38] sm:$0xff]  }
 0x168   : > { %v1806_v3 = vpop.f32.mrf.mxu1  ;;  %v2166_v56 = vadd.f32 %v2045_v5, %v1229_v44  ;;  %v9721_v55 = vpop.f32.mrf.mxu0  ;;  %v1977_v44 = vrot.slane %v9651_v0, 7 }
 0x169   : > { %v1975_v15 = vrot.slane %v1806_v3, 7  ;;  %v2978_v4 = vsel %vm1072_vm3, %v2914_v6, %v2915_v13  ;;  %v2918_v6 = vrot.slane %v9721_v55, 7 }
 0x16a   : > { %v9654_v43 = vpop.f32.mrf.mxu1  ;;  %9885 = vmatmul.mubr.msk.bf16.vlgmr.msra.gmra.mxu1 %vm616_vm2, %v10346_v10  ;;  %v11181_v31 = vadd.f32 %v2982_v35, %v2166_v56  ;;  %v2759_v46 = vpop.f32.mrf.mxu0 }
 0x16b   : > { %v2044_v57 = vsel %vm1072_vm3, %v1974_v47, %v1975_v15  ;;  %10015 = vmatpush3.bf16.msra.mxu1 %v6889_v50  ;;  %9888 = vmatprep.mubr.msk.bf16.mxu1 %vm616_vm2, %v10349_v38  ;;  %v2916_v32 = vrot.slane %v2759_v46, 7  ;;  %v10353_v38 = vld [vmem:[#allocation2 + $0x40] sm:$0xff]  }
 0x16c   : > { %v1819_v7 = vpop.f32.mrf.mxu1  ;;  %v2167_v17 = vadd.f32 %v2044_v57, %v1230_v34  ;;  %v9724_v10 = vpop.f32.mrf.mxu0  ;;  %9955 = vmatmul.mubr.msk.bf16.gmra.mxu0 %vm616_vm2, %v10348_v11 }
 0x16d   : > { %v1978_v5 = vrot.slane %v1819_v7, 7  ;;  %9958 = vmatprep.mubr.msk.bf16.mxu0 %vm616_vm2, %v10351_v19  ;;  %v2977_v52 = vsel %vm1072_vm3, %v2915_v13, %v2916_v32  ;;  %v10355_v13 = vld [vmem:[#allocation2 + $0x30] sm:$0xff]  }
 0x16e   : > { %v9655_v35 = vpop.f32.mrf.mxu1  ;;  %v11189_v3 = vadd.f32 %v2981_v40, %v2167_v17  ;;  %v2772_v50 = vpop.f32.mrf.mxu0  ;;  %v10352_v40 = vld [vmem:[#allocation2 + $0x28] sm:$0xff]  }
 0x16f   : > { %v2041_v47 = vsel %vm1072_vm3, %v1977_v44, %v1978_v5  ;;  %v2919_v15 = vrot.slane %v2772_v50, 7  ;;  %v1981_v17 = vrot.slane %v9655_v35, 7 }
 0x170   : > { %v1822_v0 = vpop.f32.mrf.mxu1  ;;  %v2170_v56 = vadd.f32 %v2041_v47, %v10987_v9  ;;  %v9725_v43 = vpop.f32.mrf.mxu0 }
 0x171   : > { %v1979_v34 = vrot.slane %v1822_v0, 7  ;;  %v2974_v46 = vsel %vm1072_vm3, %v2918_v6, %v2919_v15 }
 0x172   : > { %v9658_v11 = vpop.f32.mrf.mxu1  ;;  %9889 = vmatmul.mubr.msk.bf16.gmra.mxu1 %vm616_vm2, %v10350_v12  ;;  %v11198_v57 = vadd.f32 %v2978_v4, %v2170_v56  ;;  %v2775_v9 = vpop.f32.mrf.mxu0  ;;  %v10354_v12 = vld [vmem:[#allocation2 + $0x48] sm:$0xff]   ;;  %v2922_v56 = vrot.slane %v9725_v43, 7 }
 0x173   : > { %v2040_v19 = vsel %vm1072_vm3, %v1978_v5, %v1979_v34  ;;  %9892 = vmatprep.mubr.msk.bf16.mxu1 %vm616_vm2, %v10353_v38  ;;  %v2920_v44 = vrot.slane %v2775_v9, 7  ;;  %v10357_v38 = vld [vmem:[#allocation2 + $0x50] sm:$0xff]  }
 0x174   : > { %v1835_v55 = vpop.f32.mrf.mxu1  ;;  %v2171_v7 = vadd.f32 %v2040_v19, %v10848_v53  ;;  %v9728_v10 = vpop.f32.mrf.mxu0  ;;  %9959 = vmatmul.mubr.msk.bf16.gmra.mxu0 %vm616_vm2, %v10352_v40 }
 0x175   : > { %v1982_v32 = vrot.slane %v1835_v55, 7  ;;  %9962 = vmatprep.mubr.msk.bf16.mxu0 %vm616_vm2, %v10355_v13  ;;  %v2973_v50 = vsel %vm1072_vm3, %v2919_v15, %v2920_v44  ;;  %v10359_v15 = vld [vmem:[#allocation2 + $0x40] sm:$0xff]  }
 0x176   : > { %v9659_v4 = vpop.f32.mrf.mxu1  ;;  %v11207_v47 = vadd.f32 %v2977_v52, %v2171_v7  ;;  %v2788_v53 = vpop.f32.mrf.mxu0  ;;  %v10356_v52 = vld [vmem:[#allocation2 + $0x38] sm:$0xff]  }
 0x177   : > { %v2037_v5 = vsel %vm1072_vm3, %v1981_v17, %v1982_v32  ;;  %v2923_v6 = vrot.slane %v2788_v53, 7  ;;  %v1985_v7 = vrot.slane %v9659_v4, 7 }
 0x178   : > { %v1838_v35 = vpop.f32.mrf.mxu1  ;;  %v2174_v0 = vadd.f32 %v2037_v5, %v10859_v1  ;;  %v9729_v11 = vpop.f32.mrf.mxu0 }
 0x179   : > { %v1983_v34 = vrot.slane %v1838_v35, 7  ;;  %v2970_v9 = vsel %vm1072_vm3, %v2922_v56, %v2923_v6 }
 0x17a   : > { %v9662_v40 = vpop.f32.mrf.mxu1  ;;  %9893 = vmatmul.mubr.msk.bf16.gmra.mxu1 %vm616_vm2, %v10354_v12  ;;  %v11216_v19 = vadd.f32 %v2974_v46, %v2174_v0  ;;  %v2791_v1 = vpop.f32.mrf.mxu0  ;;  %v10358_v12 = vld [vmem:[#allocation2 + $0x58] sm:$0xff]   ;;  %v2926_v0 = vrot.slane %v9729_v11, 7 }
 0x17b   : > { %v2036_v13 = vsel %vm1072_vm3, %v1982_v32, %v1983_v34  ;;  %9896 = vmatprep.mubr.msk.bf16.mxu1 %vm616_vm2, %v10357_v38  ;;  %v2924_v17 = vrot.slane %v2791_v1, 7  ;;  %v10361_v38 = vld [vmem:[#allocation2 + $0x60] sm:$0xff]  }
 0x17c   : > { %v1851_v43 = vpop.f32.mrf.mxu1  ;;  %v2175_v55 = vadd.f32 %v2036_v13, %v10870_v14  ;;  %v9732_v10 = vpop.f32.mrf.mxu0  ;;  %9963 = vmatmul.mubr.msk.bf16.gmra.mxu0 %vm616_vm2, %v10356_v52 }
 0x17d   : > { %v1986_v44 = vrot.slane %v1851_v43, 7  ;;  %9966 = vmatprep.mubr.msk.bf16.mxu0 %vm616_vm2, %v10359_v15  ;;  %v2969_v53 = vsel %vm1072_vm3, %v2923_v6, %v2924_v17  ;;  %v10363_v6 = vld [vmem:[#allocation2 + $0x50] sm:$0xff]  }
 0x17e   : > { %v9663_v46 = vpop.f32.mrf.mxu1  ;;  %v11225_v5 = vadd.f32 %v2973_v50, %v2175_v55  ;;  %v2804_v14 = vpop.f32.mrf.mxu0  ;;  %v10360_v50 = vld [vmem:[#allocation2 + $0x48] sm:$0xff]  }
 0x17f   : > { %v2033_v32 = vsel %vm1072_vm3, %v1985_v7, %v1986_v44  ;;  %v2927_v56 = vrot.slane %v2804_v14, 7  ;;  %v1989_v55 = vrot.slane %v9663_v46, 7 }
 0x180   : > { %v1854_v4 = vpop.f32.mrf.mxu1  ;;  %v2178_v35 = vadd.f32 %v2033_v32, %v10881_v28  ;;  %v9733_v40 = vpop.f32.mrf.mxu0 }
 0x181   : > { %v1987_v34 = vrot.slane %v1854_v4, 7  ;;  %v2966_v1 = vsel %vm1072_vm3, %v2926_v0, %v2927_v56 }
 0x182   : > { %v9666_v52 = vpop.f32.mrf.mxu1  ;;  %9897 = vmatmul.mubr.msk.bf16.gmra.mxu1 %vm616_vm2, %v10358_v12  ;;  %v11234_v13 = vadd.f32 %v2970_v9, %v2178_v35  ;;  %v2807_v28 = vpop.f32.mrf.mxu0  ;;  %v10362_v12 = vld [vmem:[#allocation2 + $0x68] sm:$0xff]   ;;  %v2930_v35 = vrot.slane %v9733_v40, 7 }
 0x183   : > { %v2032_v15 = vsel %vm1072_vm3, %v1986_v44, %v1987_v34  ;;  %9900 = vmatprep.mubr.msk.bf16.mxu1 %vm616_vm2, %v10361_v38  ;;  %v2928_v7 = vrot.slane %v2807_v28, 7  ;;  %v10365_v38 = vld [vmem:[#allocation2 + $0x70] sm:$0xff]  }
 0x184   : > { %v1867_v11 = vpop.f32.mrf.mxu1  ;;  %v2179_v43 = vadd.f32 %v2032_v15, %v10892_v42  ;;  %v9736_v10 = vpop.f32.mrf.mxu0  ;;  %9967 = vmatmul.mubr.msk.bf16.gmra.mxu0 %vm616_vm2, %v10360_v50 }
 0x185   : > { %v1990_v17 = vrot.slane %v1867_v11, 7  ;;  %9970 = vmatprep.mubr.msk.bf16.mxu0 %vm616_vm2, %v10363_v6  ;;  %v2965_v14 = vsel %vm1072_vm3, %v2927_v56, %v2928_v7  ;;  %v10367_v56 = vld [vmem:[#allocation2 + $0x60] sm:$0xff]  }
 0x186   : > { %v9667_v9 = vpop.f32.mrf.mxu1  ;;  %v11243_v32 = vadd.f32 %v2969_v53, %v2179_v43  ;;  %v2820_v42 = vpop.f32.mrf.mxu0  ;;  %v10364_v53 = vld [vmem:[#allocation2 + $0x58] sm:$0xff]  }
 0x187   : > { %v2029_v44 = vsel %vm1072_vm3, %v1989_v55, %v1990_v17  ;;  %v2931_v0 = vrot.slane %v2820_v42, 7  ;;  %v1993_v43 = vrot.slane %v9667_v9, 7 }
 0x188   : > { %v1870_v46 = vpop.f32.mrf.mxu1  ;;  %v2182_v4 = vadd.f32 %v2029_v44, %v10903_v58  ;;  %v9737_v52 = vpop.f32.mrf.mxu0 }
 0x189   : > { %v1991_v34 = vrot.slane %v1870_v46, 7  ;;  %v2962_v28 = vsel %vm1072_vm3, %v2930_v35, %v2931_v0 }
 0x18a   : > { %v9670_v50 = vpop.f32.mrf.mxu1  ;;  %9901 = vmatmul.mubr.msk.bf16.gmra.mxu1 %vm616_vm2, %v10362_v12  ;;  %v11252_v15 = vadd.f32 %v2966_v1, %v2182_v4  ;;  %v2823_v58 = vpop.f32.mrf.mxu0  ;;  %v10366_v12 = vld [vmem:[#allocation2 + $0x78] sm:$0xff]   ;;  %v2934_v4 = vrot.slane %v9737_v52, 7 }
 0x18b   : > { %v2028_v6 = vsel %vm1072_vm3, %v1990_v17, %v1991_v34  ;;  %9904 = vmatprep.mubr.msk.bf16.mxu1 %vm616_vm2, %v10365_v38  ;;  %v2932_v55 = vrot.slane %v2823_v58, 7  ;;  %v10369_v38 = vld [vmem:[#allocation2 + $0x80] sm:$0xff]  }
 0x18c   : > { %v1883_v40 = vpop.f32.mrf.mxu1  ;;  %v2183_v11 = vadd.f32 %v2028_v6, %v10914_v8  ;;  %v9740_v10 = vpop.f32.mrf.mxu0  ;;  %9971 = vmatmul.mubr.msk.bf16.gmra.mxu0 %vm616_vm2, %v10364_v53 }
 0x18d   : > { %v1994_v7 = vrot.slane %v1883_v40, 7  ;;  %9974 = vmatprep.mubr.msk.bf16.mxu0 %vm616_vm2, %v10367_v56  ;;  %v2961_v42 = vsel %vm1072_vm3, %v2931_v0, %v2932_v55  ;;  %v10371_v0 = vld [vmem:[#allocation2 + $0x70] sm:$0xff]  }
 0x18e   : > { %v9671_v1 = vpop.f32.mrf.mxu1  ;;  %v11261_v44 = vadd.f32 %v2965_v14, %v2183_v11  ;;  %v2836_v8 = vpop.f32.mrf.mxu0  ;;  %v10368_v14 = vld [vmem:[#allocation2 + $0x68] sm:$0xff]  }
 0x18f   : > { %v2025_v17 = vsel %vm1072_vm3, %v1993_v43, %v1994_v7  ;;  %v2935_v35 = vrot.slane %v2836_v8, 7  ;;  %v1997_v11 = vrot.slane %v9671_v1, 7 }
 0x190   : > { %v1886_v9 = vpop.f32.mrf.mxu1  ;;  %v2186_v46 = vadd.f32 %v2025_v17, %v10925_v26  ;;  %v9741_v50 = vpop.f32.mrf.mxu0 }
 0x191   : > { %v1995_v34 = vrot.slane %v1886_v9, 7  ;;  %v2958_v58 = vsel %vm1072_vm3, %v2934_v4, %v2935_v35 }
 0x192   : > { %v9674_v53 = vpop.f32.mrf.mxu1  ;;  %9905 = vmatmul.mubr.msk.bf16.gmra.mxu1 %vm616_vm2, %v10366_v12  ;;  %v11270_v6 = vadd.f32 %v2962_v28, %v2186_v46  ;;  %v2839_v26 = vpop.f32.mrf.mxu0  ;;  %v10370_v12 = vld [vmem:[#allocation2 + $0x88] sm:$0xff]   ;;  %v2938_v46 = vrot.slane %v9741_v50, 7 }
 0x193   : > { %v2024_v56 = vsel %vm1072_vm3, %v1994_v7, %v1995_v34  ;;  %9908 = vmatprep.mubr.msk.bf16.mxu1 %vm616_vm2, %v10369_v38  ;;  %v2936_v43 = vrot.slane %v2839_v26, 7  ;;  %v10373_v38 = vld [vmem:[#allocation2 + $0x90] sm:$0xff]  }
 0x194   : > { %v1899_v52 = vpop.f32.mrf.mxu1  ;;  %v2187_v40 = vadd.f32 %v2024_v56, %v10936_v45  ;;  %v9744_v10 = vpop.f32.mrf.mxu0  ;;  %9975 = vmatmul.mubr.msk.bf16.gmra.mxu0 %vm616_vm2, %v10368_v14 }
 0x195   : > { %v1998_v55 = vrot.slane %v1899_v52, 7  ;;  %9978 = vmatprep.mubr.msk.bf16.mxu0 %vm616_vm2, %v10371_v0  ;;  %v2957_v8 = vsel %vm1072_vm3, %v2935_v35, %v2936_v43  ;;  %v10375_v35 = vld [vmem:[#allocation2 + $0x80] sm:$0xff]  }
 0x196   : > { %v9675_v28 = vpop.f32.mrf.mxu1  ;;  %v11279_v17 = vadd.f32 %v2961_v42, %v2187_v40  ;;  %v2852_v45 = vpop.f32.mrf.mxu0  ;;  %v10372_v42 = vld [vmem:[#allocation2 + $0x78] sm:$0xff]  }
 0x197   : > { %v2021_v7 = vsel %vm1072_vm3, %v1997_v11, %v1998_v55  ;;  %v2939_v4 = vrot.slane %v2852_v45, 7  ;;  %v2001_v40 = vrot.slane %v9675_v28, 7 }
 0x198   : > { %v1902_v1 = vpop.f32.mrf.mxu1  ;;  %v2190_v9 = vadd.f32 %v2021_v7, %v10947_v61  ;;  %v9745_v53 = vpop.f32.mrf.mxu0 }
 0x199   : > { %v1999_v34 = vrot.slane %v1902_v1, 7  ;;  %v2954_v26 = vsel %vm1072_vm3, %v2938_v46, %v2939_v4 }
 0x19a   : > { %v9678_v14 = vpop.f32.mrf.mxu1  ;;  %9909 = vmatmul.mubr.msk.bf16.gmra.mxu1 %vm616_vm2, %v10370_v12  ;;  %v11288_v56 = vadd.f32 %v2958_v58, %v2190_v9  ;;  %v2855_v61 = vpop.f32.mrf.mxu0  ;;  %v10374_v12 = vld [vmem:[#allocation2 + $0x98] sm:$0xff]   ;;  %v2942_v9 = vrot.slane %v9745_v53, 7 }
 0x19b   : > { %v2020_v0 = vsel %vm1072_vm3, %v1998_v55, %v1999_v34  ;;  %9912 = vmatprep.mubr.msk.bf16.mxu1 %vm616_vm2, %v10373_v38  ;;  %v2940_v11 = vrot.slane %v2855_v61, 7  ;;  %v10377_v38 = vld [vmem:[#allocation2 + $0xa0] sm:$0xff]  }
 0x19c   : > { %v1915_v50 = vpop.f32.mrf.mxu1  ;;  %v2191_v52 = vadd.f32 %v2020_v0, %v10958_v16  ;;  %v9748_v10 = vpop.f32.mrf.mxu0  ;;  %9979 = vmatmul.mubr.msk.bf16.gmra.mxu0 %vm616_vm2, %v10372_v42 }
 0x19d   : > { %v2002_v43 = vrot.slane %v1915_v50, 7  ;;  %9982 = vmatprep.mubr.msk.bf16.mxu0 %vm616_vm2, %v10375_v35  ;;  %v2953_v45 = vsel %vm1072_vm3, %v2939_v4, %v2940_v11  ;;  %v10379_v4 = vld [vmem:[#allocation2 + $0x90] sm:$0xff]  }
 0x19e   : > { %v9679_v58 = vpop.f32.mrf.mxu1  ;;  %v11297_v7 = vadd.f32 %v2957_v8, %v2191_v52  ;;  %v2868_v16 = vpop.f32.mrf.mxu0  ;;  %v10376_v8 = vld [vmem:[#allocation2 + $0x88] sm:$0xff]  }
 0x19f   : > { %v2017_v55 = vsel %vm1072_vm3, %v2001_v40, %v2002_v43  ;;  %v2943_v46 = vrot.slane %v2868_v16, 7  ;;  %v2005_v40 = vrot.slane %v9679_v58, 7 }
 0x1a0   : > { %v1918_v28 = vpop.f32.mrf.mxu1  ;;  %v2194_v1 = vadd.f32 %v2017_v55, %v10969_v36  ;;  %v9749_v14 = vpop.f32.mrf.mxu0  ;;  %v10378_v55 = vld [vmem:[#allocation2 + $0xa8] sm:$0xff]  }
 0x1a1   : > { %v2003_v34 = vrot.slane %v1918_v28, 7  ;;  %v2946_v61 = vrot.slane %v9749_v14, 7  ;;  %v2950_v36 = vsel %vm1072_vm3, %v2942_v9, %v2943_v46 }
 0x1a2   : > { %v9682_v42 = vpop.f32.mrf.mxu1  ;;  %9913 = vmatmul.mubr.msk.bf16.gmra.mxu1 %vm616_vm2, %v10374_v12  ;;  %v11306_v0 = vadd.f32 %v2954_v26, %v2194_v1  ;;  %v2871_v53 = vpop.f32.mrf.mxu0 }
 0x1a3   : > { %v2016_v35 = vsel %vm1072_vm3, %v2002_v43, %v2003_v34  ;;  %9916 = vmatprep.mubr.msk.bf16.mxu1 %vm616_vm2, %v10377_v38  ;;  %v2944_v11 = vrot.slane %v2871_v53, 7  ;;  %v3010_v26 = vsel %vm1072_vm3, %v2946_v61, %v2883_v37  ;;  %v1201_v37 = vadd.f32 %v11118_v51, %v11006_v27 }
 0x1a4   : > { %v1931_v50 = vpop.f32.mrf.mxu1  ;;  %v2195_v52 = vadd.f32 %v2016_v35, %v10980_v60  ;;  %v9820_v43 = vpop.f32.mrf.mxu0  ;;  %9983 = vmatmul.mubr.msk.bf16.gmra.mxu0 %vm616_vm2, %v10376_v8  ;;  %v10381_v60 = vld [vmem:[#allocation2 + $0xb0] sm:$0xff]   ;;  %v10380_v35 = vld [vmem:[#allocation2 + $0x98] sm:$0xff]  }
 0x1a5   : > { %v2006_v10 = vrot.slane %v1931_v50, 7  ;;  %9986 = vmatprep.mubr.msk.bf16.mxu0 %vm616_vm2, %v10379_v4  ;;  %v2949_v22 = vsel %vm1072_vm3, %v2943_v46, %v2944_v11 }
 0x1a6   : > { %v9683_v12 = vpop.f32.mrf.mxu1  ;;  %v11319_v38 = vadd.f32 %v2953_v45, %v2195_v52  ;;  %v4372_v58 = vpop.f32.mrf.mxu0  ;;  %v10382_v52 = vld [vmem:[#allocation2 + $0xb8] sm:$0xff]  }
 0x1a7   : > { %v2013_v16 = vsel %vm1072_vm3, %v2005_v40, %v2006_v10  ;;  %v2009_v28 = vrot.slane %v9683_v12, 7 }
 0x1a8   : > { %v1934_v1 = vpop.f32.mrf.mxu1  ;;  %v2198_v9 = vadd.f32 %v2013_v16, %v10998_v18  ;;  %v9821_v14 = vpop.f32.mrf.mxu0  ;;  %v10383_v18 = vld [vmem:[#allocation2 + $0xa0] sm:$0xff]   ;;  %v10387_v16 = vld [vmem:[#allocation2 + $0xb0] sm:$0xff]  }
 0x1a9   : > { %v2073_v45 = vsel %vm1072_vm3, %v2009_v28, %v1946_v2  ;;  %v2007_v34 = vrot.slane %v1934_v1, 7 }
 0x1aa   : > { %v9754_v42 = vpop.f32.mrf.mxu1  ;;  %9917 = vmatmul.mubr.msk.bf16.gmra.mxu1 %vm616_vm2, %v10378_v55  ;;  %v2138_v8 = vadd.f32 %v2073_v45, %v1201_v37  ;;  %v11334_v46 = vadd.f32 %v2950_v36, %v2198_v9  ;;  %v4375_v51 = vpop.f32.mrf.mxu0  ;;  %v10385_v36 = vld [vmem:[#allocation2 + $0xc0] sm:$0xff]   ;;  %v10386_v9 = vld [vmem:[#allocation2 + $0xc8] sm:$0xff]  }
 0x1ab   : > { %v2012_v27 = vsel %vm1072_vm3, %v2006_v10, %v2007_v34  ;;  %9920 = vmatprep.mubr.msk.bf16.mxu1 %vm616_vm2, %v10381_v60 }
 0x1ac   : > { %v3075_v25 = vadd.f32 %v3010_v26, %v2138_v8  ;;  %v3564_v61 = vpop.f32.mrf.mxu1  ;;  %v2199_v2 = vadd.f32 %v2012_v27, %v11014_v20  ;;  %v9824_v53 = vpop.f32.mrf.mxu0  ;;  %9987 = vmatmul.mubr.msk.bf16.gmra.mxu0 %vm616_vm2, %v10380_v35  ;;  %v10384_v20 = vld [vmem:[#allocation2 + $0xa8] sm:$0xff]   ;;  %v10388_v27 = vld [vmem:[#allocation2 + $0xb8] sm:$0xff]  }
 0x1ad   : > { %9990 = vmatprep.mubr.msk.bf16.mxu0 %vm616_vm2, %v10383_v18  ;;  %v10390_v53 = vld [vmem:[#allocation2 + $0xd8] sm:$0xff]  }
 0x1ae   : > { %v3883_v4 = vadd.f32 %v3564_v61, %v3075_v25  ;;  %v9755_v50 = vpop.f32.mrf.mxu1  ;;  %v11341_v40 = vadd.f32 %v2949_v22, %v2199_v2  ;;  %v4388_v11 = vpop.f32.mrf.mxu0 }
 0x1b0   : > { %v3567_v10 = vpop.f32.mrf.mxu1  ;;  %v11344_v43 = vadd.f32 %v4372_v58, %v3883_v4  ;;  %v9825_v12 = vpop.f32.mrf.mxu0 }
 0x1b1   : > { %v3884_v26 = vadd.f32 %v3567_v10, %v11038_v48  ;;  %v10389_v48 = vld [vmem:[#allocation2 + $0xd0] sm:$0xff]   ;;  %v10392_v12 = vld [vmem:[#allocation2 + $0xc8] sm:$0xff]  }
 0x1b2   : > { %v9758_v55 = vpop.f32.mrf.mxu1  ;;  %9921 = vmatmul.mubr.msk.bf16.gmra.mxu1 %vm616_vm2, %v10382_v52  ;;  %v4391_v60 = vpop.f32.mrf.mxu0 }
 0x1b3   : > { %9924 = vmatprep.mubr.msk.bf16.mxu1 %vm616_vm2, %v10385_v36  ;;  %v11349_v28 = vadd.f32 %v4375_v51, %v3884_v26 }
 0x1b4   : > { %v3580_v22 = vpop.f32.mrf.mxu1  ;;  %v9828_v1 = vpop.f32.mrf.mxu0  ;;  %9991 = vmatmul.mubr.msk.bf16.gmra.mxu0 %vm616_vm2, %v10384_v20 }
 0x1b5   : > { %v3887_v37 = vadd.f32 %v3580_v22, %v11048_v23  ;;  %9994 = vmatprep.mubr.msk.bf16.mxu0 %vm616_vm2, %v10387_v16  ;;  %v10391_v23 = vld [vmem:[#allocation2 + $0xc0] sm:$0xff]   ;;  %v10394_v1 = vld [vmem:[#allocation2 + $0xe8] sm:$0xff]  }
 0x1b6   : > { %v9759_v58 = vpop.f32.mrf.mxu1  ;;  %v4404_v34 = vpop.f32.mrf.mxu0 }
 0x1b7   : > { %v11354_v45 = vadd.f32 %v4388_v11, %v3887_v37 }
 0x1b8   : > { %v3583_v14 = vpop.f32.mrf.mxu1  ;;  %v9829_v8 = vpop.f32.mrf.mxu0 }
 0x1b9   : > { %v3888_v42 = vadd.f32 %v3583_v14, %v11058_v49  ;;  %v10393_v49 = vld [vmem:[#allocation2 + $0xe0] sm:$0xff]   ;;  %v10396_v8 = vld [vmem:[#allocation2 + $0xd8] sm:$0xff]  }
 0x1ba   : > { %v9762_v35 = vpop.f32.mrf.mxu1  ;;  %9925 = vmatmul.mubr.msk.bf16.gmra.mxu1 %vm616_vm2, %v10386_v9  ;;  %v4407_v51 = vpop.f32.mrf.mxu0 }
 0x1bb   : > { %9928 = vmatprep.mubr.msk.bf16.mxu1 %vm616_vm2, %v10389_v48  ;;  %v11359_v18 = vadd.f32 %v4391_v60, %v3888_v42 }
 0x1bc   : > { %v3596_v25 = vpop.f32.mrf.mxu1  ;;  %v9832_v2 = vpop.f32.mrf.mxu0  ;;  %9995 = vmatmul.mubr.msk.bf16.gmra.mxu0 %vm616_vm2, %v10388_v27 }
 0x1bd   : > { %v3891_v61 = vadd.f32 %v3596_v25, %v11068_v29  ;;  %9998 = vmatprep.mubr.msk.bf16.mxu0 %vm616_vm2, %v10391_v23  ;;  %v10395_v29 = vld [vmem:[#allocation2 + $0xd0] sm:$0xff]   ;;  %v10398_v2 = vld [vmem:[#allocation2 + $0xf8] sm:$0xff]  }
 0x1be   : > { %v9763_v4 = vpop.f32.mrf.mxu1  ;;  %v4420_v52 = vpop.f32.mrf.mxu0 }
 0x1bf   : > { %v11364_v50 = vadd.f32 %v4404_v34, %v3891_v61 }
 0x1c0   : > { %v3599_v36 = vpop.f32.mrf.mxu1  ;;  %v9833_v10 = vpop.f32.mrf.mxu0 }
 0x1c1   : > { %v3892_v11 = vadd.f32 %v3599_v36, %v11078_v54  ;;  %v10397_v54 = vld [vmem:[#allocation2 + $0xf0] sm:$0xff]   ;;  %v10400_v10 = vld [vmem:[#allocation2 + $0xe8] sm:$0xff]  }
 0x1c2   : > { %v9766_v26 = vpop.f32.mrf.mxu1  ;;  %9929 = vmatmul.mubr.msk.bf16.gmra.mxu1 %vm616_vm2, %v10390_v53  ;;  %v4423_v20 = vpop.f32.mrf.mxu0 }
 0x1c3   : > { %9932 = vmatprep.mubr.msk.bf16.mxu1 %vm616_vm2, %v10393_v49  ;;  %v11369_v55 = vadd.f32 %v4407_v51, %v3892_v11 }
 0x1c4   : > { %v3612_v16 = vpop.f32.mrf.mxu1  ;;  %v9836_v22 = vpop.f32.mrf.mxu0  ;;  %9999 = vmatmul.mubr.msk.bf16.gmra.mxu0 %vm616_vm2, %v10392_v12 }
 0x1c5   : > { %v3895_v60 = vadd.f32 %v3612_v16, %v11088_v30  ;;  %10002 = vmatprep.mubr.msk.bf16.mxu0 %vm616_vm2, %v10395_v29  ;;  %v10399_v30 = vld [vmem:[#allocation2 + $0xe0] sm:$0xff]   ;;  %v10402_v22 = vld [vmem:[#allocation2 + $0x108] sm:$0xff]  }
 0x1c6   : > { %v9767_v37 = vpop.f32.mrf.mxu1  ;;  %v4436_v9 = vpop.f32.mrf.mxu0 }
 0x1c7   : > { %v11374_v58 = vadd.f32 %v4420_v52, %v3895_v60 }
 0x1c8   : > { %v3615_v48 = vpop.f32.mrf.mxu1  ;;  %v9837_v14 = vpop.f32.mrf.mxu0 }
 0x1c9   : > { %v3896_v34 = vadd.f32 %v3615_v48, %v11098_v59  ;;  %v10401_v59 = vld [vmem:[#allocation2 + $0x100] sm:$0xff]   ;;  %v10404_v14 = vld [vmem:[#allocation2 + $0xf8] sm:$0xff]  }
 0x1ca   : > { %v9770_v42 = vpop.f32.mrf.mxu1  ;;  %9933 = vmatmul.mubr.msk.bf16.gmra.mxu1 %vm616_vm2, %v10394_v1  ;;  %v4439_v27 = vpop.f32.mrf.mxu0 }
 0x1cb   : > { %9936 = vmatprep.mubr.msk.bf16.mxu1 %vm616_vm2, %v10397_v54  ;;  %v11379_v35 = vadd.f32 %v4423_v20, %v3896_v34 }
 0x1cc   : > { %v3628_v23 = vpop.f32.mrf.mxu1  ;;  %v9840_v25 = vpop.f32.mrf.mxu0  ;;  %10003 = vmatmul.mubr.msk.bf16.gmra.mxu0 %vm616_vm2, %v10396_v8 }
 0x1cd   : > { %v3899_v51 = vadd.f32 %v3628_v23, %v11108_v33  ;;  %10006 = vmatprep.mubr.msk.bf16.mxu0 %vm616_vm2, %v10399_v30  ;;  %v10403_v33 = vld [vmem:[#allocation2 + $0xf0] sm:$0xff]   ;;  %v10406_v25 = vld [vmem:[#allocation2 + $0x118] sm:$0xff]  }
 0x1ce   : > { %v9771_v61 = vpop.f32.mrf.mxu1  ;;  %v4452_v53 = vpop.f32.mrf.mxu0 }
 0x1cf   : > { %v11384_v4 = vadd.f32 %v4436_v9, %v3899_v51 }
 0x1d0   : > { %v3631_v49 = vpop.f32.mrf.mxu1  ;;  %v9841_v36 = vpop.f32.mrf.mxu0 }
 0x1d1   : > { %v3900_v52 = vadd.f32 %v3631_v49, %v11123_v63  ;;  %v10405_v63 = vld [vmem:[#allocation2 + $0x110] sm:$0xff]   ;;  %v10408_v36 = vld [vmem:[#allocation2 + $0x28] sm:$0xff]  }
 0x1d2   : > { %v9774_v11 = vpop.f32.mrf.mxu1  ;;  %9937 = vmatmul.mubr.msk.bf16.gmra.mxu1 %vm616_vm2, %v10398_v2  ;;  %v4455_v12 = vpop.f32.mrf.mxu0 }
 0x1d3   : > { %9940 = vmatprep.mubr.msk.bf16.mxu1 %vm616_vm2, %v10401_v59  ;;  %v11389_v26 = vadd.f32 %v4439_v27, %v3900_v52 }
 0x1d4   : > { %v3644_v29 = vpop.f32.mrf.mxu1  ;;  %v9844_v16 = vpop.f32.mrf.mxu0  ;;  %10007 = vmatmul.mubr.msk.bf16.gmra.mxu0 %vm616_vm2, %v10400_v10 }
 0x1d5   : > { %v3903_v20 = vadd.f32 %v3644_v29, %v11133_v62  ;;  %10010 = vmatprep.mubr.msk.bf16.mxu0 %vm616_vm2, %v10403_v33  ;;  %v10407_v62 = vld [vmem:[#allocation2 + $0x20] sm:$0xff]   ;;  %v10410_v16 = vld [vmem:[#allocation2 + $0x18] sm:$0xff]  }
 0x1d6   : > { %v9775_v60 = vpop.f32.mrf.mxu1  ;;  %v4468_v1 = vpop.f32.mrf.mxu0 }
 0x1d7   : > { %v11394_v37 = vadd.f32 %v4452_v53, %v3903_v20 }
 0x1d8   : > { %v3647_v54 = vpop.f32.mrf.mxu1  ;;  %v9845_v48 = vpop.f32.mrf.mxu0 }
 0x1d9   : > { %v3904_v9 = vadd.f32 %v3647_v54, %v11143_v41  ;;  %v10409_v41 = vld [vmem:[#allocation2 + $0x10] sm:$0xff]   ;;  %v10412_v48 = vld [vmem:[#allocation2 + $0x38] sm:$0xff]  }
 0x1da   : > { %v9778_v34 = vpop.f32.mrf.mxu1  ;;  %9941 = vmatmul.mubr.msk.bf16.gmra.mxu1 %vm616_vm2, %v10402_v22  ;;  %v4471_v8 = vpop.f32.mrf.mxu0 }
 0x1db   : > { %9944 = vmatprep.mubr.msk.bf16.mxu1 %vm616_vm2, %v10405_v63  ;;  %v11399_v42 = vadd.f32 %v4455_v12, %v3904_v9 }
 0x1dc   : > { %v3660_v30 = vpop.f32.mrf.mxu1  ;;  %v9848_v23 = vpop.f32.mrf.mxu0  ;;  %10011 = vmatmul.mubr.msk.bf16.gmra.mxu0 %vm616_vm2, %v10404_v14 }
 0x1dd   : > { %v3907_v27 = vadd.f32 %v3660_v30, %v11153_v24  ;;  %10082 = vmatprep.mubr.msk.bf16.mxu0 %vm616_vm2, %v10407_v62  ;;  %v10411_v24 = vld [vmem:[#allocation2 + $0x30] sm:$0xff]   ;;  %v10414_v23 = vld [vmem:[#allocation2 + $0x28] sm:$0xff]  }
 0x1de   : > { %v9779_v51 = vpop.f32.mrf.mxu1  ;;  %v4484_v2 = vpop.f32.mrf.mxu0 }
 0x1df   : > { %v11404_v61 = vadd.f32 %v4468_v1, %v3907_v27 }
 0x1e0   : > { %v3663_v59 = vpop.f32.mrf.mxu1  ;;  %v9849_v49 = vpop.f32.mrf.mxu0 }
 0x1e1   : > { %v3908_v53 = vadd.f32 %v3663_v59, %v11167_v39  ;;  %v10413_v39 = vld [vmem:[#allocation2 + $0x20] sm:$0xff]   ;;  %v10416_v49 = vld [vmem:[#allocation2 + $0x48] sm:$0xff]  }
 0x1e2   : > { %v9782_v52 = vpop.f32.mrf.mxu1  ;;  %9945 = vmatmul.mubr.msk.bf16.gmra.mxu1 %vm616_vm2, %v10406_v25  ;;  %v4487_v10 = vpop.f32.mrf.mxu0 }
 0x1e3   : > { %10016 = vmatprep.mubr.msk.bf16.mxu1 %vm616_vm2, %v10409_v41  ;;  %v11409_v11 = vadd.f32 %v4471_v8, %v3908_v53 }
 0x1e4   : > { %v3676_v33 = vpop.f32.mrf.mxu1  ;;  %v9852_v29 = vpop.f32.mrf.mxu0  ;;  %10083 = vmatmul.mubr.msk.bf16.vlgmr.msra.gmra.mxu0 %vm616_vm2, %v10408_v36 }
 0x1e5   : > { %v3911_v12 = vadd.f32 %v3676_v33, %v11181_v31  ;;  %10086 = vmatprep.mubr.msk.bf16.mxu0 %vm616_vm2, %v10411_v24  ;;  %v10415_v31 = vld [vmem:[#allocation2 + $0x40] sm:$0xff]   ;;  %v10418_v29 = vld [vmem:[#allocation2 + $0x38] sm:$0xff]  }
 0x1e6   : > { %v9783_v20 = vpop.f32.mrf.mxu1  ;;  %v4500_v22 = vpop.f32.mrf.mxu0 }
 0x1e7   : > { %v11414_v60 = vadd.f32 %v4484_v2, %v3911_v12 }
 0x1e8   : > { %v3679_v63 = vpop.f32.mrf.mxu1  ;;  %v9853_v54 = vpop.f32.mrf.mxu0 }
 0x1e9   : > { %v3912_v1 = vadd.f32 %v3679_v63, %v11189_v3  ;;  %v10417_v3 = vld [vmem:[#allocation2 + $0x30] sm:$0xff]   ;;  %v10420_v54 = vld [vmem:[#allocation2 + $0x58] sm:$0xff]  }
 0x1ea   : > { %v9786_v9 = vpop.f32.mrf.mxu1  ;;  %10017 = vmatmul.mubr.msk.bf16.vlgmr.msra.gmra.mxu1 %vm616_vm2, %v10410_v16  ;;  %v4503_v14 = vpop.f32.mrf.mxu0 }
 0x1eb   : > { %10020 = vmatprep.mubr.msk.bf16.mxu1 %vm616_vm2, %v10413_v39  ;;  %v11419_v34 = vadd.f32 %v4487_v10, %v3912_v1 }
 0x1ec   : > { %v3692_v62 = vpop.f32.mrf.mxu1  ;;  %v9856_v30 = vpop.f32.mrf.mxu0  ;;  %10087 = vmatmul.mubr.msk.bf16.gmra.mxu0 %vm616_vm2, %v10412_v48 }
 0x1ed   : > { %v3915_v8 = vadd.f32 %v3692_v62, %v11198_v57  ;;  %10090 = vmatprep.mubr.msk.bf16.mxu0 %vm616_vm2, %v10415_v31  ;;  %v10419_v57 = vld [vmem:[#allocation2 + $0x50] sm:$0xff]   ;;  %v10422_v30 = vld [vmem:[#allocation2 + $0x48] sm:$0xff]  }
 0x1ee   : > { %v9787_v27 = vpop.f32.mrf.mxu1  ;;  %v4516_v25 = vpop.f32.mrf.mxu0 }
 0x1ef   : > { %v11424_v51 = vadd.f32 %v4500_v22, %v3915_v8 }
 0x1f0   : > { %v3695_v41 = vpop.f32.mrf.mxu1  ;;  %v9857_v59 = vpop.f32.mrf.mxu0 }
 0x1f1   : > { %v3916_v2 = vadd.f32 %v3695_v41, %v11207_v47  ;;  %v10421_v47 = vld [vmem:[#allocation2 + $0x40] sm:$0xff]   ;;  %v10424_v59 = vld [vmem:[#allocation2 + $0x68] sm:$0xff]  }
 0x1f2   : > { %v9790_v53 = vpop.f32.mrf.mxu1  ;;  %10021 = vmatmul.mubr.msk.bf16.gmra.mxu1 %vm616_vm2, %v10414_v23  ;;  %v4519_v36 = vpop.f32.mrf.mxu0 }
 0x1f3   : > { %10024 = vmatprep.mubr.msk.bf16.mxu1 %vm616_vm2, %v10417_v3  ;;  %v11429_v52 = vadd.f32 %v4503_v14, %v3916_v2 }
 0x1f4   : > { %v3708_v24 = vpop.f32.mrf.mxu1  ;;  %v9860_v33 = vpop.f32.mrf.mxu0  ;;  %10091 = vmatmul.mubr.msk.bf16.gmra.mxu0 %vm616_vm2, %v10416_v49 }
 0x1f5   : > { %v3919_v10 = vadd.f32 %v3708_v24, %v11216_v19  ;;  %10094 = vmatprep.mubr.msk.bf16.mxu0 %vm616_vm2, %v10419_v57  ;;  %v10423_v19 = vld [vmem:[#allocation2 + $0x60] sm:$0xff]   ;;  %v10426_v33 = vld [vmem:[#allocation2 + $0x58] sm:$0xff]  }
 0x1f6   : > { %v9791_v12 = vpop.f32.mrf.mxu1  ;;  %v4532_v16 = vpop.f32.mrf.mxu0 }
 0x1f7   : > { %v11434_v20 = vadd.f32 %v4516_v25, %v3919_v10 }
 0x1f8   : > { %v3711_v39 = vpop.f32.mrf.mxu1  ;;  %v9861_v63 = vpop.f32.mrf.mxu0 }
 0x1f9   : > { %v3920_v22 = vadd.f32 %v3711_v39, %v11225_v5  ;;  %v10425_v5 = vld [vmem:[#allocation2 + $0x50] sm:$0xff]   ;;  %v10428_v63 = vld [vmem:[#allocation2 + $0x78] sm:$0xff]  }
 0x1fa   : > { %v9794_v1 = vpop.f32.mrf.mxu1  ;;  %10025 = vmatmul.mubr.msk.bf16.gmra.mxu1 %vm616_vm2, %v10418_v29  ;;  %v4535_v48 = vpop.f32.mrf.mxu0 }
 0x1fb   : > { %10028 = vmatprep.mubr.msk.bf16.mxu1 %vm616_vm2, %v10421_v47  ;;  %v11439_v9 = vadd.f32 %v4519_v36, %v3920_v22 }
 0x1fc   : > { %v3724_v31 = vpop.f32.mrf.mxu1  ;;  %v9864_v62 = vpop.f32.mrf.mxu0  ;;  %10095 = vmatmul.mubr.msk.bf16.gmra.mxu0 %vm616_vm2, %v10420_v54 }
 0x1fd   : > { %v3923_v14 = vadd.f32 %v3724_v31, %v11234_v13  ;;  %10098 = vmatprep.mubr.msk.bf16.mxu0 %vm616_vm2, %v10423_v19  ;;  %v10427_v13 = vld [vmem:[#allocation2 + $0x70] sm:$0xff]   ;;  %v10430_v62 = vld [vmem:[#allocation2 + $0x68] sm:$0xff]  }
 0x1fe   : > { %v9795_v8 = vpop.f32.mrf.mxu1  ;;  %v4548_v23 = vpop.f32.mrf.mxu0 }
 0x1ff   : > { %v11444_v27 = vadd.f32 %v4532_v16, %v3923_v14 }
 0x200   : > { %v3727_v3 = vpop.f32.mrf.mxu1  ;;  %v9865_v41 = vpop.f32.mrf.mxu0 }
 0x201   : > { %v3924_v25 = vadd.f32 %v3727_v3, %v11243_v32  ;;  %v10429_v32 = vld [vmem:[#allocation2 + $0x60] sm:$0xff]   ;;  %v10432_v41 = vld [vmem:[#allocation2 + $0x88] sm:$0xff]  }
 0x202   : > { %v9798_v2 = vpop.f32.mrf.mxu1  ;;  %10029 = vmatmul.mubr.msk.bf16.gmra.mxu1 %vm616_vm2, %v10422_v30  ;;  %v4551_v49 = vpop.f32.mrf.mxu0 }
 0x203   : > { %10032 = vmatprep.mubr.msk.bf16.mxu1 %vm616_vm2, %v10425_v5  ;;  %v11449_v53 = vadd.f32 %v4535_v48, %v3924_v25 }
 0x204   : > { %v3740_v57 = vpop.f32.mrf.mxu1  ;;  %v9868_v24 = vpop.f32.mrf.mxu0  ;;  %10099 = vmatmul.mubr.msk.bf16.gmra.mxu0 %vm616_vm2, %v10424_v59 }
 0x205   : > { %v3927_v36 = vadd.f32 %v3740_v57, %v11252_v15  ;;  %10102 = vmatprep.mubr.msk.bf16.mxu0 %vm616_vm2, %v10427_v13  ;;  %v10431_v15 = vld [vmem:[#allocation2 + $0x80] sm:$0xff]   ;;  %v10434_v24 = vld [vmem:[#allocation2 + $0x78] sm:$0xff]  }
 0x206   : > { %v9799_v10 = vpop.f32.mrf.mxu1  ;;  %v4564_v29 = vpop.f32.mrf.mxu0 }
 0x207   : > { %v11454_v12 = vadd.f32 %v4548_v23, %v3927_v36 }
 0x208   : > { %v3743_v47 = vpop.f32.mrf.mxu1  ;;  %v9869_v39 = vpop.f32.mrf.mxu0 }
 0x209   : > { %v3928_v16 = vadd.f32 %v3743_v47, %v11261_v44  ;;  %v10433_v44 = vld [vmem:[#allocation2 + $0x70] sm:$0xff]   ;;  %v10436_v39 = vld [vmem:[#allocation2 + $0x98] sm:$0xff]  }
 0x20a   : > { %v9802_v22 = vpop.f32.mrf.mxu1  ;;  %10033 = vmatmul.mubr.msk.bf16.gmra.mxu1 %vm616_vm2, %v10426_v33  ;;  %v4567_v54 = vpop.f32.mrf.mxu0 }
 0x20b   : > { %10036 = vmatprep.mubr.msk.bf16.mxu1 %vm616_vm2, %v10429_v32  ;;  %v11459_v1 = vadd.f32 %v4551_v49, %v3928_v16 }
 0x20c   : > { %v3756_v19 = vpop.f32.mrf.mxu1  ;;  %v9872_v31 = vpop.f32.mrf.mxu0  ;;  %10103 = vmatmul.mubr.msk.bf16.gmra.mxu0 %vm616_vm2, %v10428_v63 }
 0x20d   : > { %v3931_v48 = vadd.f32 %v3756_v19, %v11270_v6  ;;  %10106 = vmatprep.mubr.msk.bf16.mxu0 %vm616_vm2, %v10431_v15  ;;  %v10435_v6 = vld [vmem:[#allocation2 + $0x90] sm:$0xff]   ;;  %v10438_v31 = vld [vmem:[#allocation2 + $0x88] sm:$0xff]  }
 0x20e   : > { %v9803_v14 = vpop.f32.mrf.mxu1  ;;  %v4580_v30 = vpop.f32.mrf.mxu0 }
 0x20f   : > { %v11464_v8 = vadd.f32 %v4564_v29, %v3931_v48 }
 0x210   : > { %v3759_v5 = vpop.f32.mrf.mxu1  ;;  %v9873_v3 = vpop.f32.mrf.mxu0 }
 0x211   : > { %v3932_v23 = vadd.f32 %v3759_v5, %v11279_v17  ;;  %v10437_v17 = vld [vmem:[#allocation2 + $0x80] sm:$0xff]   ;;  %v10440_v3 = vld [vmem:[#allocation2 + $0xa8] sm:$0xff]  }
 0x212   : > { %v9806_v25 = vpop.f32.mrf.mxu1  ;;  %10037 = vmatmul.mubr.msk.bf16.gmra.mxu1 %vm616_vm2, %v10430_v62  ;;  %v4583_v59 = vpop.f32.mrf.mxu0 }
 0x213   : > { %10040 = vmatprep.mubr.msk.bf16.mxu1 %vm616_vm2, %v10433_v44  ;;  %v11469_v2 = vadd.f32 %v4567_v54, %v3932_v23 }
 0x214   : > { %v3772_v13 = vpop.f32.mrf.mxu1  ;;  %v9876_v57 = vpop.f32.mrf.mxu0  ;;  %10107 = vmatmul.mubr.msk.bf16.gmra.mxu0 %vm616_vm2, %v10432_v41 }
 0x215   : > { %v3935_v49 = vadd.f32 %v3772_v13, %v11288_v56  ;;  %10110 = vmatprep.mubr.msk.bf16.mxu0 %vm616_vm2, %v10435_v6  ;;  %v10439_v56 = vld [vmem:[#allocation2 + $0xa0] sm:$0xff]   ;;  %v10442_v57 = vld [vmem:[#allocation2 + $0x98] sm:$0xff]  }
 0x216   : > { %v9807_v36 = vpop.f32.mrf.mxu1  ;;  %v4596_v33 = vpop.f32.mrf.mxu0 }
 0x217   : > { %v11474_v10 = vadd.f32 %v4580_v30, %v3935_v49 }
 0x218   : > { %v3775_v32 = vpop.f32.mrf.mxu1  ;;  %v9877_v47 = vpop.f32.mrf.mxu0 }
 0x219   : > { %v3936_v29 = vadd.f32 %v3775_v32, %v11297_v7  ;;  %v10441_v7 = vld [vmem:[#allocation2 + $0x90] sm:$0xff]   ;;  %v10444_v47 = vld [vmem:[#allocation2 + $0xb8] sm:$0xff]  }
 0x21a   : > { %v9810_v16 = vpop.f32.mrf.mxu1  ;;  %10041 = vmatmul.mubr.msk.bf16.gmra.mxu1 %vm616_vm2, %v10434_v24  ;;  %v4599_v63 = vpop.f32.mrf.mxu0 }
 0x21b   : > { %10044 = vmatprep.mubr.msk.bf16.mxu1 %vm616_vm2, %v10437_v17  ;;  %v11479_v22 = vadd.f32 %v4583_v59, %v3936_v29 }
 0x21c   : > { %v3788_v15 = vpop.f32.mrf.mxu1  ;;  %v9880_v19 = vpop.f32.mrf.mxu0  ;;  %10111 = vmatmul.mubr.msk.bf16.gmra.mxu0 %vm616_vm2, %v10436_v39  ;;  %v10447_v39 = vld [vmem:[#allocation2 + $0xc0] sm:$0xff]  }
 0x21d   : > { %v3939_v54 = vadd.f32 %v3788_v15, %v11306_v0  ;;  %10114 = vmatprep.mubr.msk.bf16.mxu0 %vm616_vm2, %v10439_v56  ;;  %v10443_v0 = vld [vmem:[#allocation2 + $0xb0] sm:$0xff]  }
 0x21e   : > { %v9811_v48 = vpop.f32.mrf.mxu1  ;;  %v4612_v62 = vpop.f32.mrf.mxu0 }
 0x21f   : > { %v11484_v14 = vadd.f32 %v4596_v33, %v3939_v54 }
 0x220   : > { %v3791_v44 = vpop.f32.mrf.mxu1  ;;  %v9881_v5 = vpop.f32.mrf.mxu0 }
 0x221   : > { %v3940_v30 = vadd.f32 %v3791_v44, %v11319_v38  ;;  %v10445_v38 = vld [vmem:[#allocation2 + $0xa0] sm:$0xff]   ;;  %v10449_v44 = vld [vmem:[#allocation2 + $0xb0] sm:$0xff]  }
 0x222   : > { %v9814_v23 = vpop.f32.mrf.mxu1  ;;  %10045 = vmatmul.mubr.msk.bf16.gmra.mxu1 %vm616_vm2, %v10438_v31  ;;  %v4615_v41 = vpop.f32.mrf.mxu0  ;;  %v10446_v31 = vld [vmem:[#allocation2 + $0xa8] sm:$0xff]  }
 0x223   : > { %10048 = vmatprep.mubr.msk.bf16.mxu1 %vm616_vm2, %v10441_v7  ;;  %v11489_v25 = vadd.f32 %v4599_v63, %v3940_v30 }
 0x224   : > { %v3804_v6 = vpop.f32.mrf.mxu1  ;;  %v9952_v13 = vpop.f32.mrf.mxu0  ;;  %10115 = vmatmul.mubr.msk.bf16.gmra.mxu0 %vm616_vm2, %v10440_v3 }
 0x225   : > { %v3943_v59 = vadd.f32 %v3804_v6, %v11334_v46  ;;  %10118 = vmatprep.mubr.msk.bf16.mxu0 %vm616_vm2, %v10443_v0  ;;  %v6245_v46 = vrot.slane %v9952_v13, 1 }
 0x226   : > { %v9815_v49 = vpop.f32.mrf.mxu1  ;;  %v5988_v24 = vpop.f32.mrf.mxu0 }
 0x227   : > { %v11494_v36 = vadd.f32 %v4612_v62, %v3943_v59  ;;  %v6243_v16 = vrot.slane %v5988_v24, 1  ;;  %v10451_v49 = vld [vmem:[#allocation2 + $0xd0] sm:$0xff]  }
 0x228   : > { %v3807_v17 = vpop.f32.mrf.mxu1  ;;  %v9953_v32 = vpop.f32.mrf.mxu0 }
 0x229   : > { %v3944_v33 = vadd.f32 %v3807_v17, %v11341_v40 }
 0x22a   : > { %v9886_v29 = vpop.f32.mrf.mxu1  ;;  %10049 = vmatmul.mubr.msk.bf16.gmra.mxu1 %vm616_vm2, %v10442_v57  ;;  %v5991_v63 = vpop.f32.mrf.mxu0 }
 0x22b   : > { %10052 = vmatprep.mubr.msk.bf16.mxu1 %vm616_vm2, %v10445_v38  ;;  %v11499_v56 = vadd.f32 %v4615_v41, %v3944_v33  ;;  %v6244_v54 = vrot.slane %v5991_v63, 1  ;;  %v10448_v41 = vld [vmem:[#allocation2 + $0xc8] sm:$0xff]  }
 0x22c   : > { %v5180_v15 = vpop.f32.mrf.mxu1  ;;  %v9956_v40 = vpop.f32.mrf.mxu0  ;;  %10119 = vmatmul.mubr.msk.bf16.gmra.mxu0 %vm616_vm2, %v10444_v47 }
 0x22d   : > { %v5499_v19 = vadd.f32 %v5180_v15, %v11344_v43  ;;  %v6370_v7 = vsel %vm6307_vm4, %v6243_v16, %v6244_v54  ;;  %v6369_v62 = vsel %vm6307_vm4, %v6244_v54, %v6245_v46  ;;  %10122 = vmatprep.mubr.msk.bf16.mxu0 %vm616_vm2, %v10447_v39  ;;  %v6249_v6 = vrot.slane %v9956_v40, 1  ;;  %v10453_v46 = vld [vmem:[#allocation2 + $0xc0] sm:$0xff]  }
 0x22e   : > { %v9887_v48 = vpop.f32.mrf.mxu1  ;;  %v6004_v5 = vpop.f32.mrf.mxu0 }
 0x22f   : > { %v11509_v30 = vadd.f32 %v6370_v7, %v5499_v19  ;;  %v6247_v59 = vrot.slane %v6004_v5, 1  ;;  %v10452_v19 = vld [vmem:[#allocation2 + $0xd8] sm:$0xff]   ;;  %v10455_v7 = vld [vmem:[#allocation2 + $0xe0] sm:$0xff]  }
 0x230   : > { %v5183_v23 = vpop.f32.mrf.mxu1  ;;  %v9957_v3 = vpop.f32.mrf.mxu0 }
 0x231   : > { %v5500_v43 = vadd.f32 %v5183_v23, %v11349_v28  ;;  %v10450_v28 = vld [vmem:[#allocation2 + $0xb8] sm:$0xff]  }
 0x232   : > { %v9890_v0 = vpop.f32.mrf.mxu1  ;;  %10053 = vmatmul.mubr.msk.bf16.gmra.mxu1 %vm616_vm2, %v10446_v31  ;;  %v6007_v57 = vpop.f32.mrf.mxu0 }
 0x233   : > { %v11513_v13 = vadd.f32 %v6369_v62, %v5500_v43  ;;  %10056 = vmatprep.mubr.msk.bf16.mxu1 %vm616_vm2, %v10449_v44  ;;  %v6248_v24 = vrot.slane %v6007_v57, 1 }
 0x234   : > { %v5196_v38 = vpop.f32.mrf.mxu1  ;;  %v9960_v33 = vpop.f32.mrf.mxu0  ;;  %10123 = vmatmul.mubr.msk.bf16.gmra.mxu0 %vm616_vm2, %v10448_v41 }
 0x235   : > { %v5503_v17 = vadd.f32 %v5196_v38, %v11354_v45  ;;  %v6366_v29 = vsel %vm6307_vm4, %v6247_v59, %v6248_v24  ;;  %v6365_v47 = vsel %vm6307_vm4, %v6248_v24, %v6249_v6  ;;  %10126 = vmatprep.mubr.msk.bf16.mxu0 %vm616_vm2, %v10451_v49  ;;  %v6253_v40 = vrot.slane %v9960_v33, 1  ;;  %v10457_v6 = vld [vmem:[#allocation2 + $0xd0] sm:$0xff]  }
 0x236   : > { %v9891_v32 = vpop.f32.mrf.mxu1  ;;  %v6020_v39 = vpop.f32.mrf.mxu0 }
 0x237   : > { %v11523_v16 = vadd.f32 %v6366_v29, %v5503_v17  ;;  %v6251_v48 = vrot.slane %v6020_v39, 1  ;;  %v10456_v17 = vld [vmem:[#allocation2 + $0xe8] sm:$0xff]   ;;  %v10459_v29 = vld [vmem:[#allocation2 + $0xf0] sm:$0xff]  }
 0x238   : > { %v5199_v63 = vpop.f32.mrf.mxu1  ;;  %v9961_v15 = vpop.f32.mrf.mxu0 }
 0x239   : > { %v5504_v45 = vadd.f32 %v5199_v63, %v11359_v18  ;;  %v10454_v18 = vld [vmem:[#allocation2 + $0xc8] sm:$0xff]  }
 0x23a   : > { %v9894_v54 = vpop.f32.mrf.mxu1  ;;  %10057 = vmatmul.mubr.msk.bf16.gmra.mxu1 %vm616_vm2, %v10450_v28  ;;  %v6023_v62 = vpop.f32.mrf.mxu0 }
 0x23b   : > { %v11527_v31 = vadd.f32 %v6365_v47, %v5504_v45  ;;  %10060 = vmatprep.mubr.msk.bf16.mxu1 %vm616_vm2, %v10453_v46  ;;  %v6252_v5 = vrot.slane %v6023_v62, 1 }
 0x23c   : > { %v5212_v44 = vpop.f32.mrf.mxu1  ;;  %v9964_v43 = vpop.f32.mrf.mxu0  ;;  %10127 = vmatmul.mubr.msk.bf16.gmra.mxu0 %vm616_vm2, %v10452_v19 }
 0x23d   : > { %v5507_v23 = vadd.f32 %v5212_v44, %v11364_v50  ;;  %v6362_v0 = vsel %vm6307_vm4, %v6251_v48, %v6252_v5  ;;  %v6361_v41 = vsel %vm6307_vm4, %v6252_v5, %v6253_v40  ;;  %10130 = vmatprep.mubr.msk.bf16.mxu0 %vm616_vm2, %v10455_v7  ;;  %v6257_v33 = vrot.slane %v9964_v43, 1  ;;  %v10461_v40 = vld [vmem:[#allocation2 + $0xe0] sm:$0xff]  }
 0x23e   : > { %v9895_v3 = vpop.f32.mrf.mxu1  ;;  %v6036_v49 = vpop.f32.mrf.mxu0 }
 0x23f   : > { %v11537_v59 = vadd.f32 %v6362_v0, %v5507_v23  ;;  %v6255_v32 = vrot.slane %v6036_v49, 1  ;;  %v10460_v23 = vld [vmem:[#allocation2 + $0xf8] sm:$0xff]   ;;  %v10463_v0 = vld [vmem:[#allocation2 + $0x100] sm:$0xff]  }
 0x240   : > { %v5215_v57 = vpop.f32.mrf.mxu1  ;;  %v9965_v38 = vpop.f32.mrf.mxu0 }
 0x241   : > { %v5508_v50 = vadd.f32 %v5215_v57, %v11369_v55  ;;  %v10458_v55 = vld [vmem:[#allocation2 + $0xd8] sm:$0xff]  }
 0x242   : > { %v9898_v24 = vpop.f32.mrf.mxu1  ;;  %10061 = vmatmul.mubr.msk.bf16.gmra.mxu1 %vm616_vm2, %v10454_v18  ;;  %v6039_v47 = vpop.f32.mrf.mxu0 }
 0x243   : > { %v11541_v28 = vadd.f32 %v6361_v41, %v5508_v50  ;;  %10064 = vmatprep.mubr.msk.bf16.mxu1 %vm616_vm2, %v10457_v6  ;;  %v6256_v39 = vrot.slane %v6039_v47, 1 }
 0x244   : > { %v5228_v46 = vpop.f32.mrf.mxu1  ;;  %v9968_v45 = vpop.f32.mrf.mxu0  ;;  %10131 = vmatmul.mubr.msk.bf16.gmra.mxu0 %vm616_vm2, %v10456_v17 }
 0x245   : > { %v5511_v63 = vadd.f32 %v5228_v46, %v11374_v58  ;;  %v6358_v54 = vsel %vm6307_vm4, %v6255_v32, %v6256_v39  ;;  %v6357_v19 = vsel %vm6307_vm4, %v6256_v39, %v6257_v33  ;;  %10134 = vmatprep.mubr.msk.bf16.mxu0 %vm616_vm2, %v10459_v29  ;;  %v6261_v43 = vrot.slane %v9968_v45, 1  ;;  %v10465_v33 = vld [vmem:[#allocation2 + $0xf0] sm:$0xff]  }
 0x246   : > { %v9899_v15 = vpop.f32.mrf.mxu1  ;;  %v6052_v7 = vpop.f32.mrf.mxu0 }
 0x247   : > { %v11551_v48 = vadd.f32 %v6358_v54, %v5511_v63  ;;  %v6259_v3 = vrot.slane %v6052_v7, 1  ;;  %v10464_v63 = vld [vmem:[#allocation2 + $0x108] sm:$0xff]   ;;  %v10467_v54 = vld [vmem:[#allocation2 + $0x110] sm:$0xff]  }
 0x248   : > { %v5231_v62 = vpop.f32.mrf.mxu1  ;;  %v9969_v44 = vpop.f32.mrf.mxu0 }
 0x249   : > { %v5512_v58 = vadd.f32 %v5231_v62, %v11379_v35  ;;  %v10462_v35 = vld [vmem:[#allocation2 + $0xe8] sm:$0xff]  }
 0x24a   : > { %v9902_v5 = vpop.f32.mrf.mxu1  ;;  %10065 = vmatmul.mubr.msk.bf16.gmra.mxu1 %vm616_vm2, %v10458_v55  ;;  %v6055_v41 = vpop.f32.mrf.mxu0 }
 0x24b   : > { %v11555_v18 = vadd.f32 %v6357_v19, %v5512_v58  ;;  %10068 = vmatprep.mubr.msk.bf16.mxu1 %vm616_vm2, %v10461_v40  ;;  %v6260_v49 = vrot.slane %v6055_v41, 1 }
 0x24c   : > { %v5244_v6 = vpop.f32.mrf.mxu1  ;;  %v9972_v50 = vpop.f32.mrf.mxu0  ;;  %10135 = vmatmul.mubr.msk.bf16.gmra.mxu0 %vm616_vm2, %v10460_v23 }
 0x24d   : > { %v5515_v57 = vadd.f32 %v5244_v6, %v11384_v4  ;;  %v6354_v24 = vsel %vm6307_vm4, %v6259_v3, %v6260_v49  ;;  %v6353_v17 = vsel %vm6307_vm4, %v6260_v49, %v6261_v43  ;;  %10138 = vmatprep.mubr.msk.bf16.mxu0 %vm616_vm2, %v10463_v0  ;;  %v6265_v45 = vrot.slane %v9972_v50, 1  ;;  %v10469_v43 = vld [vmem:[#allocation2 + $0x100] sm:$0xff]  }
 0x24e   : > { %v9903_v38 = vpop.f32.mrf.mxu1  ;;  %v6068_v29 = vpop.f32.mrf.mxu0 }
 0x24f   : > { %v11565_v32 = vadd.f32 %v6354_v24, %v5515_v57  ;;  %v6263_v15 = vrot.slane %v6068_v29, 1  ;;  %v10468_v57 = vld [vmem:[#allocation2 + $0x118] sm:$0xff]  }
 0x250   : > { %v5247_v47 = vpop.f32.mrf.mxu1  ;;  %v9973_v46 = vpop.f32.mrf.mxu0 }
 0x251   : > { %v5516_v4 = vadd.f32 %v5247_v47, %v11389_v26  ;;  %v10466_v26 = vld [vmem:[#allocation2 + $0xf8] sm:$0xff]  }
 0x252   : > { %v9906_v39 = vpop.f32.mrf.mxu1  ;;  %10069 = vmatmul.mubr.msk.bf16.gmra.mxu1 %vm616_vm2, %v10462_v35  ;;  %v6071_v19 = vpop.f32.mrf.mxu0 }
 0x253   : > { %v11569_v55 = vadd.f32 %v6353_v17, %v5516_v4  ;;  %10072 = vmatprep.mubr.msk.bf16.mxu1 %vm616_vm2, %v10465_v33  ;;  %v6264_v7 = vrot.slane %v6071_v19, 1 }
 0x254   : > { %v5260_v40 = vpop.f32.mrf.mxu1  ;;  %v9976_v58 = vpop.f32.mrf.mxu0  ;;  %10139 = vmatmul.mubr.msk.bf16.gmra.mxu0 %vm616_vm2, %v10464_v63 }
 0x255   : > { %v5519_v62 = vadd.f32 %v5260_v40, %v11394_v37  ;;  %v6350_v5 = vsel %vm6307_vm4, %v6263_v15, %v6264_v7  ;;  %v6349_v23 = vsel %vm6307_vm4, %v6264_v7, %v6265_v45  ;;  %10142 = vmatprep.mubr.msk.bf16.mxu0 %vm616_vm2, %v10467_v54  ;;  %v6269_v50 = vrot.slane %v9976_v58, 1 }
 0x256   : > { %v9907_v44 = vpop.f32.mrf.mxu1  ;;  %v6084_v0 = vpop.f32.mrf.mxu0 }
 0x257   : > { %v11579_v3 = vadd.f32 %v6350_v5, %v5519_v62  ;;  %v6267_v38 = vrot.slane %v6084_v0, 1 }
 0x258   : > { %v5263_v41 = vpop.f32.mrf.mxu1  ;;  %v9977_v6 = vpop.f32.mrf.mxu0 }
 0x259   : > { %v5520_v37 = vadd.f32 %v5263_v41, %v11399_v42  ;;  %v10470_v42 = vld [vmem:[#allocation2 + $0x108] sm:$0xff]  }
 0x25a   : > { %v9910_v49 = vpop.f32.mrf.mxu1  ;;  %10073 = vmatmul.mubr.msk.bf16.gmra.mxu1 %vm616_vm2, %v10466_v26  ;;  %v6087_v24 = vpop.f32.mrf.mxu0 }
 0x25b   : > { %v11583_v35 = vadd.f32 %v6349_v23, %v5520_v37  ;;  %10076 = vmatprep.mubr.msk.bf16.mxu1 %vm616_vm2, %v10469_v43  ;;  %v6268_v33 = vrot.slane %v6087_v24, 1 }
 0x25c   : > { %v5276_v17 = vpop.f32.mrf.mxu1  ;;  %v9980_v47 = vpop.f32.mrf.mxu0  ;;  %10143 = vmatmul.mubr.msk.bf16.gmra.mxu0 %vm616_vm2, %v10468_v57 }
 0x25d   : > { %v5523_v29 = vadd.f32 %v5276_v17, %v11404_v61  ;;  %v6346_v46 = vsel %vm6307_vm4, %v6267_v38, %v6268_v33  ;;  %v6345_v39 = vsel %vm6307_vm4, %v6268_v33, %v6269_v50  ;;  %v6273_v61 = vrot.slane %v9980_v47, 1 }
 0x25e   : > { %v9911_v4 = vpop.f32.mrf.mxu1  ;;  %v6100_v45 = vpop.f32.mrf.mxu0 }
 0x25f   : > { %v11592_v63 = vadd.f32 %v6346_v46, %v5523_v29  ;;  %v6271_v7 = vrot.slane %v6100_v45, 1 }
 0x260   : > { %v5279_v15 = vpop.f32.mrf.mxu1  ;;  %v9981_v19 = vpop.f32.mrf.mxu0 }
 0x261   : > { %v5524_v54 = vadd.f32 %v5279_v15, %v11409_v11 }
 0x262   : > { %v9914_v40 = vpop.f32.mrf.mxu1  ;;  %10077 = vmatmul.mubr.msk.bf16.gmra.mxu1 %vm616_vm2, %v10470_v42  ;;  %v6103_v58 = vpop.f32.mrf.mxu0 }
 0x263   : > { %v11596_v62 = vadd.f32 %v6345_v39, %v5524_v54  ;;  %v6272_v26 = vrot.slane %v6103_v58, 1 }
 0x264   : > { %v5292_v44 = vpop.f32.mrf.mxu1  ;;  %v9984_v23 = vpop.f32.mrf.mxu0 }
 0x265   : > { %v5527_v5 = vadd.f32 %v5292_v44, %v11414_v60  ;;  %v6342_v0 = vsel %vm6307_vm4, %v6271_v7, %v6272_v26  ;;  %v6341_v11 = vsel %vm6307_vm4, %v6272_v26, %v6273_v61  ;;  %v6277_v38 = vrot.slane %v9984_v23, 1 }
 0x266   : > { %v9915_v43 = vpop.f32.mrf.mxu1  ;;  %v6116_v37 = vpop.f32.mrf.mxu0 }
 0x267   : > { %v11603_v41 = vadd.f32 %v6342_v0, %v5527_v5  ;;  %v6275_v24 = vrot.slane %v6116_v37, 1 }
 0x268   : > { %v5295_v6 = vpop.f32.mrf.mxu1  ;;  %v9985_v57 = vpop.f32.mrf.mxu0 }
 0x269   : > { %v5528_v49 = vadd.f32 %v5295_v6, %v11419_v34 }
 0x26a   : > { %v9918_v50 = vpop.f32.mrf.mxu1  ;;  %v6119_v60 = vpop.f32.mrf.mxu0 }
 0x26b   : > { %v11606_v17 = vadd.f32 %v6341_v11, %v5528_v49  ;;  %v6276_v29 = vrot.slane %v6119_v60, 1 }
 0x26c   : > { %v5308_v33 = vpop.f32.mrf.mxu1  ;;  %v9988_v4 = vpop.f32.mrf.mxu0 }
 0x26d   : > { %v5531_v47 = vadd.f32 %v5308_v33, %v11424_v51  ;;  %v6338_v46 = vsel %vm6307_vm4, %v6275_v24, %v6276_v29  ;;  %v6337_v39 = vsel %vm6307_vm4, %v6276_v29, %v6277_v38  ;;  %v6281_v61 = vrot.slane %v9988_v4, 1 }
 0x26e   : > { %v9919_v42 = vpop.f32.mrf.mxu1  ;;  %v6132_v45 = vpop.f32.mrf.mxu0 }
 0x26f   : > { %v11613_v34 = vadd.f32 %v6338_v46, %v5531_v47  ;;  %v6279_v7 = vrot.slane %v6132_v45, 1 }
 0x270   : > { %v5311_v15 = vpop.f32.mrf.mxu1  ;;  %v9989_v19 = vpop.f32.mrf.mxu0 }
 0x271   : > { %v5532_v54 = vadd.f32 %v5311_v15, %v11429_v52 }
 0x272   : > { %v9922_v40 = vpop.f32.mrf.mxu1  ;;  %v6135_v51 = vpop.f32.mrf.mxu0 }
 0x273   : > { %v11616_v58 = vadd.f32 %v6337_v39, %v5532_v54  ;;  %v6280_v26 = vrot.slane %v6135_v51, 1 }
 0x274   : > { %v5324_v44 = vpop.f32.mrf.mxu1  ;;  %v9992_v23 = vpop.f32.mrf.mxu0 }
 0x275   : > { %v5535_v5 = vadd.f32 %v5324_v44, %v11434_v20  ;;  %v6334_v0 = vsel %vm6307_vm4, %v6279_v7, %v6280_v26  ;;  %v6333_v11 = vsel %vm6307_vm4, %v6280_v26, %v6281_v61  ;;  %v6285_v38 = vrot.slane %v9992_v23, 1 }
 0x276   : > { %v9923_v43 = vpop.f32.mrf.mxu1  ;;  %v6148_v37 = vpop.f32.mrf.mxu0 }
 0x277   : > { %v11623_v52 = vadd.f32 %v6334_v0, %v5535_v5  ;;  %v6283_v24 = vrot.slane %v6148_v37, 1 }
 0x278   : > { %v5327_v6 = vpop.f32.mrf.mxu1  ;;  %v9993_v57 = vpop.f32.mrf.mxu0 }
 0x279   : > { %v5536_v49 = vadd.f32 %v5327_v6, %v11439_v9 }
 0x27a   : > { %v9926_v50 = vpop.f32.mrf.mxu1  ;;  %v6151_v20 = vpop.f32.mrf.mxu0 }
 0x27b   : > { %v11626_v60 = vadd.f32 %v6333_v11, %v5536_v49  ;;  %v6284_v29 = vrot.slane %v6151_v20, 1 }
 0x27c   : > { %v5340_v33 = vpop.f32.mrf.mxu1  ;;  %v9996_v4 = vpop.f32.mrf.mxu0 }
 0x27d   : > { %v5539_v47 = vadd.f32 %v5340_v33, %v11444_v27  ;;  %v6330_v46 = vsel %vm6307_vm4, %v6283_v24, %v6284_v29  ;;  %v6329_v39 = vsel %vm6307_vm4, %v6284_v29, %v6285_v38  ;;  %v6289_v61 = vrot.slane %v9996_v4, 1 }
 0x27e   : > { %v9927_v42 = vpop.f32.mrf.mxu1  ;;  %v6164_v45 = vpop.f32.mrf.mxu0 }
 0x27f   : > { %v11633_v9 = vadd.f32 %v6330_v46, %v5539_v47  ;;  %v6287_v7 = vrot.slane %v6164_v45, 1 }
 0x280   : > { %v5343_v15 = vpop.f32.mrf.mxu1  ;;  %v9997_v19 = vpop.f32.mrf.mxu0 }
 0x281   : > { %v5540_v54 = vadd.f32 %v5343_v15, %v11449_v53 }
 0x282   : > { %v9930_v40 = vpop.f32.mrf.mxu1  ;;  %v6167_v27 = vpop.f32.mrf.mxu0 }
 0x283   : > { %v11636_v51 = vadd.f32 %v6329_v39, %v5540_v54  ;;  %v6288_v26 = vrot.slane %v6167_v27, 1 }
 0x284   : > { %v5356_v44 = vpop.f32.mrf.mxu1  ;;  %v10000_v23 = vpop.f32.mrf.mxu0 }
 0x285   : > { %v5543_v5 = vadd.f32 %v5356_v44, %v11454_v12  ;;  %v6326_v0 = vsel %vm6307_vm4, %v6287_v7, %v6288_v26  ;;  %v6325_v11 = vsel %vm6307_vm4, %v6288_v26, %v6289_v61  ;;  %v6293_v38 = vrot.slane %v10000_v23, 1 }
 0x286   : > { %v9931_v43 = vpop.f32.mrf.mxu1  ;;  %v6180_v37 = vpop.f32.mrf.mxu0 }
 0x287   : > { %v11643_v53 = vadd.f32 %v6326_v0, %v5543_v5  ;;  %v6291_v24 = vrot.slane %v6180_v37, 1 }
 0x288   : > { %v5359_v6 = vpop.f32.mrf.mxu1  ;;  %v10001_v57 = vpop.f32.mrf.mxu0 }
 0x289   : > { %v5544_v49 = vadd.f32 %v5359_v6, %v11459_v1 }
 0x28a   : > { %v9934_v50 = vpop.f32.mrf.mxu1  ;;  %v6183_v12 = vpop.f32.mrf.mxu0 }
 0x28b   : > { %v11646_v20 = vadd.f32 %v6325_v11, %v5544_v49  ;;  %v6292_v29 = vrot.slane %v6183_v12, 1 }
 0x28c   : > { %v5372_v33 = vpop.f32.mrf.mxu1  ;;  %v10004_v4 = vpop.f32.mrf.mxu0 }
 0x28d   : > { %v5547_v47 = vadd.f32 %v5372_v33, %v11464_v8  ;;  %v6322_v46 = vsel %vm6307_vm4, %v6291_v24, %v6292_v29  ;;  %v6321_v39 = vsel %vm6307_vm4, %v6292_v29, %v6293_v38  ;;  %v6297_v61 = vrot.slane %v10004_v4, 1 }
 0x28e   : > { %v9935_v42 = vpop.f32.mrf.mxu1  ;;  %v6196_v45 = vpop.f32.mrf.mxu0 }
 0x28f   : > { %v11653_v1 = vadd.f32 %v6322_v46, %v5547_v47  ;;  %v6295_v7 = vrot.slane %v6196_v45, 1 }
 0x290   : > { %v5375_v15 = vpop.f32.mrf.mxu1  ;;  %v10005_v19 = vpop.f32.mrf.mxu0 }
 0x291   : > { %v5548_v54 = vadd.f32 %v5375_v15, %v11469_v2 }
 0x292   : > { %v9938_v40 = vpop.f32.mrf.mxu1  ;;  %v6199_v8 = vpop.f32.mrf.mxu0 }
 0x293   : > { %v11656_v27 = vadd.f32 %v6321_v39, %v5548_v54  ;;  %v6296_v26 = vrot.slane %v6199_v8, 1 }
 0x294   : > { %v5388_v44 = vpop.f32.mrf.mxu1  ;;  %v10008_v23 = vpop.f32.mrf.mxu0 }
 0x295   : > { %v5551_v5 = vadd.f32 %v5388_v44, %v11474_v10  ;;  %v6318_v0 = vsel %vm6307_vm4, %v6295_v7, %v6296_v26  ;;  %v6317_v11 = vsel %vm6307_vm4, %v6296_v26, %v6297_v61  ;;  %v6301_v38 = vrot.slane %v10008_v23, 1 }
 0x296   : > { %v9939_v43 = vpop.f32.mrf.mxu1  ;;  %v6212_v37 = vpop.f32.mrf.mxu0 }
 0x297   : > { %v11663_v2 = vadd.f32 %v6318_v0, %v5551_v5  ;;  %v6299_v24 = vrot.slane %v6212_v37, 1 }
 0x298   : > { %v5391_v6 = vpop.f32.mrf.mxu1  ;;  %v10009_v57 = vpop.f32.mrf.mxu0 }
 0x299   : > { %v5552_v49 = vadd.f32 %v5391_v6, %v11479_v22 }
 0x29a   : > { %v9942_v50 = vpop.f32.mrf.mxu1  ;;  %v6215_v10 = vpop.f32.mrf.mxu0 }
 0x29b   : > { %v11666_v12 = vadd.f32 %v6317_v11, %v5552_v49  ;;  %v6300_v29 = vrot.slane %v6215_v10, 1 }
 0x29c   : > { %v5404_v33 = vpop.f32.mrf.mxu1  ;;  %v10012_v4 = vpop.f32.mrf.mxu0 }
 0x29d   : > { %v5555_v47 = vadd.f32 %v5404_v33, %v11484_v14  ;;  %v6314_v46 = vsel %vm6307_vm4, %v6299_v24, %v6300_v29  ;;  %v6313_v39 = vsel %vm6307_vm4, %v6300_v29, %v6301_v38  ;;  %v6305_v61 = vrot.slane %v10012_v4, 1 }
 0x29e   : > { %v9943_v42 = vpop.f32.mrf.mxu1  ;;  %v6228_v45 = vpop.f32.mrf.mxu0 }
 0x29f   : > { %v11673_v22 = vadd.f32 %v6314_v46, %v5555_v47  ;;  %v6303_v7 = vrot.slane %v6228_v45, 1 }
 0x2a0   : > { %v5407_v15 = vpop.f32.mrf.mxu1  ;;  %v10013_v19 = vpop.f32.mrf.mxu0 }
 0x2a1   : > { %v5556_v54 = vadd.f32 %v5407_v15, %v11489_v25 }
 0x2a2   : > { %v9946_v40 = vpop.f32.mrf.mxu1  ;;  %v6231_v14 = vpop.f32.mrf.mxu0 }
 0x2a3   : > { %v11676_v8 = vadd.f32 %v6313_v39, %v5556_v54  ;;  %v6304_v26 = vrot.slane %v6231_v14, 1 }
 0x2a4   : > { %v5420_v44 = vpop.f32.mrf.mxu1  ;;  %v10084_v43 = vpop.f32.mrf.mxu0 }
 0x2a5   : > { %v5559_v5 = vadd.f32 %v5420_v44, %v11494_v36  ;;  %v6310_v0 = vsel %vm6307_vm4, %v6303_v7, %v6304_v26  ;;  %v6309_v11 = vsel %vm6307_vm4, %v6304_v26, %v6305_v61  ;;  %v8118_v29 = vrot.slane %v10084_v43, 1 }
 0x2a6   : > { %v9947_v23 = vpop.f32.mrf.mxu1  ;;  %v7861_v6 = vpop.f32.mrf.mxu0 }
 0x2a7   : > { %v11683_v25 = vadd.f32 %v6310_v0, %v5559_v5  ;;  %v8116_v47 = vrot.slane %v7861_v6, 1 }
 0x2a8   : > { %v5423_v37 = vpop.f32.mrf.mxu1  ;;  %v10085_v50 = vpop.f32.mrf.mxu0 }
 0x2a9   : > { %v5560_v49 = vadd.f32 %v5423_v37, %v11499_v56 }
 0x2aa   : > { %v10018_v57 = vpop.f32.mrf.mxu1  ;;  %v7864_v36 = vpop.f32.mrf.mxu0 }
 0x2ab   : > { %v11686_v38 = vadd.f32 %v6309_v11, %v5560_v49  ;;  %v7182_v46 = vrot.slane %v10018_v57, 1  ;;  %v8117_v45 = vrot.slane %v7864_v36, 1 }
 0x2ac   : > { %v6925_v24 = vpop.f32.mrf.mxu1  ;;  %v10088_v33 = vpop.f32.mrf.mxu0 }
 0x2ad   : > { %v7180_v39 = vrot.slane %v6925_v24, 1  ;;  %v8241_v26 = vsel %vm6307_vm4, %v8117_v45, %v8118_v29  ;;  %v8242_v5 = vsel %vm6307_vm4, %v8116_v47, %v8117_v45 }
 0x2ae   : > { %v10019_v10 = vpop.f32.mrf.mxu1  ;;  %v7877_v42 = vpop.f32.mrf.mxu0 }
 0x2af   : > { %v8120_v6 = vrot.slane %v7877_v42, 1 }
 0x2b0   : > { %v6928_v4 = vpop.f32.mrf.mxu1  ;;  %v10089_v19 = vpop.f32.mrf.mxu0 }
 0x2b1   : > { %v7181_v15 = vrot.slane %v6928_v4, 1 }
 0x2b2   : > { %v10022_v54 = vpop.f32.mrf.mxu1  ;;  %v7880_v44 = vpop.f32.mrf.mxu0 }
 0x2b3   : > { %v7305_v56 = vsel %vm6307_vm4, %v7181_v15, %v7182_v46  ;;  %v7306_v40 = vsel %vm6307_vm4, %v7180_v39, %v7181_v15  ;;  %v7186_v50 = vrot.slane %v10022_v54, 1  ;;  %v8121_v36 = vrot.slane %v7880_v44, 1 }
 0x2b4   : > { %v7372_v61 = vadd.f32 %v7306_v40, %v11509_v30  ;;  %v7373_v7 = vadd.f32 %v7305_v56, %v11513_v13  ;;  %v6941_v14 = vpop.f32.mrf.mxu1  ;;  %v10092_v11 = vpop.f32.mrf.mxu0  ;;  %v8122_v30 = vrot.slane %v10088_v33, 1 }
 0x2b5   : > { %v7184_v24 = vrot.slane %v6941_v14, 1  ;;  %v8238_v54 = vsel %vm6307_vm4, %v8120_v6, %v8121_v36 }
 0x2b6   : > { %v8308_v23 = vadd.f32 %v8242_v5, %v7372_v61  ;;  %v8309_v43 = vadd.f32 %v8241_v26, %v7373_v7  ;;  %v10023_v0 = vpop.f32.mrf.mxu1  ;;  %v7893_v57 = vpop.f32.mrf.mxu0  ;;  %v8237_v15 = vsel %vm6307_vm4, %v8121_v36, %v8122_v30  ;;  %v8126_v7 = vrot.slane %v10092_v11, 1 }
 0x2b8   : > { %v8468_v13 = vmax.f32 %v8308_v23, 0.0  ;;  %v8469_v37 = vmax.f32 %v8309_v43, 0.0  ;;  %v6944_v49 = vpop.f32.mrf.mxu1  ;;  %v10093_v47 = vpop.f32.mrf.mxu0 }
 0x2b9   : > { %v7185_v10 = vrot.slane %v6944_v49, 1 }
 0x2ba   : > { %8500 = vst [vmem:[%s11702_s12] sm:$0xff] %v8468_v13  ;;  %8501 = vst [vmem:[%s11702_s12 + $0x8] sm:$0xff] %v8469_v37  ;;  %v10026_v29 = vpop.f32.mrf.mxu1  ;;  %v7896_v45 = vpop.f32.mrf.mxu0 }
 0x2bb   : > { %v7301_v4 = vsel %vm6307_vm4, %v7185_v10, %v7186_v50  ;;  %v7302_v46 = vsel %vm6307_vm4, %v7184_v24, %v7185_v10  ;;  %v7190_v5 = vrot.slane %v10026_v29, 1  ;;  %v8125_v43 = vrot.slane %v7896_v45, 1 }
 0x2bc   : > { %v7376_v33 = vadd.f32 %v7302_v46, %v11523_v16  ;;  %v7377_v42 = vadd.f32 %v7301_v4, %v11527_v31  ;;  %v6957_v39 = vpop.f32.mrf.mxu1  ;;  %v10096_v61 = vpop.f32.mrf.mxu0  ;;  %v8124_v16 = vrot.slane %v7893_v57, 1 }
 0x2bd   : > { %v7188_v23 = vrot.slane %v6957_v39, 1  ;;  %v8233_v24 = vsel %vm6307_vm4, %v8125_v43, %v8126_v7  ;;  %v8130_v46 = vrot.slane %v10096_v61, 1 }
 0x2be   : > { %v8312_v19 = vadd.f32 %v8238_v54, %v7376_v33  ;;  %v8313_v56 = vadd.f32 %v8237_v15, %v7377_v42  ;;  %v10027_v40 = vpop.f32.mrf.mxu1  ;;  %v7909_v31 = vpop.f32.mrf.mxu0  ;;  %v8234_v36 = vsel %vm6307_vm4, %v8124_v16, %v8125_v43 }
 0x2c0   : > { %v8470_v14 = vmax.f32 %v8312_v19, 0.0  ;;  %v8471_v44 = vmax.f32 %v8313_v56, 0.0  ;;  %v6960_v26 = vpop.f32.mrf.mxu1  ;;  %v10097_v13 = vpop.f32.mrf.mxu0 }
 0x2c1   : > { %v7189_v0 = vrot.slane %v6960_v26, 1 }
 0x2c2   : > { %8502 = vst [vmem:[%s11702_s12 + $0x10] sm:$0xff] %v8470_v14  ;;  %8503 = vst [vmem:[%s11702_s12 + $0x18] sm:$0xff] %v8471_v44  ;;  %v10030_v30 = vpop.f32.mrf.mxu1  ;;  %v7912_v50 = vpop.f32.mrf.mxu0 }
 0x2c3   : > { %v7297_v37 = vsel %vm6307_vm4, %v7189_v0, %v7190_v5  ;;  %v7298_v6 = vsel %vm6307_vm4, %v7188_v23, %v7189_v0  ;;  %v7194_v45 = vrot.slane %v10030_v30, 1  ;;  %v8129_v54 = vrot.slane %v7912_v50, 1 }
 0x2c4   : > { %v7380_v11 = vadd.f32 %v7298_v6, %v11537_v59  ;;  %v7381_v49 = vadd.f32 %v7297_v37, %v11541_v28  ;;  %v6973_v57 = vpop.f32.mrf.mxu1  ;;  %v10100_v4 = vpop.f32.mrf.mxu0  ;;  %v8128_v59 = vrot.slane %v7909_v31, 1 }
 0x2c5   : > { %v7192_v15 = vrot.slane %v6973_v57, 1  ;;  %v8229_v31 = vsel %vm6307_vm4, %v8129_v54, %v8130_v46  ;;  %v8134_v13 = vrot.slane %v10100_v4, 1 }
 0x2c6   : > { %v8316_v10 = vadd.f32 %v8234_v36, %v7380_v11  ;;  %v8317_v29 = vadd.f32 %v8233_v24, %v7381_v49  ;;  %v10031_v47 = vpop.f32.mrf.mxu1  ;;  %v7925_v28 = vpop.f32.mrf.mxu0  ;;  %v8230_v5 = vsel %vm6307_vm4, %v8128_v59, %v8129_v54 }
 0x2c8   : > { %v8472_v33 = vmax.f32 %v8316_v10, 0.0  ;;  %v8473_v42 = vmax.f32 %v8317_v29, 0.0  ;;  %v6976_v39 = vpop.f32.mrf.mxu1  ;;  %v10101_v40 = vpop.f32.mrf.mxu0 }
 0x2c9   : > { %v7193_v19 = vrot.slane %v6976_v39, 1 }
 0x2ca   : > { %8504 = vst [vmem:[%s11702_s12 + $0x20] sm:$0xff] %v8472_v33  ;;  %8505 = vst [vmem:[%s11702_s12 + $0x28] sm:$0xff] %v8473_v42  ;;  %v10034_v56 = vpop.f32.mrf.mxu1  ;;  %v7928_v26 = vpop.f32.mrf.mxu0 }
 0x2cb   : > { %v7293_v7 = vsel %vm6307_vm4, %v7193_v19, %v7194_v45  ;;  %v7294_v14 = vsel %vm6307_vm4, %v7192_v15, %v7193_v19  ;;  %v7198_v49 = vrot.slane %v10034_v56, 1  ;;  %v8133_v50 = vrot.slane %v7928_v26, 1 }
 0x2cc   : > { %v7384_v61 = vadd.f32 %v7294_v14, %v11551_v48  ;;  %v7385_v44 = vadd.f32 %v7293_v7, %v11555_v18  ;;  %v6989_v16 = vpop.f32.mrf.mxu1  ;;  %v10104_v30 = vpop.f32.mrf.mxu0  ;;  %v8132_v48 = vrot.slane %v7925_v28, 1 }
 0x2cd   : > { %v7196_v57 = vrot.slane %v6989_v16, 1  ;;  %v8225_v59 = vsel %vm6307_vm4, %v8133_v50, %v8134_v13  ;;  %v8138_v19 = vrot.slane %v10104_v30, 1 }
 0x2ce   : > { %v8320_v23 = vadd.f32 %v8230_v5, %v7384_v61  ;;  %v8321_v43 = vadd.f32 %v8229_v31, %v7385_v44  ;;  %v10035_v0 = vpop.f32.mrf.mxu1  ;;  %v7941_v18 = vpop.f32.mrf.mxu0  ;;  %v8226_v39 = vsel %vm6307_vm4, %v8132_v48, %v8133_v50 }
 0x2d0   : > { %v8474_v37 = vmax.f32 %v8320_v23, 0.0  ;;  %v8475_v6 = vmax.f32 %v8321_v43, 0.0  ;;  %v6992_v11 = vpop.f32.mrf.mxu1  ;;  %v10105_v10 = vpop.f32.mrf.mxu0 }
 0x2d1   : > { %v7197_v24 = vrot.slane %v6992_v11, 1 }
 0x2d2   : > { %8506 = vst [vmem:[%s11702_s12 + $0x30] sm:$0xff] %v8474_v37  ;;  %8507 = vst [vmem:[%s11702_s12 + $0x38] sm:$0xff] %v8475_v6  ;;  %v10038_v36 = vpop.f32.mrf.mxu1  ;;  %v7944_v42 = vpop.f32.mrf.mxu0 }
 0x2d3   : > { %v7289_v29 = vsel %vm6307_vm4, %v7197_v24, %v7198_v49  ;;  %v7290_v47 = vsel %vm6307_vm4, %v7196_v57, %v7197_v24  ;;  %v7202_v14 = vrot.slane %v10038_v36, 1  ;;  %v8137_v44 = vrot.slane %v7944_v42, 1 }
 0x2d4   : > { %v7388_v4 = vadd.f32 %v7290_v47, %v11565_v32  ;;  %v7389_v46 = vadd.f32 %v7289_v29, %v11569_v55  ;;  %v7005_v33 = vpop.f32.mrf.mxu1  ;;  %v10108_v54 = vpop.f32.mrf.mxu0  ;;  %v8136_v32 = vrot.slane %v7941_v18, 1 }
 0x2d5   : > { %v7200_v61 = vrot.slane %v7005_v33, 1  ;;  %v8221_v37 = vsel %vm6307_vm4, %v8137_v44, %v8138_v19  ;;  %v8142_v57 = vrot.slane %v10108_v54, 1 }
 0x2d6   : > { %v8324_v28 = vadd.f32 %v8226_v39, %v7388_v4  ;;  %v8325_v45 = vadd.f32 %v8225_v59, %v7389_v46  ;;  %v10039_v15 = vpop.f32.mrf.mxu1  ;;  %v7957_v55 = vpop.f32.mrf.mxu0  ;;  %v8222_v6 = vsel %vm6307_vm4, %v8136_v32, %v8137_v44 }
 0x2d8   : > { %v8476_v56 = vmax.f32 %v8324_v28, 0.0  ;;  %v8477_v40 = vmax.f32 %v8325_v45, 0.0  ;;  %v7008_v7 = vpop.f32.mrf.mxu1  ;;  %v10109_v31 = vpop.f32.mrf.mxu0 }
 0x2d9   : > { %v7201_v16 = vrot.slane %v7008_v7, 1 }
 0x2da   : > { %8508 = vst [vmem:[%s11702_s12 + $0x40] sm:$0xff] %v8476_v56  ;;  %8509 = vst [vmem:[%s11702_s12 + $0x48] sm:$0xff] %v8477_v40  ;;  %v10042_v26 = vpop.f32.mrf.mxu1  ;;  %v7960_v13 = vpop.f32.mrf.mxu0 }
 0x2db   : > { %v7285_v5 = vsel %vm6307_vm4, %v7201_v16, %v7202_v14  ;;  %v7286_v23 = vsel %vm6307_vm4, %v7200_v61, %v7201_v16  ;;  %v7206_v10 = vrot.slane %v10042_v26, 1  ;;  %v8141_v47 = vrot.slane %v7960_v13, 1 }
 0x2dc   : > { %v7392_v43 = vadd.f32 %v7286_v23, %v11579_v3  ;;  %v7393_v0 = vadd.f32 %v7285_v5, %v11583_v35  ;;  %v7021_v30 = vpop.f32.mrf.mxu1  ;;  %v10112_v49 = vpop.f32.mrf.mxu0  ;;  %v8140_v3 = vrot.slane %v7957_v55, 1 }
 0x2dd   : > { %v7204_v29 = vrot.slane %v7021_v30, 1  ;;  %v8217_v54 = vsel %vm6307_vm4, %v8141_v47, %v8142_v57  ;;  %v8146_v55 = vrot.slane %v10112_v49, 1 }
 0x2de   : > { %v8328_v48 = vadd.f32 %v8222_v6, %v7392_v43  ;;  %v8329_v11 = vadd.f32 %v8221_v37, %v7393_v0  ;;  %v10043_v18 = vpop.f32.mrf.mxu1  ;;  %v7973_v35 = vpop.f32.mrf.mxu0  ;;  %v8218_v19 = vsel %vm6307_vm4, %v8140_v3, %v8141_v47 }
 0x2e0   : > { %v8478_v50 = vmax.f32 %v8328_v48, 0.0  ;;  %v8479_v24 = vmax.f32 %v8329_v11, 0.0  ;;  %v7024_v36 = vpop.f32.mrf.mxu1  ;;  %v10113_v33 = vpop.f32.mrf.mxu0 }
 0x2e1   : > { %v7205_v4 = vrot.slane %v7024_v36, 1 }
 0x2e2   : > { %8510 = vst [vmem:[%s11702_s12 + $0x50] sm:$0xff] %v8478_v50  ;;  %8511 = vst [vmem:[%s11702_s12 + $0x58] sm:$0xff] %v8479_v24  ;;  %v10046_v46 = vpop.f32.mrf.mxu1  ;;  %v7976_v15 = vpop.f32.mrf.mxu0 }
 0x2e3   : > { %v7281_v42 = vsel %vm6307_vm4, %v7205_v4, %v7206_v10  ;;  %v7282_v59 = vsel %vm6307_vm4, %v7204_v29, %v7205_v4  ;;  %v7210_v16 = vrot.slane %v10046_v46, 1  ;;  %v8145_v31 = vrot.slane %v7976_v15, 1 }
 0x2e4   : > { %v7396_v39 = vadd.f32 %v7282_v59, %v11592_v63  ;;  %v7397_v28 = vadd.f32 %v7281_v42, %v11596_v62  ;;  %v7037_v45 = vpop.f32.mrf.mxu1  ;;  %v10116_v7 = vpop.f32.mrf.mxu0  ;;  %v8144_v63 = vrot.slane %v7973_v35, 1 }
 0x2e5   : > { %v7208_v26 = vrot.slane %v7037_v45, 1  ;;  %v8213_v11 = vsel %vm6307_vm4, %v8145_v31, %v8146_v55  ;;  %v8150_v3 = vrot.slane %v10116_v7, 1 }
 0x2e6   : > { %v8332_v56 = vadd.f32 %v8218_v19, %v7396_v39  ;;  %v8333_v40 = vadd.f32 %v8217_v54, %v7397_v28  ;;  %v10047_v32 = vpop.f32.mrf.mxu1  ;;  %v7989_v62 = vpop.f32.mrf.mxu0  ;;  %v8214_v18 = vsel %vm6307_vm4, %v8144_v63, %v8145_v31 }
 0x2e8   : > { %v8480_v14 = vmax.f32 %v8332_v56, 0.0  ;;  %v8481_v61 = vmax.f32 %v8333_v40, 0.0  ;;  %v7040_v44 = vpop.f32.mrf.mxu1  ;;  %v10117_v43 = vpop.f32.mrf.mxu0 }
 0x2e9   : > { %v7209_v5 = vrot.slane %v7040_v44, 1 }
 0x2ea   : > { %8512 = vst [vmem:[%s11702_s12 + $0x60] sm:$0xff] %v8480_v14  ;;  %8513 = vst [vmem:[%s11702_s12 + $0x68] sm:$0xff] %v8481_v61  ;;  %v10050_v23 = vpop.f32.mrf.mxu1  ;;  %v7992_v48 = vpop.f32.mrf.mxu0 }
 0x2eb   : > { %v7277_v0 = vsel %vm6307_vm4, %v7209_v5, %v7210_v16  ;;  %v7278_v30 = vsel %vm6307_vm4, %v7208_v26, %v7209_v5  ;;  %v7214_v29 = vrot.slane %v10050_v23, 1  ;;  %v8149_v4 = vrot.slane %v7992_v48, 1 }
 0x2ec   : > { %v7400_v13 = vadd.f32 %v7278_v30, %v11603_v41  ;;  %v7401_v37 = vadd.f32 %v7277_v0, %v11606_v17  ;;  %v7053_v6 = vpop.f32.mrf.mxu1  ;;  %v10120_v24 = vpop.f32.mrf.mxu0  ;;  %v8148_v41 = vrot.slane %v7989_v62, 1 }
 0x2ed   : > { %v7212_v47 = vrot.slane %v7053_v6, 1  ;;  %v8209_v19 = vsel %vm6307_vm4, %v8149_v4, %v8150_v3  ;;  %v8154_v14 = vrot.slane %v10120_v24, 1 }
 0x2ee   : > { %v8336_v49 = vadd.f32 %v8214_v18, %v7400_v13  ;;  %v8337_v57 = vadd.f32 %v8213_v11, %v7401_v37  ;;  %v10051_v50 = vpop.f32.mrf.mxu1  ;;  %v8005_v17 = vpop.f32.mrf.mxu0  ;;  %v8210_v56 = vsel %vm6307_vm4, %v8148_v41, %v8149_v4 }
 0x2f0   : > { %v8482_v36 = vmax.f32 %v8336_v49, 0.0  ;;  %v8483_v35 = vmax.f32 %v8337_v57, 0.0  ;;  %v7056_v10 = vpop.f32.mrf.mxu1  ;;  %v10121_v42 = vpop.f32.mrf.mxu0 }
 0x2f1   : > { %v7213_v46 = vrot.slane %v7056_v10, 1 }
 0x2f2   : > { %8514 = vst [vmem:[%s11702_s12 + $0x70] sm:$0xff] %v8482_v36  ;;  %8515 = vst [vmem:[%s11702_s12 + $0x78] sm:$0xff] %v8483_v35  ;;  %v10054_v33 = vpop.f32.mrf.mxu1  ;;  %v8008_v54 = vpop.f32.mrf.mxu0 }
 0x2f3   : > { %v7273_v59 = vsel %vm6307_vm4, %v7213_v46, %v7214_v29  ;;  %v7274_v39 = vsel %vm6307_vm4, %v7212_v47, %v7213_v46  ;;  %v7218_v62 = vrot.slane %v10054_v33, 1  ;;  %v8153_v26 = vrot.slane %v8008_v54, 1 }
 0x2f4   : > { %v7404_v28 = vadd.f32 %v7274_v39, %v11613_v34  ;;  %v7405_v45 = vadd.f32 %v7273_v59, %v11616_v58  ;;  %v7069_v15 = vpop.f32.mrf.mxu1  ;;  %v10124_v55 = vpop.f32.mrf.mxu0  ;;  %v8152_v34 = vrot.slane %v8005_v17, 1 }
 0x2f5   : > { %v7216_v16 = vrot.slane %v7069_v15, 1  ;;  %v8205_v48 = vsel %vm6307_vm4, %v8153_v26, %v8154_v14  ;;  %v8158_v24 = vrot.slane %v10124_v55, 1 }
 0x2f6   : > { %v8340_v40 = vadd.f32 %v8210_v56, %v7404_v28  ;;  %v8341_v32 = vadd.f32 %v8209_v19, %v7405_v45  ;;  %v10055_v7 = vpop.f32.mrf.mxu1  ;;  %v8021_v58 = vpop.f32.mrf.mxu0  ;;  %v8206_v11 = vsel %vm6307_vm4, %v8152_v34, %v8153_v26 }
 0x2f8   : > { %v8484_v61 = vmax.f32 %v8340_v40, 0.0  ;;  %v8485_v63 = vmax.f32 %v8341_v32, 0.0  ;;  %v7072_v44 = vpop.f32.mrf.mxu1  ;;  %v10125_v23 = vpop.f32.mrf.mxu0 }
 0x2f9   : > { %v7217_v31 = vrot.slane %v7072_v44, 1 }
 0x2fa   : > { %8516 = vst [vmem:[%s11702_s12 + $0x80] sm:$0xff] %v8484_v61  ;;  %8517 = vst [vmem:[%s11702_s12 + $0x88] sm:$0xff] %v8485_v63  ;;  %v10058_v5 = vpop.f32.mrf.mxu1  ;;  %v8024_v6 = vpop.f32.mrf.mxu0 }
 0x2fb   : > { %v7269_v43 = vsel %vm6307_vm4, %v7217_v31, %v7218_v62  ;;  %v7270_v0 = vsel %vm6307_vm4, %v7216_v16, %v7217_v31  ;;  %v7222_v41 = vrot.slane %v10058_v5, 1  ;;  %v8157_v17 = vrot.slane %v8024_v6, 1 }
 0x2fc   : > { %v7408_v30 = vadd.f32 %v7270_v0, %v11623_v52  ;;  %v7409_v13 = vadd.f32 %v7269_v43, %v11626_v60  ;;  %v7085_v37 = vpop.f32.mrf.mxu1  ;;  %v10128_v50 = vpop.f32.mrf.mxu0  ;;  %v8156_v52 = vrot.slane %v8021_v58, 1 }
 0x2fd   : > { %v7220_v10 = vrot.slane %v7085_v37, 1  ;;  %v8201_v45 = vsel %vm6307_vm4, %v8157_v17, %v8158_v24  ;;  %v8162_v32 = vrot.slane %v10128_v50, 1 }
 0x2fe   : > { %v8344_v18 = vadd.f32 %v8206_v11, %v7408_v30  ;;  %v8345_v49 = vadd.f32 %v8205_v48, %v7409_v13  ;;  %v10059_v57 = vpop.f32.mrf.mxu1  ;;  %v8037_v60 = vpop.f32.mrf.mxu0  ;;  %v8202_v15 = vsel %vm6307_vm4, %v8156_v52, %v8157_v17 }
 0x300   : > { %v8486_v3 = vmax.f32 %v8344_v18, 0.0  ;;  %v8487_v36 = vmax.f32 %v8345_v49, 0.0  ;;  %v7088_v35 = vpop.f32.mrf.mxu1  ;;  %v10129_v4 = vpop.f32.mrf.mxu0 }
 0x301   : > { %v7221_v29 = vrot.slane %v7088_v35, 1 }
 0x302   : > { %8518 = vst [vmem:[%s11702_s12 + $0x90] sm:$0xff] %v8486_v3  ;;  %8519 = vst [vmem:[%s11702_s12 + $0x98] sm:$0xff] %v8487_v36  ;;  %v10062_v47 = vpop.f32.mrf.mxu1  ;;  %v8040_v28 = vpop.f32.mrf.mxu0 }
 0x303   : > { %v7265_v46 = vsel %vm6307_vm4, %v7221_v29, %v7222_v41  ;;  %v7266_v33 = vsel %vm6307_vm4, %v7220_v10, %v7221_v29  ;;  %v7226_v61 = vrot.slane %v10062_v47, 1  ;;  %v8161_v34 = vrot.slane %v8040_v28, 1 }
 0x304   : > { %v7412_v42 = vadd.f32 %v7266_v33, %v11633_v9  ;;  %v7413_v59 = vadd.f32 %v7265_v46, %v11636_v51  ;;  %v7101_v39 = vpop.f32.mrf.mxu1  ;;  %v10132_v40 = vpop.f32.mrf.mxu0  ;;  %v8160_v9 = vrot.slane %v8037_v60, 1 }
 0x305   : > { %v7224_v63 = vrot.slane %v7101_v39, 1  ;;  %v8197_v0 = vsel %vm6307_vm4, %v8161_v34, %v8162_v32  ;;  %v8166_v11 = vrot.slane %v10132_v40, 1 }
 0x306   : > { %v8348_v54 = vadd.f32 %v8202_v15, %v7412_v42  ;;  %v8349_v19 = vadd.f32 %v8201_v45, %v7413_v59  ;;  %v10063_v56 = vpop.f32.mrf.mxu1  ;;  %v8053_v51 = vpop.f32.mrf.mxu0  ;;  %v8198_v30 = vsel %vm6307_vm4, %v8160_v9, %v8161_v34 }
 0x308   : > { %v8488_v7 = vmax.f32 %v8348_v54, 0.0  ;;  %v8489_v55 = vmax.f32 %v8349_v19, 0.0  ;;  %v7104_v14 = vpop.f32.mrf.mxu1  ;;  %v10133_v62 = vpop.f32.mrf.mxu0 }
 0x309   : > { %v7225_v44 = vrot.slane %v7104_v14, 1 }
 0x30a   : > { %8520 = vst [vmem:[%s11702_s12 + $0xa0] sm:$0xff] %v8488_v7  ;;  %8521 = vst [vmem:[%s11702_s12 + $0xa8] sm:$0xff] %v8489_v55  ;;  %v10066_v58 = vpop.f32.mrf.mxu1  ;;  %v8056_v43 = vpop.f32.mrf.mxu0 }
 0x30b   : > { %v7261_v16 = vsel %vm6307_vm4, %v7225_v44, %v7226_v61  ;;  %v7262_v26 = vsel %vm6307_vm4, %v7224_v63, %v7225_v44  ;;  %v7230_v50 = vrot.slane %v10066_v58, 1  ;;  %v8165_v3 = vrot.slane %v8056_v43, 1 }
 0x30c   : > { %v7416_v31 = vadd.f32 %v7262_v26, %v11643_v53  ;;  %v7417_v5 = vadd.f32 %v7261_v16, %v11646_v20  ;;  %v7117_v23 = vpop.f32.mrf.mxu1  ;;  %v10136_v48 = vpop.f32.mrf.mxu0  ;;  %v8164_v53 = vrot.slane %v8053_v51, 1 }
 0x30d   : > { %v7228_v24 = vrot.slane %v7117_v23, 1  ;;  %v8193_v4 = vsel %vm6307_vm4, %v8165_v3, %v8166_v11  ;;  %v8170_v28 = vrot.slane %v10136_v48, 1 }
 0x30e   : > { %v8352_v13 = vadd.f32 %v8198_v30, %v7416_v31  ;;  %v8353_v37 = vadd.f32 %v8197_v0, %v7417_v5  ;;  %v10067_v6 = vpop.f32.mrf.mxu1  ;;  %v8069_v20 = vpop.f32.mrf.mxu0  ;;  %v8194_v46 = vsel %vm6307_vm4, %v8164_v53, %v8165_v3 }
 0x310   : > { %v8490_v18 = vmax.f32 %v8352_v13, 0.0  ;;  %v8491_v49 = vmax.f32 %v8353_v37, 0.0  ;;  %v7120_v57 = vpop.f32.mrf.mxu1  ;;  %v10137_v35 = vpop.f32.mrf.mxu0 }
 0x311   : > { %v7229_v36 = vrot.slane %v7120_v57, 1 }
 0x312   : > { %8522 = vst [vmem:[%s11702_s12 + $0xb0] sm:$0xff] %v8490_v18  ;;  %8523 = vst [vmem:[%s11702_s12 + $0xb8] sm:$0xff] %v8491_v49  ;;  %v10070_v52 = vpop.f32.mrf.mxu1  ;;  %v8072_v47 = vpop.f32.mrf.mxu0 }
 0x313   : > { %v7257_v60 = vsel %vm6307_vm4, %v7229_v36, %v7230_v50  ;;  %v7258_v41 = vsel %vm6307_vm4, %v7228_v24, %v7229_v36  ;;  %v7234_v19 = vrot.slane %v10070_v52, 1  ;;  %v8169_v40 = vrot.slane %v8072_v47, 1 }
 0x314   : > { %v7420_v10 = vadd.f32 %v7258_v41, %v11653_v1  ;;  %v7421_v17 = vadd.f32 %v7257_v60, %v11656_v27  ;;  %v7133_v29 = vpop.f32.mrf.mxu1  ;;  %v10140_v39 = vpop.f32.mrf.mxu0  ;;  %v8168_v1 = vrot.slane %v8069_v20, 1 }
 0x315   : > { %v7232_v56 = vrot.slane %v7133_v29, 1  ;;  %v8189_v44 = vsel %vm6307_vm4, %v8169_v40, %v8170_v28  ;;  %v8174_v5 = vrot.slane %v10140_v39, 1 }
 0x316   : > { %v8356_v33 = vadd.f32 %v8194_v46, %v7420_v10  ;;  %v8357_v42 = vadd.f32 %v8193_v4, %v7421_v17  ;;  %v10071_v59 = vpop.f32.mrf.mxu1  ;;  %v8085_v27 = vpop.f32.mrf.mxu0  ;;  %v8190_v58 = vsel %vm6307_vm4, %v8168_v1, %v8169_v40 }
 0x318   : > { %v8492_v45 = vmax.f32 %v8356_v33, 0.0  ;;  %v8493_v15 = vmax.f32 %v8357_v42, 0.0  ;;  %v7136_v54 = vpop.f32.mrf.mxu1  ;;  %v10141_v55 = vpop.f32.mrf.mxu0 }
 0x319   : > { %v7233_v32 = vrot.slane %v7136_v54, 1 }
 0x31a   : > { %8524 = vst [vmem:[%s11702_s12 + $0xc0] sm:$0xff] %v8492_v45  ;;  %8525 = vst [vmem:[%s11702_s12 + $0xc8] sm:$0xff] %v8493_v15  ;;  %v10074_v7 = vpop.f32.mrf.mxu1  ;;  %v8088_v34 = vpop.f32.mrf.mxu0 }
 0x31b   : > { %v7253_v9 = vsel %vm6307_vm4, %v7233_v32, %v7234_v19  ;;  %v7254_v14 = vsel %vm6307_vm4, %v7232_v56, %v7233_v32  ;;  %v7238_v30 = vrot.slane %v10074_v7, 1  ;;  %v8173_v37 = vrot.slane %v8088_v34, 1 }
 0x31c   : > { %v7424_v51 = vadd.f32 %v7254_v14, %v11663_v2  ;;  %v7425_v61 = vadd.f32 %v7253_v9, %v11666_v12  ;;  %v7149_v63 = vpop.f32.mrf.mxu1  ;;  %v10144_v31 = vpop.f32.mrf.mxu0  ;;  %v8172_v2 = vrot.slane %v8085_v27, 1 }
 0x31d   : > { %v7236_v13 = vrot.slane %v7149_v63, 1  ;;  %v8185_v50 = vsel %vm6307_vm4, %v8173_v37, %v8174_v5  ;;  %v8178_v60 = vrot.slane %v10144_v31, 1 }
 0x31e   : > { %v8360_v62 = vadd.f32 %v8190_v58, %v7424_v51  ;;  %v8361_v16 = vadd.f32 %v8189_v44, %v7425_v61  ;;  %v10075_v26 = vpop.f32.mrf.mxu1  ;;  %v8101_v12 = vpop.f32.mrf.mxu0  ;;  %v8186_v24 = vsel %vm6307_vm4, %v8172_v2, %v8173_v37 }
 0x31f   : > { %v8176_v17 = vrot.slane %v8101_v12, 1 }
 0x320   : > { %v8494_v23 = vmax.f32 %v8360_v62, 0.0  ;;  %v8495_v43 = vmax.f32 %v8361_v16, 0.0  ;;  %v7152_v0 = vpop.f32.mrf.mxu1  ;;  %v10145_v11 = vpop.f32.mrf.mxu0 }
 0x321   : > { %v7237_v6 = vrot.slane %v7152_v0, 1 }
 0x322   : > { %8526 = vst [vmem:[%s11702_s12 + $0xd0] sm:$0xff] %v8494_v23  ;;  %8527 = vst [vmem:[%s11702_s12 + $0xd8] sm:$0xff] %v8495_v43  ;;  %v10078_v48 = vpop.f32.mrf.mxu1  ;;  %v8104_v52 = vpop.f32.mrf.mxu0 }
 0x323   : > { %v7249_v18 = vsel %vm6307_vm4, %v7237_v6, %v7238_v30  ;;  %v7250_v49 = vsel %vm6307_vm4, %v7236_v13, %v7237_v6  ;;  %v7242_v29 = vrot.slane %v10078_v48, 1  ;;  %v8177_v47 = vrot.slane %v8104_v52, 1 }
 0x324   : > { %v7428_v53 = vadd.f32 %v7250_v49, %v11673_v22  ;;  %v7429_v57 = vadd.f32 %v7249_v18, %v11676_v8  ;;  %v7165_v20 = vpop.f32.mrf.mxu1 }
 0x325   : > { %v7240_v8 = vrot.slane %v7165_v20, 1  ;;  %v8181_v39 = vsel %vm6307_vm4, %v8177_v47, %v8178_v60  ;;  %v8182_v28 = vsel %vm6307_vm4, %v8176_v17, %v8177_v47 }
 0x326   : > { %v8364_v3 = vadd.f32 %v8186_v24, %v7428_v53  ;;  %v8365_v36 = vadd.f32 %v8185_v50, %v7429_v57  ;;  %v10079_v35 = vpop.f32.mrf.mxu1 }
 0x328   : > { %v8496_v41 = vmax.f32 %v8364_v3, 0.0  ;;  %v8497_v10 = vmax.f32 %v8365_v36, 0.0  ;;  %v7168_v22 = vpop.f32.mrf.mxu1 }
 0x329   : > { %v7241_v4 = vrot.slane %v7168_v22, 1 }
 0x32a   : > { %8528 = vst [vmem:[%s11702_s12 + $0xe0] sm:$0xff] %v8496_v41  ;;  %8529 = vst [vmem:[%s11702_s12 + $0xe8] sm:$0xff] %v8497_v10 }
 0x32b   : > { %v7245_v46 = vsel %vm6307_vm4, %v7241_v4, %v7242_v29  ;;  %v7246_v33 = vsel %vm6307_vm4, %v7240_v8, %v7241_v4 }
 0x32c   : > { %v7432_v42 = vadd.f32 %v7246_v33, %v11683_v25  ;;  %v7433_v59 = vadd.f32 %v7245_v46, %v11686_v38 }
 0x32e   : > { %v8368_v45 = vadd.f32 %v8182_v28, %v7432_v42  ;;  %v8369_v15 = vadd.f32 %v8181_v39, %v7433_v59 }
 0x330   : > { %v8498_v1 = vmax.f32 %v8368_v45, 0.0  ;;  %v8499_v54 = vmax.f32 %v8369_v15, 0.0 }
 0x332   : > { %8530 = vst [vmem:[%s11702_s12 + $0xf0] sm:$0xff] %v8498_v1  ;;  %8531 = vst [vmem:[%s11702_s12 + $0xf8] sm:$0xff] %v8499_v54 }
 0x333 PF: > { %s13_s14 = sadd.s32 1, %s10496_s14   ;;  %s11899_s12 = smov %s10492_s13 }
 0x334   : > { %p10_p5 = scmp.ge.s32.totalorder %s13_s14, 4   ;;  %s11900_s13 = smov %s11902_s15 }
 0x336   :  { %12 = sbr.rel (!%p10_p5) target bundleno = 2 (0x2), region = 82 }

</bundles_post_ra>
